<compile_context>
chip_gen: v7x
topology: tpu7x:2x2x1
jax: 0.10.0
libtpu: 0.0.40
codegen_flags: <defaults>
</compile_context>

<pallas_src>
import numpy as np
import jax
import jax.numpy as jnp
from jax import lax
from jax.experimental import pallas as pl
from jax.experimental.pallas import tpu as pltpu


# ----------------------------------------------------------------------------- glue
def _ac_lerp_coords(in_size, out_size):
    """Source indices/weights for bilinear resize with align_corners=True."""
    if in_size == 1:
        z = np.zeros((out_size,), np.int32)
        return z, z, np.zeros((out_size,), np.float32)
    src = np.arange(out_size, dtype=np.float64) * (in_size - 1) / (out_size - 1)
    i0 = np.clip(np.floor(src).astype(np.int64), 0, in_size - 1)
    i1 = np.clip(i0 + 1, 0, in_size - 1)
    w = (src - i0).astype(np.float32)
    return i0.astype(np.int32), i1.astype(np.int32), w


def bilinear_upsample_x2_ac(x):
    """(N, C, H, W) -> (N, C, 2H, 2W); bilinear, align_corners=True (torch)."""
    N, C, H, W = x.shape
    h0, h1, hw = _ac_lerp_coords(H, 2 * H)
    w0, w1, ww = _ac_lerp_coords(W, 2 * W)
    xh = (x[:, :, h0, :] * (1.0 - hw)[None, None, :, None]
          + x[:, :, h1, :] * hw[None, None, :, None])
    xw = (xh[:, :, :, w0] * (1.0 - ww)[None, None, None, :]
          + xh[:, :, :, w1] * ww[None, None, None, :])
    return xw


def crop(residual, output_shape):
    """Identical integer arithmetic to the torch `crop` helper."""
    mh = residual.shape[2] // 2
    sh = mh - output_shape[2] // 2
    eh = sh + output_shape[2]
    mw = residual.shape[3] // 2
    sw = mw - output_shape[3] // 2
    ew = sw + output_shape[3]
    return residual[:, :, sh:eh, sw:ew]


# --------------------------------------------------------------------------- kernel
def expanding_kernel(xu_ref, skip_ref,
                     w1_ref, b1_ref, w2_ref, b2_ref, w3_ref, b3_ref,
                     o_ref):
    # xu_ref:   (C,  Hu, L0)  upsampled input, batch folded into lanes (L0 = N*Wu)
    # skip_ref: (Ch, H1, L1)  cropped residual in the same lane frame (L1 = L0-1)
    # w*/b*:    flat float32 params, PyTorch OIHW order           (SMEM scalars)
    # o_ref:    (Ch, H3, L3)  full output frame (valid cols per batch extracted
    #                         by the wrapper)
    C, Hu, L0 = xu_ref.shape
    Ch, H1, L1 = skip_ref.shape
    _, H3, L3 = o_ref.shape
    H2, L2 = H1 - 2, L1 - 2
    Cin2 = 2 * Ch

    def conv(feats, w_ref, b_ref, n_out, n_in, k, h_out, l_out, relu):
        # Loop order (ci, dh, dw) outer / co inner: each shifted window is
        # materialized once and reused for all output channels.
        accs = [jnp.zeros((h_out, l_out), jnp.float32) + b_ref[co]
                for co in range(n_out)]
        for ci in range(n_in):
            for dh in range(k):
                for dw in range(k):
                    win = feats[ci][dh:dh + h_out, dw:dw + l_out]   # hoisted slice
                    for co in range(n_out):
                        wv = w_ref[((co * n_in + ci) * k + dh) * k + dw]
                        accs[co] = accs[co] + wv * win
        if relu:
            accs = [jnp.maximum(a, 0.0) for a in accs]
        return accs

    xu = [xu_ref[c] for c in range(C)]                    # C planes of (Hu, L0)

    # --- conv1: 2x2 VALID, C -> Ch ---
    y1 = conv(xu, w1_ref, b1_ref, Ch, C, 2, H1, L1, relu=False)

    # channel concat([conv1_out, skip]) realized by feeding planes in cat order
    feats = y1 + [skip_ref[c] for c in range(Ch)]

    # --- conv2: 3x3 VALID, 2*Ch -> Ch, + ReLU ---
    y2 = conv(feats, w2_ref, b2_ref, Ch, Cin2, 3, H2, L2, relu=True)

    # --- conv3: 3x3 VALID, Ch -> Ch, + ReLU ---
    y3 = conv(y2, w3_ref, b3_ref, Ch, Ch, 3, H3, L3, relu=True)

    # Single lane-dense store of the whole output slab.
    o_ref[...] = jnp.stack(y3, axis=0)


# -------------------------------------------------------------------------- wrapper
def expanding_forward(x, residual, params):
    N, C, H, W = x.shape
    Ch = C // 2
    Hu, Wu = 2 * H, 2 * W
    H1, W1 = Hu - 1, Wu - 1
    H3, W3 = Hu - 5, Wu - 5
    L0 = N * Wu                     # batch folded into lanes
    L1, L3 = L0 - 1, L0 - 5

    xu = bilinear_upsample_x2_ac(x).astype(jnp.float32)            # (N, C, Hu, Wu)
    skip = crop(residual, (N, Ch, H1, W1)).astype(jnp.float32)     # (N, Ch, H1, W1)

    # Layout plumbing (XLA glue): fold batch into the lane axis.
    xu_k = jnp.transpose(xu, (1, 2, 0, 3)).reshape(C, Hu, L0)      # (C, Hu, N*Wu)
    skip_t = jnp.transpose(skip, (1, 2, 0, 3))                     # (Ch, H1, N, W1)
    skip_p = jnp.pad(skip_t, ((0, 0), (0, 0), (0, 0), (0, Wu - W1)))
    skip_k = skip_p.reshape(Ch, H1, L0)[:, :, :L1]                 # (Ch, H1, L1)

    flat = lambda a: a.reshape(-1).astype(jnp.float32)
    args = (xu_k, skip_k,
            flat(params["w1"]), flat(params["b1"]),
            flat(params["w2"]), flat(params["b2"]),
            flat(params["w3"]), flat(params["b3"]))

    smem = pl.BlockSpec(memory_space=pltpu.MemorySpace.SMEM)
    grid_spec = pltpu.PrefetchScalarGridSpec(
        num_scalar_prefetch=0,
        grid=(1,),                                   # single step: all N at once
        in_specs=[
            pl.BlockSpec((C, Hu, L0), lambda i: (0, 0, 0)),
            pl.BlockSpec((Ch, H1, L1), lambda i: (0, 0, 0)),
            smem, smem, smem, smem, smem, smem,
        ],
        out_specs=pl.BlockSpec((Ch, H3, L3), lambda i: (0, 0, 0)),
    )
    out_f = pl.pallas_call(
        expanding_kernel,
        out_shape=jax.ShapeDtypeStruct((Ch, H3, L3), jnp.float32),
        grid_spec=grid_spec,
        compiler_params=pltpu.CompilerParams(dimension_semantics=("arbitrary",)),
    )(*args)

    # Unfold batches from lanes: batch n lives at frame columns [n*Wu, n*Wu+W3).
    outs = [out_f[:, :, n * Wu:n * Wu + W3] for n in range(N)]
    return jnp.stack(outs, axis=0)                                 # (N, Ch, H3, W3)


# ------------------------------------------------------------------- pure-JAX ref
def _interp_matrix(in_size, out_size):
    i0, i1, w = _ac_lerp_coords(in_size, out_size)
    M = np.zeros((out_size, in_size), np.float32)
    M[np.arange(out_size), i0] += 1.0 - w
    M[np.arange(out_size), i1] += w
    return jnp.asarray(M)


def reference_forward(x, residual, params):
    N, C, H, W = x.shape
    hp = lax.Precision.HIGHEST
    A = _interp_matrix(H, 2 * H)
    B = _interp_matrix(W, 2 * W)
    xu = jnp.einsum("ph,nchw->ncpw", A, x, precision=hp)
    xu = jnp.einsum("qw,ncpw->ncpq", B, xu, precision=hp)
    dn = ("NCHW", "OIHW", "NCHW")
    y = lax.conv_general_dilated(xu, params["w1"], (1, 1), "VALID",
                                 dimension_numbers=dn, precision=hp)
    y = y + params["b1"][None, :, None, None]
    skip = crop(residual, y.shape)
    y = jnp.concatenate([y, skip], axis=1)
    y = lax.conv_general_dilated(y, params["w2"], (1, 1), "VALID",
                                 dimension_numbers=dn, precision=hp)
    y = jnp.maximum(y + params["b2"][None, :, None, None], 0.0)
    y = lax.conv_general_dilated(y, params["w3"], (1, 1), "VALID",
                                 dimension_numbers=dn, precision=hp)
    y = jnp.maximum(y + params["b3"][None, :, None, None], 0.0)
    return y


# ----------------------------------------------------------------------------- main
if __name__ == "__main__":
    key = jax.random.PRNGKey(0)
    ks = jax.random.split(key, 8)

    N, C, H, W = 2, 4, 16, 16        # x: NCHW
    Ch = C // 2
    Hr, Wr = 36, 36                  # residual spatial extent (>= 2H-1 = 31)

    x = jax.random.normal(ks[0], (N, C, H, W), jnp.float32)
    residual = jax.random.normal(ks[1], (N, Ch, Hr, Wr), jnp.float32)

    # Deterministic synthetic parameters, PyTorch Conv2d layout (out, in, kh, kw).
    params = {
        "w1": 0.25 * jax.random.normal(ks[2], (Ch, C, 2, 2), jnp.float32),
        "b1": 0.10 * jax.random.normal(ks[3], (Ch,), jnp.float32),
        "w2": 0.25 * jax.random.normal(ks[4], (Ch, 2 * Ch, 3, 3), jnp.float32),
        "b2": 0.10 * jax.random.normal(ks[5], (Ch,), jnp.float32),
        "w3": 0.25 * jax.random.normal(ks[6], (Ch, Ch, 3, 3), jnp.float32),
        "b3": 0.10 * jax.random.normal(ks[7], (Ch,), jnp.float32),
    }

    out = jax.block_until_ready(expanding_forward(x, residual, params))
    assert out.shape == (N, Ch, 2 * H - 5, 2 * W - 5), out.shape

    ref = jax.block_until_ready(reference_forward(x, residual, params))
    np.testing.assert_allclose(np.asarray(out), np.asarray(ref), rtol=1e-4, atol=1e-4)

    print("KERNEL_OK")
</pallas_src>

<mosaic_0001>
module attributes {stable_mosaic.version = 11 : i64} {
  func.func @expanding_kernel(%arg0: i32, %arg1: memref<4x32x64xf32, #tpu.memory_space<vmem>>, %arg2: memref<2x31x63xf32, #tpu.memory_space<vmem>>, %arg3: memref<32xf32, #tpu.memory_space<smem>>, %arg4: memref<2xf32, #tpu.memory_space<smem>>, %arg5: memref<72xf32, #tpu.memory_space<smem>>, %arg6: memref<2xf32, #tpu.memory_space<smem>>, %arg7: memref<36xf32, #tpu.memory_space<smem>>, %arg8: memref<2xf32, #tpu.memory_space<smem>>, %arg9: memref<2x27x59xf32, #tpu.memory_space<vmem>>) attributes {dimension_semantics = [#tpu.dimension_semantics<arbitrary>], iteration_bounds = array<i64: 1>, scalar_prefetch = 0 : i64, scratch_operands = 0 : i64, tpu.core_type = #tpu.core_type<tc>, window_params = [{pipeline_mode = #tpu.pipeline_mode<synchronous>, transform_indices = @transform_0, window_bounds = array<i64: 4, 32, 64>}, {pipeline_mode = #tpu.pipeline_mode<synchronous>, transform_indices = @transform_1, window_bounds = array<i64: 2, 31, 63>}, {transform_indices = @transform_2, window_bounds = array<i64: 32>}, {transform_indices = @transform_3, window_bounds = array<i64: 2>}, {transform_indices = @transform_4, window_bounds = array<i64: 72>}, {transform_indices = @transform_5, window_bounds = array<i64: 2>}, {transform_indices = @transform_6, window_bounds = array<i64: 36>}, {transform_indices = @transform_7, window_bounds = array<i64: 2>}, {pipeline_mode = #tpu.pipeline_mode<synchronous>, transform_indices = @transform_8, window_bounds = array<i64: 2, 27, 59>}]} {
    %c0 = arith.constant 0 : index
    %c0_0 = arith.constant 0 : index
    %c0_1 = arith.constant 0 : index
    %0 = vector.load %arg1[%c0, %c0_0, %c0_1] : memref<4x32x64xf32, #tpu.memory_space<vmem>>, vector<1x32x64xf32>
    %1 = vector.shape_cast %0 : vector<1x32x64xf32> to vector<32x64xf32>
    %c1 = arith.constant 1 : index
    %c0_2 = arith.constant 0 : index
    %c0_3 = arith.constant 0 : index
    %2 = vector.load %arg1[%c1, %c0_2, %c0_3] : memref<4x32x64xf32, #tpu.memory_space<vmem>>, vector<1x32x64xf32>
    %3 = vector.shape_cast %2 : vector<1x32x64xf32> to vector<32x64xf32>
    %c2 = arith.constant 2 : index
    %c0_4 = arith.constant 0 : index
    %c0_5 = arith.constant 0 : index
    %4 = vector.load %arg1[%c2, %c0_4, %c0_5] : memref<4x32x64xf32, #tpu.memory_space<vmem>>, vector<1x32x64xf32>
    %5 = vector.shape_cast %4 : vector<1x32x64xf32> to vector<32x64xf32>
    %c3 = arith.constant 3 : index
    %c0_6 = arith.constant 0 : index
    %c0_7 = arith.constant 0 : index
    %6 = vector.load %arg1[%c3, %c0_6, %c0_7] : memref<4x32x64xf32, #tpu.memory_space<vmem>>, vector<1x32x64xf32>
    %7 = vector.shape_cast %6 : vector<1x32x64xf32> to vector<32x64xf32>
    %cst = arith.constant 0.000000e+00 : f32
    %8 = vector.broadcast %cst : f32 to vector<31x63xf32>
    %c0_8 = arith.constant 0 : index
    %9 = memref.load %arg4[%c0_8] : memref<2xf32, #tpu.memory_space<smem>>
    %10 = vector.broadcast %9 : f32 to vector<31x63xf32>
    %11 = arith.addf %8, %10 : vector<31x63xf32>
    %cst_9 = arith.constant 0.000000e+00 : f32
    %12 = vector.broadcast %cst_9 : f32 to vector<31x63xf32>
    %c1_10 = arith.constant 1 : index
    %13 = memref.load %arg4[%c1_10] : memref<2xf32, #tpu.memory_space<smem>>
    %14 = vector.broadcast %13 : f32 to vector<31x63xf32>
    %15 = arith.addf %12, %14 : vector<31x63xf32>
    %16 = vector.extract_strided_slice %1 {offsets = [0, 0], sizes = [31, 63], strides = [1, 1]} : vector<32x64xf32> to vector<31x63xf32>
    %c0_11 = arith.constant 0 : index
    %17 = memref.load %arg3[%c0_11] : memref<32xf32, #tpu.memory_space<smem>>
    %18 = vector.broadcast %17 : f32 to vector<31x63xf32>
    %19 = arith.mulf %18, %16 : vector<31x63xf32>
    %20 = arith.addf %11, %19 : vector<31x63xf32>
    %c16 = arith.constant 16 : index
    %21 = memref.load %arg3[%c16] : memref<32xf32, #tpu.memory_space<smem>>
    %22 = vector.broadcast %21 : f32 to vector<31x63xf32>
    %23 = arith.mulf %22, %16 : vector<31x63xf32>
    %24 = arith.addf %15, %23 : vector<31x63xf32>
    %25 = vector.extract_strided_slice %1 {offsets = [0, 1], sizes = [31, 63], strides = [1, 1]} : vector<32x64xf32> to vector<31x63xf32>
    %c1_12 = arith.constant 1 : index
    %26 = memref.load %arg3[%c1_12] : memref<32xf32, #tpu.memory_space<smem>>
    %27 = vector.broadcast %26 : f32 to vector<31x63xf32>
    %28 = arith.mulf %27, %25 : vector<31x63xf32>
    %29 = arith.addf %20, %28 : vector<31x63xf32>
    %c17 = arith.constant 17 : index
    %30 = memref.load %arg3[%c17] : memref<32xf32, #tpu.memory_space<smem>>
    %31 = vector.broadcast %30 : f32 to vector<31x63xf32>
    %32 = arith.mulf %31, %25 : vector<31x63xf32>
    %33 = arith.addf %24, %32 : vector<31x63xf32>
    %34 = vector.extract_strided_slice %1 {offsets = [1, 0], sizes = [31, 63], strides = [1, 1]} : vector<32x64xf32> to vector<31x63xf32>
    %c2_13 = arith.constant 2 : index
    %35 = memref.load %arg3[%c2_13] : memref<32xf32, #tpu.memory_space<smem>>
    %36 = vector.broadcast %35 : f32 to vector<31x63xf32>
    %37 = arith.mulf %36, %34 : vector<31x63xf32>
    %38 = arith.addf %29, %37 : vector<31x63xf32>
    %c18 = arith.constant 18 : index
    %39 = memref.load %arg3[%c18] : memref<32xf32, #tpu.memory_space<smem>>
    %40 = vector.broadcast %39 : f32 to vector<31x63xf32>
    %41 = arith.mulf %40, %34 : vector<31x63xf32>
    %42 = arith.addf %33, %41 : vector<31x63xf32>
    %43 = vector.extract_strided_slice %1 {offsets = [1, 1], sizes = [31, 63], strides = [1, 1]} : vector<32x64xf32> to vector<31x63xf32>
    %c3_14 = arith.constant 3 : index
    %44 = memref.load %arg3[%c3_14] : memref<32xf32, #tpu.memory_space<smem>>
    %45 = vector.broadcast %44 : f32 to vector<31x63xf32>
    %46 = arith.mulf %45, %43 : vector<31x63xf32>
    %47 = arith.addf %38, %46 : vector<31x63xf32>
    %c19 = arith.constant 19 : index
    %48 = memref.load %arg3[%c19] : memref<32xf32, #tpu.memory_space<smem>>
    %49 = vector.broadcast %48 : f32 to vector<31x63xf32>
    %50 = arith.mulf %49, %43 : vector<31x63xf32>
    %51 = arith.addf %42, %50 : vector<31x63xf32>
    %52 = vector.extract_strided_slice %3 {offsets = [0, 0], sizes = [31, 63], strides = [1, 1]} : vector<32x64xf32> to vector<31x63xf32>
    %c4 = arith.constant 4 : index
    %53 = memref.load %arg3[%c4] : memref<32xf32, #tpu.memory_space<smem>>
    %54 = vector.broadcast %53 : f32 to vector<31x63xf32>
    %55 = arith.mulf %54, %52 : vector<31x63xf32>
    %56 = arith.addf %47, %55 : vector<31x63xf32>
    %c20 = arith.constant 20 : index
    %57 = memref.load %arg3[%c20] : memref<32xf32, #tpu.memory_space<smem>>
    %58 = vector.broadcast %57 : f32 to vector<31x63xf32>
    %59 = arith.mulf %58, %52 : vector<31x63xf32>
    %60 = arith.addf %51, %59 : vector<31x63xf32>
    %61 = vector.extract_strided_slice %3 {offsets = [0, 1], sizes = [31, 63], strides = [1, 1]} : vector<32x64xf32> to vector<31x63xf32>
    %c5 = arith.constant 5 : index
    %62 = memref.load %arg3[%c5] : memref<32xf32, #tpu.memory_space<smem>>
    %63 = vector.broadcast %62 : f32 to vector<31x63xf32>
    %64 = arith.mulf %63, %61 : vector<31x63xf32>
    %65 = arith.addf %56, %64 : vector<31x63xf32>
    %c21 = arith.constant 21 : index
    %66 = memref.load %arg3[%c21] : memref<32xf32, #tpu.memory_space<smem>>
    %67 = vector.broadcast %66 : f32 to vector<31x63xf32>
    %68 = arith.mulf %67, %61 : vector<31x63xf32>
    %69 = arith.addf %60, %68 : vector<31x63xf32>
    %70 = vector.extract_strided_slice %3 {offsets = [1, 0], sizes = [31, 63], strides = [1, 1]} : vector<32x64xf32> to vector<31x63xf32>
    %c6 = arith.constant 6 : index
    %71 = memref.load %arg3[%c6] : memref<32xf32, #tpu.memory_space<smem>>
    %72 = vector.broadcast %71 : f32 to vector<31x63xf32>
    %73 = arith.mulf %72, %70 : vector<31x63xf32>
    %74 = arith.addf %65, %73 : vector<31x63xf32>
    %c22 = arith.constant 22 : index
    %75 = memref.load %arg3[%c22] : memref<32xf32, #tpu.memory_space<smem>>
    %76 = vector.broadcast %75 : f32 to vector<31x63xf32>
    %77 = arith.mulf %76, %70 : vector<31x63xf32>
    %78 = arith.addf %69, %77 : vector<31x63xf32>
    %79 = vector.extract_strided_slice %3 {offsets = [1, 1], sizes = [31, 63], strides = [1, 1]} : vector<32x64xf32> to vector<31x63xf32>
    %c7 = arith.constant 7 : index
    %80 = memref.load %arg3[%c7] : memref<32xf32, #tpu.memory_space<smem>>
    %81 = vector.broadcast %80 : f32 to vector<31x63xf32>
    %82 = arith.mulf %81, %79 : vector<31x63xf32>
    %83 = arith.addf %74, %82 : vector<31x63xf32>
    %c23 = arith.constant 23 : index
    %84 = memref.load %arg3[%c23] : memref<32xf32, #tpu.memory_space<smem>>
    %85 = vector.broadcast %84 : f32 to vector<31x63xf32>
    %86 = arith.mulf %85, %79 : vector<31x63xf32>
    %87 = arith.addf %78, %86 : vector<31x63xf32>
    %88 = vector.extract_strided_slice %5 {offsets = [0, 0], sizes = [31, 63], strides = [1, 1]} : vector<32x64xf32> to vector<31x63xf32>
    %c8 = arith.constant 8 : index
    %89 = memref.load %arg3[%c8] : memref<32xf32, #tpu.memory_space<smem>>
    %90 = vector.broadcast %89 : f32 to vector<31x63xf32>
    %91 = arith.mulf %90, %88 : vector<31x63xf32>
    %92 = arith.addf %83, %91 : vector<31x63xf32>
    %c24 = arith.constant 24 : index
    %93 = memref.load %arg3[%c24] : memref<32xf32, #tpu.memory_space<smem>>
    %94 = vector.broadcast %93 : f32 to vector<31x63xf32>
    %95 = arith.mulf %94, %88 : vector<31x63xf32>
    %96 = arith.addf %87, %95 : vector<31x63xf32>
    %97 = vector.extract_strided_slice %5 {offsets = [0, 1], sizes = [31, 63], strides = [1, 1]} : vector<32x64xf32> to vector<31x63xf32>
    %c9 = arith.constant 9 : index
    %98 = memref.load %arg3[%c9] : memref<32xf32, #tpu.memory_space<smem>>
    %99 = vector.broadcast %98 : f32 to vector<31x63xf32>
    %100 = arith.mulf %99, %97 : vector<31x63xf32>
    %101 = arith.addf %92, %100 : vector<31x63xf32>
    %c25 = arith.constant 25 : index
    %102 = memref.load %arg3[%c25] : memref<32xf32, #tpu.memory_space<smem>>
    %103 = vector.broadcast %102 : f32 to vector<31x63xf32>
    %104 = arith.mulf %103, %97 : vector<31x63xf32>
    %105 = arith.addf %96, %104 : vector<31x63xf32>
    %106 = vector.extract_strided_slice %5 {offsets = [1, 0], sizes = [31, 63], strides = [1, 1]} : vector<32x64xf32> to vector<31x63xf32>
    %c10 = arith.constant 10 : index
    %107 = memref.load %arg3[%c10] : memref<32xf32, #tpu.memory_space<smem>>
    %108 = vector.broadcast %107 : f32 to vector<31x63xf32>
    %109 = arith.mulf %108, %106 : vector<31x63xf32>
    %110 = arith.addf %101, %109 : vector<31x63xf32>
    %c26 = arith.constant 26 : index
    %111 = memref.load %arg3[%c26] : memref<32xf32, #tpu.memory_space<smem>>
    %112 = vector.broadcast %111 : f32 to vector<31x63xf32>
    %113 = arith.mulf %112, %106 : vector<31x63xf32>
    %114 = arith.addf %105, %113 : vector<31x63xf32>
    %115 = vector.extract_strided_slice %5 {offsets = [1, 1], sizes = [31, 63], strides = [1, 1]} : vector<32x64xf32> to vector<31x63xf32>
    %c11 = arith.constant 11 : index
    %116 = memref.load %arg3[%c11] : memref<32xf32, #tpu.memory_space<smem>>
    %117 = vector.broadcast %116 : f32 to vector<31x63xf32>
    %118 = arith.mulf %117, %115 : vector<31x63xf32>
    %119 = arith.addf %110, %118 : vector<31x63xf32>
    %c27 = arith.constant 27 : index
    %120 = memref.load %arg3[%c27] : memref<32xf32, #tpu.memory_space<smem>>
    %121 = vector.broadcast %120 : f32 to vector<31x63xf32>
    %122 = arith.mulf %121, %115 : vector<31x63xf32>
    %123 = arith.addf %114, %122 : vector<31x63xf32>
    %124 = vector.extract_strided_slice %7 {offsets = [0, 0], sizes = [31, 63], strides = [1, 1]} : vector<32x64xf32> to vector<31x63xf32>
    %c12 = arith.constant 12 : index
    %125 = memref.load %arg3[%c12] : memref<32xf32, #tpu.memory_space<smem>>
    %126 = vector.broadcast %125 : f32 to vector<31x63xf32>
    %127 = arith.mulf %126, %124 : vector<31x63xf32>
    %128 = arith.addf %119, %127 : vector<31x63xf32>
    %c28 = arith.constant 28 : index
    %129 = memref.load %arg3[%c28] : memref<32xf32, #tpu.memory_space<smem>>
    %130 = vector.broadcast %129 : f32 to vector<31x63xf32>
    %131 = arith.mulf %130, %124 : vector<31x63xf32>
    %132 = arith.addf %123, %131 : vector<31x63xf32>
    %133 = vector.extract_strided_slice %7 {offsets = [0, 1], sizes = [31, 63], strides = [1, 1]} : vector<32x64xf32> to vector<31x63xf32>
    %c13 = arith.constant 13 : index
    %134 = memref.load %arg3[%c13] : memref<32xf32, #tpu.memory_space<smem>>
    %135 = vector.broadcast %134 : f32 to vector<31x63xf32>
    %136 = arith.mulf %135, %133 : vector<31x63xf32>
    %137 = arith.addf %128, %136 : vector<31x63xf32>
    %c29 = arith.constant 29 : index
    %138 = memref.load %arg3[%c29] : memref<32xf32, #tpu.memory_space<smem>>
    %139 = vector.broadcast %138 : f32 to vector<31x63xf32>
    %140 = arith.mulf %139, %133 : vector<31x63xf32>
    %141 = arith.addf %132, %140 : vector<31x63xf32>
    %142 = vector.extract_strided_slice %7 {offsets = [1, 0], sizes = [31, 63], strides = [1, 1]} : vector<32x64xf32> to vector<31x63xf32>
    %c14 = arith.constant 14 : index
    %143 = memref.load %arg3[%c14] : memref<32xf32, #tpu.memory_space<smem>>
    %144 = vector.broadcast %143 : f32 to vector<31x63xf32>
    %145 = arith.mulf %144, %142 : vector<31x63xf32>
    %146 = arith.addf %137, %145 : vector<31x63xf32>
    %c30 = arith.constant 30 : index
    %147 = memref.load %arg3[%c30] : memref<32xf32, #tpu.memory_space<smem>>
    %148 = vector.broadcast %147 : f32 to vector<31x63xf32>
    %149 = arith.mulf %148, %142 : vector<31x63xf32>
    %150 = arith.addf %141, %149 : vector<31x63xf32>
    %151 = vector.extract_strided_slice %7 {offsets = [1, 1], sizes = [31, 63], strides = [1, 1]} : vector<32x64xf32> to vector<31x63xf32>
    %c15 = arith.constant 15 : index
    %152 = memref.load %arg3[%c15] : memref<32xf32, #tpu.memory_space<smem>>
    %153 = vector.broadcast %152 : f32 to vector<31x63xf32>
    %154 = arith.mulf %153, %151 : vector<31x63xf32>
    %155 = arith.addf %146, %154 : vector<31x63xf32>
    %c31 = arith.constant 31 : index
    %156 = memref.load %arg3[%c31] : memref<32xf32, #tpu.memory_space<smem>>
    %157 = vector.broadcast %156 : f32 to vector<31x63xf32>
    %158 = arith.mulf %157, %151 : vector<31x63xf32>
    %159 = arith.addf %150, %158 : vector<31x63xf32>
    %c0_15 = arith.constant 0 : index
    %c0_16 = arith.constant 0 : index
    %c0_17 = arith.constant 0 : index
    %160 = vector.load %arg2[%c0_15, %c0_16, %c0_17] : memref<2x31x63xf32, #tpu.memory_space<vmem>>, vector<1x31x63xf32>
    %161 = vector.shape_cast %160 : vector<1x31x63xf32> to vector<31x63xf32>
    %c1_18 = arith.constant 1 : index
    %c0_19 = arith.constant 0 : index
    %c0_20 = arith.constant 0 : index
    %162 = vector.load %arg2[%c1_18, %c0_19, %c0_20] : memref<2x31x63xf32, #tpu.memory_space<vmem>>, vector<1x31x63xf32>
    %163 = vector.shape_cast %162 : vector<1x31x63xf32> to vector<31x63xf32>
    %cst_21 = arith.constant 0.000000e+00 : f32
    %164 = vector.broadcast %cst_21 : f32 to vector<29x61xf32>
    %c0_22 = arith.constant 0 : index
    %165 = memref.load %arg6[%c0_22] : memref<2xf32, #tpu.memory_space<smem>>
    %166 = vector.broadcast %165 : f32 to vector<29x61xf32>
    %167 = arith.addf %164, %166 : vector<29x61xf32>
    %cst_23 = arith.constant 0.000000e+00 : f32
    %168 = vector.broadcast %cst_23 : f32 to vector<29x61xf32>
    %c1_24 = arith.constant 1 : index
    %169 = memref.load %arg6[%c1_24] : memref<2xf32, #tpu.memory_space<smem>>
    %170 = vector.broadcast %169 : f32 to vector<29x61xf32>
    %171 = arith.addf %168, %170 : vector<29x61xf32>
    %172 = vector.extract_strided_slice %155 {offsets = [0, 0], sizes = [29, 61], strides = [1, 1]} : vector<31x63xf32> to vector<29x61xf32>
    %c0_25 = arith.constant 0 : index
    %173 = memref.load %arg5[%c0_25] : memref<72xf32, #tpu.memory_space<smem>>
    %174 = vector.broadcast %173 : f32 to vector<29x61xf32>
    %175 = arith.mulf %174, %172 : vector<29x61xf32>
    %176 = arith.addf %167, %175 : vector<29x61xf32>
    %c36 = arith.constant 36 : index
    %177 = memref.load %arg5[%c36] : memref<72xf32, #tpu.memory_space<smem>>
    %178 = vector.broadcast %177 : f32 to vector<29x61xf32>
    %179 = arith.mulf %178, %172 : vector<29x61xf32>
    %180 = arith.addf %171, %179 : vector<29x61xf32>
    %181 = vector.extract_strided_slice %155 {offsets = [0, 1], sizes = [29, 61], strides = [1, 1]} : vector<31x63xf32> to vector<29x61xf32>
    %c1_26 = arith.constant 1 : index
    %182 = memref.load %arg5[%c1_26] : memref<72xf32, #tpu.memory_space<smem>>
    %183 = vector.broadcast %182 : f32 to vector<29x61xf32>
    %184 = arith.mulf %183, %181 : vector<29x61xf32>
    %185 = arith.addf %176, %184 : vector<29x61xf32>
    %c37 = arith.constant 37 : index
    %186 = memref.load %arg5[%c37] : memref<72xf32, #tpu.memory_space<smem>>
    %187 = vector.broadcast %186 : f32 to vector<29x61xf32>
    %188 = arith.mulf %187, %181 : vector<29x61xf32>
    %189 = arith.addf %180, %188 : vector<29x61xf32>
    %190 = vector.extract_strided_slice %155 {offsets = [0, 2], sizes = [29, 61], strides = [1, 1]} : vector<31x63xf32> to vector<29x61xf32>
    %c2_27 = arith.constant 2 : index
    %191 = memref.load %arg5[%c2_27] : memref<72xf32, #tpu.memory_space<smem>>
    %192 = vector.broadcast %191 : f32 to vector<29x61xf32>
    %193 = arith.mulf %192, %190 : vector<29x61xf32>
    %194 = arith.addf %185, %193 : vector<29x61xf32>
    %c38 = arith.constant 38 : index
    %195 = memref.load %arg5[%c38] : memref<72xf32, #tpu.memory_space<smem>>
    %196 = vector.broadcast %195 : f32 to vector<29x61xf32>
    %197 = arith.mulf %196, %190 : vector<29x61xf32>
    %198 = arith.addf %189, %197 : vector<29x61xf32>
    %199 = vector.extract_strided_slice %155 {offsets = [1, 0], sizes = [29, 61], strides = [1, 1]} : vector<31x63xf32> to vector<29x61xf32>
    %c3_28 = arith.constant 3 : index
    %200 = memref.load %arg5[%c3_28] : memref<72xf32, #tpu.memory_space<smem>>
    %201 = vector.broadcast %200 : f32 to vector<29x61xf32>
    %202 = arith.mulf %201, %199 : vector<29x61xf32>
    %203 = arith.addf %194, %202 : vector<29x61xf32>
    %c39 = arith.constant 39 : index
    %204 = memref.load %arg5[%c39] : memref<72xf32, #tpu.memory_space<smem>>
    %205 = vector.broadcast %204 : f32 to vector<29x61xf32>
    %206 = arith.mulf %205, %199 : vector<29x61xf32>
    %207 = arith.addf %198, %206 : vector<29x61xf32>
    %208 = vector.extract_strided_slice %155 {offsets = [1, 1], sizes = [29, 61], strides = [1, 1]} : vector<31x63xf32> to vector<29x61xf32>
    %c4_29 = arith.constant 4 : index
    %209 = memref.load %arg5[%c4_29] : memref<72xf32, #tpu.memory_space<smem>>
    %210 = vector.broadcast %209 : f32 to vector<29x61xf32>
    %211 = arith.mulf %210, %208 : vector<29x61xf32>
    %212 = arith.addf %203, %211 : vector<29x61xf32>
    %c40 = arith.constant 40 : index
    %213 = memref.load %arg5[%c40] : memref<72xf32, #tpu.memory_space<smem>>
    %214 = vector.broadcast %213 : f32 to vector<29x61xf32>
    %215 = arith.mulf %214, %208 : vector<29x61xf32>
    %216 = arith.addf %207, %215 : vector<29x61xf32>
    %217 = vector.extract_strided_slice %155 {offsets = [1, 2], sizes = [29, 61], strides = [1, 1]} : vector<31x63xf32> to vector<29x61xf32>
    %c5_30 = arith.constant 5 : index
    %218 = memref.load %arg5[%c5_30] : memref<72xf32, #tpu.memory_space<smem>>
    %219 = vector.broadcast %218 : f32 to vector<29x61xf32>
    %220 = arith.mulf %219, %217 : vector<29x61xf32>
    %221 = arith.addf %212, %220 : vector<29x61xf32>
    %c41 = arith.constant 41 : index
    %222 = memref.load %arg5[%c41] : memref<72xf32, #tpu.memory_space<smem>>
    %223 = vector.broadcast %222 : f32 to vector<29x61xf32>
    %224 = arith.mulf %223, %217 : vector<29x61xf32>
    %225 = arith.addf %216, %224 : vector<29x61xf32>
    %226 = vector.extract_strided_slice %155 {offsets = [2, 0], sizes = [29, 61], strides = [1, 1]} : vector<31x63xf32> to vector<29x61xf32>
    %c6_31 = arith.constant 6 : index
    %227 = memref.load %arg5[%c6_31] : memref<72xf32, #tpu.memory_space<smem>>
    %228 = vector.broadcast %227 : f32 to vector<29x61xf32>
    %229 = arith.mulf %228, %226 : vector<29x61xf32>
    %230 = arith.addf %221, %229 : vector<29x61xf32>
    %c42 = arith.constant 42 : index
    %231 = memref.load %arg5[%c42] : memref<72xf32, #tpu.memory_space<smem>>
    %232 = vector.broadcast %231 : f32 to vector<29x61xf32>
    %233 = arith.mulf %232, %226 : vector<29x61xf32>
    %234 = arith.addf %225, %233 : vector<29x61xf32>
    %235 = vector.extract_strided_slice %155 {offsets = [2, 1], sizes = [29, 61], strides = [1, 1]} : vector<31x63xf32> to vector<29x61xf32>
    %c7_32 = arith.constant 7 : index
    %236 = memref.load %arg5[%c7_32] : memref<72xf32, #tpu.memory_space<smem>>
    %237 = vector.broadcast %236 : f32 to vector<29x61xf32>
    %238 = arith.mulf %237, %235 : vector<29x61xf32>
    %239 = arith.addf %230, %238 : vector<29x61xf32>
    %c43 = arith.constant 43 : index
    %240 = memref.load %arg5[%c43] : memref<72xf32, #tpu.memory_space<smem>>
    %241 = vector.broadcast %240 : f32 to vector<29x61xf32>
    %242 = arith.mulf %241, %235 : vector<29x61xf32>
    %243 = arith.addf %234, %242 : vector<29x61xf32>
    %244 = vector.extract_strided_slice %155 {offsets = [2, 2], sizes = [29, 61], strides = [1, 1]} : vector<31x63xf32> to vector<29x61xf32>
    %c8_33 = arith.constant 8 : index
    %245 = memref.load %arg5[%c8_33] : memref<72xf32, #tpu.memory_space<smem>>
    %246 = vector.broadcast %245 : f32 to vector<29x61xf32>
    %247 = arith.mulf %246, %244 : vector<29x61xf32>
    %248 = arith.addf %239, %247 : vector<29x61xf32>
    %c44 = arith.constant 44 : index
    %249 = memref.load %arg5[%c44] : memref<72xf32, #tpu.memory_space<smem>>
    %250 = vector.broadcast %249 : f32 to vector<29x61xf32>
    %251 = arith.mulf %250, %244 : vector<29x61xf32>
    %252 = arith.addf %243, %251 : vector<29x61xf32>
    %253 = vector.extract_strided_slice %159 {offsets = [0, 0], sizes = [29, 61], strides = [1, 1]} : vector<31x63xf32> to vector<29x61xf32>
    %c9_34 = arith.constant 9 : index
    %254 = memref.load %arg5[%c9_34] : memref<72xf32, #tpu.memory_space<smem>>
    %255 = vector.broadcast %254 : f32 to vector<29x61xf32>
    %256 = arith.mulf %255, %253 : vector<29x61xf32>
    %257 = arith.addf %248, %256 : vector<29x61xf32>
    %c45 = arith.constant 45 : index
    %258 = memref.load %arg5[%c45] : memref<72xf32, #tpu.memory_space<smem>>
    %259 = vector.broadcast %258 : f32 to vector<29x61xf32>
    %260 = arith.mulf %259, %253 : vector<29x61xf32>
    %261 = arith.addf %252, %260 : vector<29x61xf32>
    %262 = vector.extract_strided_slice %159 {offsets = [0, 1], sizes = [29, 61], strides = [1, 1]} : vector<31x63xf32> to vector<29x61xf32>
    %c10_35 = arith.constant 10 : index
    %263 = memref.load %arg5[%c10_35] : memref<72xf32, #tpu.memory_space<smem>>
    %264 = vector.broadcast %263 : f32 to vector<29x61xf32>
    %265 = arith.mulf %264, %262 : vector<29x61xf32>
    %266 = arith.addf %257, %265 : vector<29x61xf32>
    %c46 = arith.constant 46 : index
    %267 = memref.load %arg5[%c46] : memref<72xf32, #tpu.memory_space<smem>>
    %268 = vector.broadcast %267 : f32 to vector<29x61xf32>
    %269 = arith.mulf %268, %262 : vector<29x61xf32>
    %270 = arith.addf %261, %269 : vector<29x61xf32>
    %271 = vector.extract_strided_slice %159 {offsets = [0, 2], sizes = [29, 61], strides = [1, 1]} : vector<31x63xf32> to vector<29x61xf32>
    %c11_36 = arith.constant 11 : index
    %272 = memref.load %arg5[%c11_36] : memref<72xf32, #tpu.memory_space<smem>>
    %273 = vector.broadcast %272 : f32 to vector<29x61xf32>
    %274 = arith.mulf %273, %271 : vector<29x61xf32>
    %275 = arith.addf %266, %274 : vector<29x61xf32>
    %c47 = arith.constant 47 : index
    %276 = memref.load %arg5[%c47] : memref<72xf32, #tpu.memory_space<smem>>
    %277 = vector.broadcast %276 : f32 to vector<29x61xf32>
    %278 = arith.mulf %277, %271 : vector<29x61xf32>
    %279 = arith.addf %270, %278 : vector<29x61xf32>
    %280 = vector.extract_strided_slice %159 {offsets = [1, 0], sizes = [29, 61], strides = [1, 1]} : vector<31x63xf32> to vector<29x61xf32>
    %c12_37 = arith.constant 12 : index
    %281 = memref.load %arg5[%c12_37] : memref<72xf32, #tpu.memory_space<smem>>
    %282 = vector.broadcast %281 : f32 to vector<29x61xf32>
    %283 = arith.mulf %282, %280 : vector<29x61xf32>
    %284 = arith.addf %275, %283 : vector<29x61xf32>
    %c48 = arith.constant 48 : index
    %285 = memref.load %arg5[%c48] : memref<72xf32, #tpu.memory_space<smem>>
    %286 = vector.broadcast %285 : f32 to vector<29x61xf32>
    %287 = arith.mulf %286, %280 : vector<29x61xf32>
    %288 = arith.addf %279, %287 : vector<29x61xf32>
    %289 = vector.extract_strided_slice %159 {offsets = [1, 1], sizes = [29, 61], strides = [1, 1]} : vector<31x63xf32> to vector<29x61xf32>
    %c13_38 = arith.constant 13 : index
    %290 = memref.load %arg5[%c13_38] : memref<72xf32, #tpu.memory_space<smem>>
    %291 = vector.broadcast %290 : f32 to vector<29x61xf32>
    %292 = arith.mulf %291, %289 : vector<29x61xf32>
    %293 = arith.addf %284, %292 : vector<29x61xf32>
    %c49 = arith.constant 49 : index
    %294 = memref.load %arg5[%c49] : memref<72xf32, #tpu.memory_space<smem>>
    %295 = vector.broadcast %294 : f32 to vector<29x61xf32>
    %296 = arith.mulf %295, %289 : vector<29x61xf32>
    %297 = arith.addf %288, %296 : vector<29x61xf32>
    %298 = vector.extract_strided_slice %159 {offsets = [1, 2], sizes = [29, 61], strides = [1, 1]} : vector<31x63xf32> to vector<29x61xf32>
    %c14_39 = arith.constant 14 : index
    %299 = memref.load %arg5[%c14_39] : memref<72xf32, #tpu.memory_space<smem>>
    %300 = vector.broadcast %299 : f32 to vector<29x61xf32>
    %301 = arith.mulf %300, %298 : vector<29x61xf32>
    %302 = arith.addf %293, %301 : vector<29x61xf32>
    %c50 = arith.constant 50 : index
    %303 = memref.load %arg5[%c50] : memref<72xf32, #tpu.memory_space<smem>>
    %304 = vector.broadcast %303 : f32 to vector<29x61xf32>
    %305 = arith.mulf %304, %298 : vector<29x61xf32>
    %306 = arith.addf %297, %305 : vector<29x61xf32>
    %307 = vector.extract_strided_slice %159 {offsets = [2, 0], sizes = [29, 61], strides = [1, 1]} : vector<31x63xf32> to vector<29x61xf32>
    %c15_40 = arith.constant 15 : index
    %308 = memref.load %arg5[%c15_40] : memref<72xf32, #tpu.memory_space<smem>>
    %309 = vector.broadcast %308 : f32 to vector<29x61xf32>
    %310 = arith.mulf %309, %307 : vector<29x61xf32>
    %311 = arith.addf %302, %310 : vector<29x61xf32>
    %c51 = arith.constant 51 : index
    %312 = memref.load %arg5[%c51] : memref<72xf32, #tpu.memory_space<smem>>
    %313 = vector.broadcast %312 : f32 to vector<29x61xf32>
    %314 = arith.mulf %313, %307 : vector<29x61xf32>
    %315 = arith.addf %306, %314 : vector<29x61xf32>
    %316 = vector.extract_strided_slice %159 {offsets = [2, 1], sizes = [29, 61], strides = [1, 1]} : vector<31x63xf32> to vector<29x61xf32>
    %c16_41 = arith.constant 16 : index
    %317 = memref.load %arg5[%c16_41] : memref<72xf32, #tpu.memory_space<smem>>
    %318 = vector.broadcast %317 : f32 to vector<29x61xf32>
    %319 = arith.mulf %318, %316 : vector<29x61xf32>
    %320 = arith.addf %311, %319 : vector<29x61xf32>
    %c52 = arith.constant 52 : index
    %321 = memref.load %arg5[%c52] : memref<72xf32, #tpu.memory_space<smem>>
    %322 = vector.broadcast %321 : f32 to vector<29x61xf32>
    %323 = arith.mulf %322, %316 : vector<29x61xf32>
    %324 = arith.addf %315, %323 : vector<29x61xf32>
    %325 = vector.extract_strided_slice %159 {offsets = [2, 2], sizes = [29, 61], strides = [1, 1]} : vector<31x63xf32> to vector<29x61xf32>
    %c17_42 = arith.constant 17 : index
    %326 = memref.load %arg5[%c17_42] : memref<72xf32, #tpu.memory_space<smem>>
    %327 = vector.broadcast %326 : f32 to vector<29x61xf32>
    %328 = arith.mulf %327, %325 : vector<29x61xf32>
    %329 = arith.addf %320, %328 : vector<29x61xf32>
    %c53 = arith.constant 53 : index
    %330 = memref.load %arg5[%c53] : memref<72xf32, #tpu.memory_space<smem>>
    %331 = vector.broadcast %330 : f32 to vector<29x61xf32>
    %332 = arith.mulf %331, %325 : vector<29x61xf32>
    %333 = arith.addf %324, %332 : vector<29x61xf32>
    %334 = vector.extract_strided_slice %161 {offsets = [0, 0], sizes = [29, 61], strides = [1, 1]} : vector<31x63xf32> to vector<29x61xf32>
    %c18_43 = arith.constant 18 : index
    %335 = memref.load %arg5[%c18_43] : memref<72xf32, #tpu.memory_space<smem>>
    %336 = vector.broadcast %335 : f32 to vector<29x61xf32>
    %337 = arith.mulf %336, %334 : vector<29x61xf32>
    %338 = arith.addf %329, %337 : vector<29x61xf32>
    %c54 = arith.constant 54 : index
    %339 = memref.load %arg5[%c54] : memref<72xf32, #tpu.memory_space<smem>>
    %340 = vector.broadcast %339 : f32 to vector<29x61xf32>
    %341 = arith.mulf %340, %334 : vector<29x61xf32>
    %342 = arith.addf %333, %341 : vector<29x61xf32>
    %343 = vector.extract_strided_slice %161 {offsets = [0, 1], sizes = [29, 61], strides = [1, 1]} : vector<31x63xf32> to vector<29x61xf32>
    %c19_44 = arith.constant 19 : index
    %344 = memref.load %arg5[%c19_44] : memref<72xf32, #tpu.memory_space<smem>>
    %345 = vector.broadcast %344 : f32 to vector<29x61xf32>
    %346 = arith.mulf %345, %343 : vector<29x61xf32>
    %347 = arith.addf %338, %346 : vector<29x61xf32>
    %c55 = arith.constant 55 : index
    %348 = memref.load %arg5[%c55] : memref<72xf32, #tpu.memory_space<smem>>
    %349 = vector.broadcast %348 : f32 to vector<29x61xf32>
    %350 = arith.mulf %349, %343 : vector<29x61xf32>
    %351 = arith.addf %342, %350 : vector<29x61xf32>
    %352 = vector.extract_strided_slice %161 {offsets = [0, 2], sizes = [29, 61], strides = [1, 1]} : vector<31x63xf32> to vector<29x61xf32>
    %c20_45 = arith.constant 20 : index
    %353 = memref.load %arg5[%c20_45] : memref<72xf32, #tpu.memory_space<smem>>
    %354 = vector.broadcast %353 : f32 to vector<29x61xf32>
    %355 = arith.mulf %354, %352 : vector<29x61xf32>
    %356 = arith.addf %347, %355 : vector<29x61xf32>
    %c56 = arith.constant 56 : index
    %357 = memref.load %arg5[%c56] : memref<72xf32, #tpu.memory_space<smem>>
    %358 = vector.broadcast %357 : f32 to vector<29x61xf32>
    %359 = arith.mulf %358, %352 : vector<29x61xf32>
    %360 = arith.addf %351, %359 : vector<29x61xf32>
    %361 = vector.extract_strided_slice %161 {offsets = [1, 0], sizes = [29, 61], strides = [1, 1]} : vector<31x63xf32> to vector<29x61xf32>
    %c21_46 = arith.constant 21 : index
    %362 = memref.load %arg5[%c21_46] : memref<72xf32, #tpu.memory_space<smem>>
    %363 = vector.broadcast %362 : f32 to vector<29x61xf32>
    %364 = arith.mulf %363, %361 : vector<29x61xf32>
    %365 = arith.addf %356, %364 : vector<29x61xf32>
    %c57 = arith.constant 57 : index
    %366 = memref.load %arg5[%c57] : memref<72xf32, #tpu.memory_space<smem>>
    %367 = vector.broadcast %366 : f32 to vector<29x61xf32>
    %368 = arith.mulf %367, %361 : vector<29x61xf32>
    %369 = arith.addf %360, %368 : vector<29x61xf32>
    %370 = vector.extract_strided_slice %161 {offsets = [1, 1], sizes = [29, 61], strides = [1, 1]} : vector<31x63xf32> to vector<29x61xf32>
    %c22_47 = arith.constant 22 : index
    %371 = memref.load %arg5[%c22_47] : memref<72xf32, #tpu.memory_space<smem>>
    %372 = vector.broadcast %371 : f32 to vector<29x61xf32>
    %373 = arith.mulf %372, %370 : vector<29x61xf32>
    %374 = arith.addf %365, %373 : vector<29x61xf32>
    %c58 = arith.constant 58 : index
    %375 = memref.load %arg5[%c58] : memref<72xf32, #tpu.memory_space<smem>>
    %376 = vector.broadcast %375 : f32 to vector<29x61xf32>
    %377 = arith.mulf %376, %370 : vector<29x61xf32>
    %378 = arith.addf %369, %377 : vector<29x61xf32>
    %379 = vector.extract_strided_slice %161 {offsets = [1, 2], sizes = [29, 61], strides = [1, 1]} : vector<31x63xf32> to vector<29x61xf32>
    %c23_48 = arith.constant 23 : index
    %380 = memref.load %arg5[%c23_48] : memref<72xf32, #tpu.memory_space<smem>>
    %381 = vector.broadcast %380 : f32 to vector<29x61xf32>
    %382 = arith.mulf %381, %379 : vector<29x61xf32>
    %383 = arith.addf %374, %382 : vector<29x61xf32>
    %c59 = arith.constant 59 : index
    %384 = memref.load %arg5[%c59] : memref<72xf32, #tpu.memory_space<smem>>
    %385 = vector.broadcast %384 : f32 to vector<29x61xf32>
    %386 = arith.mulf %385, %379 : vector<29x61xf32>
    %387 = arith.addf %378, %386 : vector<29x61xf32>
    %388 = vector.extract_strided_slice %161 {offsets = [2, 0], sizes = [29, 61], strides = [1, 1]} : vector<31x63xf32> to vector<29x61xf32>
    %c24_49 = arith.constant 24 : index
    %389 = memref.load %arg5[%c24_49] : memref<72xf32, #tpu.memory_space<smem>>
    %390 = vector.broadcast %389 : f32 to vector<29x61xf32>
    %391 = arith.mulf %390, %388 : vector<29x61xf32>
    %392 = arith.addf %383, %391 : vector<29x61xf32>
    %c60 = arith.constant 60 : index
    %393 = memref.load %arg5[%c60] : memref<72xf32, #tpu.memory_space<smem>>
    %394 = vector.broadcast %393 : f32 to vector<29x61xf32>
    %395 = arith.mulf %394, %388 : vector<29x61xf32>
    %396 = arith.addf %387, %395 : vector<29x61xf32>
    %397 = vector.extract_strided_slice %161 {offsets = [2, 1], sizes = [29, 61], strides = [1, 1]} : vector<31x63xf32> to vector<29x61xf32>
    %c25_50 = arith.constant 25 : index
    %398 = memref.load %arg5[%c25_50] : memref<72xf32, #tpu.memory_space<smem>>
    %399 = vector.broadcast %398 : f32 to vector<29x61xf32>
    %400 = arith.mulf %399, %397 : vector<29x61xf32>
    %401 = arith.addf %392, %400 : vector<29x61xf32>
    %c61 = arith.constant 61 : index
    %402 = memref.load %arg5[%c61] : memref<72xf32, #tpu.memory_space<smem>>
    %403 = vector.broadcast %402 : f32 to vector<29x61xf32>
    %404 = arith.mulf %403, %397 : vector<29x61xf32>
    %405 = arith.addf %396, %404 : vector<29x61xf32>
    %406 = vector.extract_strided_slice %161 {offsets = [2, 2], sizes = [29, 61], strides = [1, 1]} : vector<31x63xf32> to vector<29x61xf32>
    %c26_51 = arith.constant 26 : index
    %407 = memref.load %arg5[%c26_51] : memref<72xf32, #tpu.memory_space<smem>>
    %408 = vector.broadcast %407 : f32 to vector<29x61xf32>
    %409 = arith.mulf %408, %406 : vector<29x61xf32>
    %410 = arith.addf %401, %409 : vector<29x61xf32>
    %c62 = arith.constant 62 : index
    %411 = memref.load %arg5[%c62] : memref<72xf32, #tpu.memory_space<smem>>
    %412 = vector.broadcast %411 : f32 to vector<29x61xf32>
    %413 = arith.mulf %412, %406 : vector<29x61xf32>
    %414 = arith.addf %405, %413 : vector<29x61xf32>
    %415 = vector.extract_strided_slice %163 {offsets = [0, 0], sizes = [29, 61], strides = [1, 1]} : vector<31x63xf32> to vector<29x61xf32>
    %c27_52 = arith.constant 27 : index
    %416 = memref.load %arg5[%c27_52] : memref<72xf32, #tpu.memory_space<smem>>
    %417 = vector.broadcast %416 : f32 to vector<29x61xf32>
    %418 = arith.mulf %417, %415 : vector<29x61xf32>
    %419 = arith.addf %410, %418 : vector<29x61xf32>
    %c63 = arith.constant 63 : index
    %420 = memref.load %arg5[%c63] : memref<72xf32, #tpu.memory_space<smem>>
    %421 = vector.broadcast %420 : f32 to vector<29x61xf32>
    %422 = arith.mulf %421, %415 : vector<29x61xf32>
    %423 = arith.addf %414, %422 : vector<29x61xf32>
    %424 = vector.extract_strided_slice %163 {offsets = [0, 1], sizes = [29, 61], strides = [1, 1]} : vector<31x63xf32> to vector<29x61xf32>
    %c28_53 = arith.constant 28 : index
    %425 = memref.load %arg5[%c28_53] : memref<72xf32, #tpu.memory_space<smem>>
    %426 = vector.broadcast %425 : f32 to vector<29x61xf32>
    %427 = arith.mulf %426, %424 : vector<29x61xf32>
    %428 = arith.addf %419, %427 : vector<29x61xf32>
    %c64 = arith.constant 64 : index
    %429 = memref.load %arg5[%c64] : memref<72xf32, #tpu.memory_space<smem>>
    %430 = vector.broadcast %429 : f32 to vector<29x61xf32>
    %431 = arith.mulf %430, %424 : vector<29x61xf32>
    %432 = arith.addf %423, %431 : vector<29x61xf32>
    %433 = vector.extract_strided_slice %163 {offsets = [0, 2], sizes = [29, 61], strides = [1, 1]} : vector<31x63xf32> to vector<29x61xf32>
    %c29_54 = arith.constant 29 : index
    %434 = memref.load %arg5[%c29_54] : memref<72xf32, #tpu.memory_space<smem>>
    %435 = vector.broadcast %434 : f32 to vector<29x61xf32>
    %436 = arith.mulf %435, %433 : vector<29x61xf32>
    %437 = arith.addf %428, %436 : vector<29x61xf32>
    %c65 = arith.constant 65 : index
    %438 = memref.load %arg5[%c65] : memref<72xf32, #tpu.memory_space<smem>>
    %439 = vector.broadcast %438 : f32 to vector<29x61xf32>
    %440 = arith.mulf %439, %433 : vector<29x61xf32>
    %441 = arith.addf %432, %440 : vector<29x61xf32>
    %442 = vector.extract_strided_slice %163 {offsets = [1, 0], sizes = [29, 61], strides = [1, 1]} : vector<31x63xf32> to vector<29x61xf32>
    %c30_55 = arith.constant 30 : index
    %443 = memref.load %arg5[%c30_55] : memref<72xf32, #tpu.memory_space<smem>>
    %444 = vector.broadcast %443 : f32 to vector<29x61xf32>
    %445 = arith.mulf %444, %442 : vector<29x61xf32>
    %446 = arith.addf %437, %445 : vector<29x61xf32>
    %c66 = arith.constant 66 : index
    %447 = memref.load %arg5[%c66] : memref<72xf32, #tpu.memory_space<smem>>
    %448 = vector.broadcast %447 : f32 to vector<29x61xf32>
    %449 = arith.mulf %448, %442 : vector<29x61xf32>
    %450 = arith.addf %441, %449 : vector<29x61xf32>
    %451 = vector.extract_strided_slice %163 {offsets = [1, 1], sizes = [29, 61], strides = [1, 1]} : vector<31x63xf32> to vector<29x61xf32>
    %c31_56 = arith.constant 31 : index
    %452 = memref.load %arg5[%c31_56] : memref<72xf32, #tpu.memory_space<smem>>
    %453 = vector.broadcast %452 : f32 to vector<29x61xf32>
    %454 = arith.mulf %453, %451 : vector<29x61xf32>
    %455 = arith.addf %446, %454 : vector<29x61xf32>
    %c67 = arith.constant 67 : index
    %456 = memref.load %arg5[%c67] : memref<72xf32, #tpu.memory_space<smem>>
    %457 = vector.broadcast %456 : f32 to vector<29x61xf32>
    %458 = arith.mulf %457, %451 : vector<29x61xf32>
    %459 = arith.addf %450, %458 : vector<29x61xf32>
    %460 = vector.extract_strided_slice %163 {offsets = [1, 2], sizes = [29, 61], strides = [1, 1]} : vector<31x63xf32> to vector<29x61xf32>
    %c32 = arith.constant 32 : index
    %461 = memref.load %arg5[%c32] : memref<72xf32, #tpu.memory_space<smem>>
    %462 = vector.broadcast %461 : f32 to vector<29x61xf32>
    %463 = arith.mulf %462, %460 : vector<29x61xf32>
    %464 = arith.addf %455, %463 : vector<29x61xf32>
    %c68 = arith.constant 68 : index
    %465 = memref.load %arg5[%c68] : memref<72xf32, #tpu.memory_space<smem>>
    %466 = vector.broadcast %465 : f32 to vector<29x61xf32>
    %467 = arith.mulf %466, %460 : vector<29x61xf32>
    %468 = arith.addf %459, %467 : vector<29x61xf32>
    %469 = vector.extract_strided_slice %163 {offsets = [2, 0], sizes = [29, 61], strides = [1, 1]} : vector<31x63xf32> to vector<29x61xf32>
    %c33 = arith.constant 33 : index
    %470 = memref.load %arg5[%c33] : memref<72xf32, #tpu.memory_space<smem>>
    %471 = vector.broadcast %470 : f32 to vector<29x61xf32>
    %472 = arith.mulf %471, %469 : vector<29x61xf32>
    %473 = arith.addf %464, %472 : vector<29x61xf32>
    %c69 = arith.constant 69 : index
    %474 = memref.load %arg5[%c69] : memref<72xf32, #tpu.memory_space<smem>>
    %475 = vector.broadcast %474 : f32 to vector<29x61xf32>
    %476 = arith.mulf %475, %469 : vector<29x61xf32>
    %477 = arith.addf %468, %476 : vector<29x61xf32>
    %478 = vector.extract_strided_slice %163 {offsets = [2, 1], sizes = [29, 61], strides = [1, 1]} : vector<31x63xf32> to vector<29x61xf32>
    %c34 = arith.constant 34 : index
    %479 = memref.load %arg5[%c34] : memref<72xf32, #tpu.memory_space<smem>>
    %480 = vector.broadcast %479 : f32 to vector<29x61xf32>
    %481 = arith.mulf %480, %478 : vector<29x61xf32>
    %482 = arith.addf %473, %481 : vector<29x61xf32>
    %c70 = arith.constant 70 : index
    %483 = memref.load %arg5[%c70] : memref<72xf32, #tpu.memory_space<smem>>
    %484 = vector.broadcast %483 : f32 to vector<29x61xf32>
    %485 = arith.mulf %484, %478 : vector<29x61xf32>
    %486 = arith.addf %477, %485 : vector<29x61xf32>
    %487 = vector.extract_strided_slice %163 {offsets = [2, 2], sizes = [29, 61], strides = [1, 1]} : vector<31x63xf32> to vector<29x61xf32>
    %c35 = arith.constant 35 : index
    %488 = memref.load %arg5[%c35] : memref<72xf32, #tpu.memory_space<smem>>
    %489 = vector.broadcast %488 : f32 to vector<29x61xf32>
    %490 = arith.mulf %489, %487 : vector<29x61xf32>
    %491 = arith.addf %482, %490 : vector<29x61xf32>
    %c71 = arith.constant 71 : index
    %492 = memref.load %arg5[%c71] : memref<72xf32, #tpu.memory_space<smem>>
    %493 = vector.broadcast %492 : f32 to vector<29x61xf32>
    %494 = arith.mulf %493, %487 : vector<29x61xf32>
    %495 = arith.addf %486, %494 : vector<29x61xf32>
    %cst_57 = arith.constant 0.000000e+00 : f32
    %496 = vector.broadcast %cst_57 : f32 to vector<29x61xf32>
    %497 = arith.maximumf %491, %496 : vector<29x61xf32>
    %cst_58 = arith.constant 0.000000e+00 : f32
    %498 = vector.broadcast %cst_58 : f32 to vector<29x61xf32>
    %499 = arith.maximumf %495, %498 : vector<29x61xf32>
    %cst_59 = arith.constant 0.000000e+00 : f32
    %500 = vector.broadcast %cst_59 : f32 to vector<27x59xf32>
    %c0_60 = arith.constant 0 : index
    %501 = memref.load %arg8[%c0_60] : memref<2xf32, #tpu.memory_space<smem>>
    %502 = vector.broadcast %501 : f32 to vector<27x59xf32>
    %503 = arith.addf %500, %502 : vector<27x59xf32>
    %cst_61 = arith.constant 0.000000e+00 : f32
    %504 = vector.broadcast %cst_61 : f32 to vector<27x59xf32>
    %c1_62 = arith.constant 1 : index
    %505 = memref.load %arg8[%c1_62] : memref<2xf32, #tpu.memory_space<smem>>
    %506 = vector.broadcast %505 : f32 to vector<27x59xf32>
    %507 = arith.addf %504, %506 : vector<27x59xf32>
    %508 = vector.extract_strided_slice %497 {offsets = [0, 0], sizes = [27, 59], strides = [1, 1]} : vector<29x61xf32> to vector<27x59xf32>
    %c0_63 = arith.constant 0 : index
    %509 = memref.load %arg7[%c0_63] : memref<36xf32, #tpu.memory_space<smem>>
    %510 = vector.broadcast %509 : f32 to vector<27x59xf32>
    %511 = arith.mulf %510, %508 : vector<27x59xf32>
    %512 = arith.addf %503, %511 : vector<27x59xf32>
    %c18_64 = arith.constant 18 : index
    %513 = memref.load %arg7[%c18_64] : memref<36xf32, #tpu.memory_space<smem>>
    %514 = vector.broadcast %513 : f32 to vector<27x59xf32>
    %515 = arith.mulf %514, %508 : vector<27x59xf32>
    %516 = arith.addf %507, %515 : vector<27x59xf32>
    %517 = vector.extract_strided_slice %497 {offsets = [0, 1], sizes = [27, 59], strides = [1, 1]} : vector<29x61xf32> to vector<27x59xf32>
    %c1_65 = arith.constant 1 : index
    %518 = memref.load %arg7[%c1_65] : memref<36xf32, #tpu.memory_space<smem>>
    %519 = vector.broadcast %518 : f32 to vector<27x59xf32>
    %520 = arith.mulf %519, %517 : vector<27x59xf32>
    %521 = arith.addf %512, %520 : vector<27x59xf32>
    %c19_66 = arith.constant 19 : index
    %522 = memref.load %arg7[%c19_66] : memref<36xf32, #tpu.memory_space<smem>>
    %523 = vector.broadcast %522 : f32 to vector<27x59xf32>
    %524 = arith.mulf %523, %517 : vector<27x59xf32>
    %525 = arith.addf %516, %524 : vector<27x59xf32>
    %526 = vector.extract_strided_slice %497 {offsets = [0, 2], sizes = [27, 59], strides = [1, 1]} : vector<29x61xf32> to vector<27x59xf32>
    %c2_67 = arith.constant 2 : index
    %527 = memref.load %arg7[%c2_67] : memref<36xf32, #tpu.memory_space<smem>>
    %528 = vector.broadcast %527 : f32 to vector<27x59xf32>
    %529 = arith.mulf %528, %526 : vector<27x59xf32>
    %530 = arith.addf %521, %529 : vector<27x59xf32>
    %c20_68 = arith.constant 20 : index
    %531 = memref.load %arg7[%c20_68] : memref<36xf32, #tpu.memory_space<smem>>
    %532 = vector.broadcast %531 : f32 to vector<27x59xf32>
    %533 = arith.mulf %532, %526 : vector<27x59xf32>
    %534 = arith.addf %525, %533 : vector<27x59xf32>
    %535 = vector.extract_strided_slice %497 {offsets = [1, 0], sizes = [27, 59], strides = [1, 1]} : vector<29x61xf32> to vector<27x59xf32>
    %c3_69 = arith.constant 3 : index
    %536 = memref.load %arg7[%c3_69] : memref<36xf32, #tpu.memory_space<smem>>
    %537 = vector.broadcast %536 : f32 to vector<27x59xf32>
    %538 = arith.mulf %537, %535 : vector<27x59xf32>
    %539 = arith.addf %530, %538 : vector<27x59xf32>
    %c21_70 = arith.constant 21 : index
    %540 = memref.load %arg7[%c21_70] : memref<36xf32, #tpu.memory_space<smem>>
    %541 = vector.broadcast %540 : f32 to vector<27x59xf32>
    %542 = arith.mulf %541, %535 : vector<27x59xf32>
    %543 = arith.addf %534, %542 : vector<27x59xf32>
    %544 = vector.extract_strided_slice %497 {offsets = [1, 1], sizes = [27, 59], strides = [1, 1]} : vector<29x61xf32> to vector<27x59xf32>
    %c4_71 = arith.constant 4 : index
    %545 = memref.load %arg7[%c4_71] : memref<36xf32, #tpu.memory_space<smem>>
    %546 = vector.broadcast %545 : f32 to vector<27x59xf32>
    %547 = arith.mulf %546, %544 : vector<27x59xf32>
    %548 = arith.addf %539, %547 : vector<27x59xf32>
    %c22_72 = arith.constant 22 : index
    %549 = memref.load %arg7[%c22_72] : memref<36xf32, #tpu.memory_space<smem>>
    %550 = vector.broadcast %549 : f32 to vector<27x59xf32>
    %551 = arith.mulf %550, %544 : vector<27x59xf32>
    %552 = arith.addf %543, %551 : vector<27x59xf32>
    %553 = vector.extract_strided_slice %497 {offsets = [1, 2], sizes = [27, 59], strides = [1, 1]} : vector<29x61xf32> to vector<27x59xf32>
    %c5_73 = arith.constant 5 : index
    %554 = memref.load %arg7[%c5_73] : memref<36xf32, #tpu.memory_space<smem>>
    %555 = vector.broadcast %554 : f32 to vector<27x59xf32>
    %556 = arith.mulf %555, %553 : vector<27x59xf32>
    %557 = arith.addf %548, %556 : vector<27x59xf32>
    %c23_74 = arith.constant 23 : index
    %558 = memref.load %arg7[%c23_74] : memref<36xf32, #tpu.memory_space<smem>>
    %559 = vector.broadcast %558 : f32 to vector<27x59xf32>
    %560 = arith.mulf %559, %553 : vector<27x59xf32>
    %561 = arith.addf %552, %560 : vector<27x59xf32>
    %562 = vector.extract_strided_slice %497 {offsets = [2, 0], sizes = [27, 59], strides = [1, 1]} : vector<29x61xf32> to vector<27x59xf32>
    %c6_75 = arith.constant 6 : index
    %563 = memref.load %arg7[%c6_75] : memref<36xf32, #tpu.memory_space<smem>>
    %564 = vector.broadcast %563 : f32 to vector<27x59xf32>
    %565 = arith.mulf %564, %562 : vector<27x59xf32>
    %566 = arith.addf %557, %565 : vector<27x59xf32>
    %c24_76 = arith.constant 24 : index
    %567 = memref.load %arg7[%c24_76] : memref<36xf32, #tpu.memory_space<smem>>
    %568 = vector.broadcast %567 : f32 to vector<27x59xf32>
    %569 = arith.mulf %568, %562 : vector<27x59xf32>
    %570 = arith.addf %561, %569 : vector<27x59xf32>
    %571 = vector.extract_strided_slice %497 {offsets = [2, 1], sizes = [27, 59], strides = [1, 1]} : vector<29x61xf32> to vector<27x59xf32>
    %c7_77 = arith.constant 7 : index
    %572 = memref.load %arg7[%c7_77] : memref<36xf32, #tpu.memory_space<smem>>
    %573 = vector.broadcast %572 : f32 to vector<27x59xf32>
    %574 = arith.mulf %573, %571 : vector<27x59xf32>
    %575 = arith.addf %566, %574 : vector<27x59xf32>
    %c25_78 = arith.constant 25 : index
    %576 = memref.load %arg7[%c25_78] : memref<36xf32, #tpu.memory_space<smem>>
    %577 = vector.broadcast %576 : f32 to vector<27x59xf32>
    %578 = arith.mulf %577, %571 : vector<27x59xf32>
    %579 = arith.addf %570, %578 : vector<27x59xf32>
    %580 = vector.extract_strided_slice %497 {offsets = [2, 2], sizes = [27, 59], strides = [1, 1]} : vector<29x61xf32> to vector<27x59xf32>
    %c8_79 = arith.constant 8 : index
    %581 = memref.load %arg7[%c8_79] : memref<36xf32, #tpu.memory_space<smem>>
    %582 = vector.broadcast %581 : f32 to vector<27x59xf32>
    %583 = arith.mulf %582, %580 : vector<27x59xf32>
    %584 = arith.addf %575, %583 : vector<27x59xf32>
    %c26_80 = arith.constant 26 : index
    %585 = memref.load %arg7[%c26_80] : memref<36xf32, #tpu.memory_space<smem>>
    %586 = vector.broadcast %585 : f32 to vector<27x59xf32>
    %587 = arith.mulf %586, %580 : vector<27x59xf32>
    %588 = arith.addf %579, %587 : vector<27x59xf32>
    %589 = vector.extract_strided_slice %499 {offsets = [0, 0], sizes = [27, 59], strides = [1, 1]} : vector<29x61xf32> to vector<27x59xf32>
    %c9_81 = arith.constant 9 : index
    %590 = memref.load %arg7[%c9_81] : memref<36xf32, #tpu.memory_space<smem>>
    %591 = vector.broadcast %590 : f32 to vector<27x59xf32>
    %592 = arith.mulf %591, %589 : vector<27x59xf32>
    %593 = arith.addf %584, %592 : vector<27x59xf32>
    %c27_82 = arith.constant 27 : index
    %594 = memref.load %arg7[%c27_82] : memref<36xf32, #tpu.memory_space<smem>>
    %595 = vector.broadcast %594 : f32 to vector<27x59xf32>
    %596 = arith.mulf %595, %589 : vector<27x59xf32>
    %597 = arith.addf %588, %596 : vector<27x59xf32>
    %598 = vector.extract_strided_slice %499 {offsets = [0, 1], sizes = [27, 59], strides = [1, 1]} : vector<29x61xf32> to vector<27x59xf32>
    %c10_83 = arith.constant 10 : index
    %599 = memref.load %arg7[%c10_83] : memref<36xf32, #tpu.memory_space<smem>>
    %600 = vector.broadcast %599 : f32 to vector<27x59xf32>
    %601 = arith.mulf %600, %598 : vector<27x59xf32>
    %602 = arith.addf %593, %601 : vector<27x59xf32>
    %c28_84 = arith.constant 28 : index
    %603 = memref.load %arg7[%c28_84] : memref<36xf32, #tpu.memory_space<smem>>
    %604 = vector.broadcast %603 : f32 to vector<27x59xf32>
    %605 = arith.mulf %604, %598 : vector<27x59xf32>
    %606 = arith.addf %597, %605 : vector<27x59xf32>
    %607 = vector.extract_strided_slice %499 {offsets = [0, 2], sizes = [27, 59], strides = [1, 1]} : vector<29x61xf32> to vector<27x59xf32>
    %c11_85 = arith.constant 11 : index
    %608 = memref.load %arg7[%c11_85] : memref<36xf32, #tpu.memory_space<smem>>
    %609 = vector.broadcast %608 : f32 to vector<27x59xf32>
    %610 = arith.mulf %609, %607 : vector<27x59xf32>
    %611 = arith.addf %602, %610 : vector<27x59xf32>
    %c29_86 = arith.constant 29 : index
    %612 = memref.load %arg7[%c29_86] : memref<36xf32, #tpu.memory_space<smem>>
    %613 = vector.broadcast %612 : f32 to vector<27x59xf32>
    %614 = arith.mulf %613, %607 : vector<27x59xf32>
    %615 = arith.addf %606, %614 : vector<27x59xf32>
    %616 = vector.extract_strided_slice %499 {offsets = [1, 0], sizes = [27, 59], strides = [1, 1]} : vector<29x61xf32> to vector<27x59xf32>
    %c12_87 = arith.constant 12 : index
    %617 = memref.load %arg7[%c12_87] : memref<36xf32, #tpu.memory_space<smem>>
    %618 = vector.broadcast %617 : f32 to vector<27x59xf32>
    %619 = arith.mulf %618, %616 : vector<27x59xf32>
    %620 = arith.addf %611, %619 : vector<27x59xf32>
    %c30_88 = arith.constant 30 : index
    %621 = memref.load %arg7[%c30_88] : memref<36xf32, #tpu.memory_space<smem>>
    %622 = vector.broadcast %621 : f32 to vector<27x59xf32>
    %623 = arith.mulf %622, %616 : vector<27x59xf32>
    %624 = arith.addf %615, %623 : vector<27x59xf32>
    %625 = vector.extract_strided_slice %499 {offsets = [1, 1], sizes = [27, 59], strides = [1, 1]} : vector<29x61xf32> to vector<27x59xf32>
    %c13_89 = arith.constant 13 : index
    %626 = memref.load %arg7[%c13_89] : memref<36xf32, #tpu.memory_space<smem>>
    %627 = vector.broadcast %626 : f32 to vector<27x59xf32>
    %628 = arith.mulf %627, %625 : vector<27x59xf32>
    %629 = arith.addf %620, %628 : vector<27x59xf32>
    %c31_90 = arith.constant 31 : index
    %630 = memref.load %arg7[%c31_90] : memref<36xf32, #tpu.memory_space<smem>>
    %631 = vector.broadcast %630 : f32 to vector<27x59xf32>
    %632 = arith.mulf %631, %625 : vector<27x59xf32>
    %633 = arith.addf %624, %632 : vector<27x59xf32>
    %634 = vector.extract_strided_slice %499 {offsets = [1, 2], sizes = [27, 59], strides = [1, 1]} : vector<29x61xf32> to vector<27x59xf32>
    %c14_91 = arith.constant 14 : index
    %635 = memref.load %arg7[%c14_91] : memref<36xf32, #tpu.memory_space<smem>>
    %636 = vector.broadcast %635 : f32 to vector<27x59xf32>
    %637 = arith.mulf %636, %634 : vector<27x59xf32>
    %638 = arith.addf %629, %637 : vector<27x59xf32>
    %c32_92 = arith.constant 32 : index
    %639 = memref.load %arg7[%c32_92] : memref<36xf32, #tpu.memory_space<smem>>
    %640 = vector.broadcast %639 : f32 to vector<27x59xf32>
    %641 = arith.mulf %640, %634 : vector<27x59xf32>
    %642 = arith.addf %633, %641 : vector<27x59xf32>
    %643 = vector.extract_strided_slice %499 {offsets = [2, 0], sizes = [27, 59], strides = [1, 1]} : vector<29x61xf32> to vector<27x59xf32>
    %c15_93 = arith.constant 15 : index
    %644 = memref.load %arg7[%c15_93] : memref<36xf32, #tpu.memory_space<smem>>
    %645 = vector.broadcast %644 : f32 to vector<27x59xf32>
    %646 = arith.mulf %645, %643 : vector<27x59xf32>
    %647 = arith.addf %638, %646 : vector<27x59xf32>
    %c33_94 = arith.constant 33 : index
    %648 = memref.load %arg7[%c33_94] : memref<36xf32, #tpu.memory_space<smem>>
    %649 = vector.broadcast %648 : f32 to vector<27x59xf32>
    %650 = arith.mulf %649, %643 : vector<27x59xf32>
    %651 = arith.addf %642, %650 : vector<27x59xf32>
    %652 = vector.extract_strided_slice %499 {offsets = [2, 1], sizes = [27, 59], strides = [1, 1]} : vector<29x61xf32> to vector<27x59xf32>
    %c16_95 = arith.constant 16 : index
    %653 = memref.load %arg7[%c16_95] : memref<36xf32, #tpu.memory_space<smem>>
    %654 = vector.broadcast %653 : f32 to vector<27x59xf32>
    %655 = arith.mulf %654, %652 : vector<27x59xf32>
    %656 = arith.addf %647, %655 : vector<27x59xf32>
    %c34_96 = arith.constant 34 : index
    %657 = memref.load %arg7[%c34_96] : memref<36xf32, #tpu.memory_space<smem>>
    %658 = vector.broadcast %657 : f32 to vector<27x59xf32>
    %659 = arith.mulf %658, %652 : vector<27x59xf32>
    %660 = arith.addf %651, %659 : vector<27x59xf32>
    %661 = vector.extract_strided_slice %499 {offsets = [2, 2], sizes = [27, 59], strides = [1, 1]} : vector<29x61xf32> to vector<27x59xf32>
    %c17_97 = arith.constant 17 : index
    %662 = memref.load %arg7[%c17_97] : memref<36xf32, #tpu.memory_space<smem>>
    %663 = vector.broadcast %662 : f32 to vector<27x59xf32>
    %664 = arith.mulf %663, %661 : vector<27x59xf32>
    %665 = arith.addf %656, %664 : vector<27x59xf32>
    %c35_98 = arith.constant 35 : index
    %666 = memref.load %arg7[%c35_98] : memref<36xf32, #tpu.memory_space<smem>>
    %667 = vector.broadcast %666 : f32 to vector<27x59xf32>
    %668 = arith.mulf %667, %661 : vector<27x59xf32>
    %669 = arith.addf %660, %668 : vector<27x59xf32>
    %cst_99 = arith.constant 0.000000e+00 : f32
    %670 = vector.broadcast %cst_99 : f32 to vector<27x59xf32>
    %671 = arith.maximumf %665, %670 : vector<27x59xf32>
    %cst_100 = arith.constant 0.000000e+00 : f32
    %672 = vector.broadcast %cst_100 : f32 to vector<27x59xf32>
    %673 = arith.maximumf %669, %672 : vector<27x59xf32>
    %674 = vector.shape_cast %671 : vector<27x59xf32> to vector<1x27x59xf32>
    %675 = vector.shape_cast %673 : vector<27x59xf32> to vector<1x27x59xf32>
    %676 = tpu.concatenate %674, %675 in 0 : vector<1x27x59xf32>, vector<1x27x59xf32> -> vector<2x27x59xf32>
    %c0_101 = arith.constant 0 : index
    %c0_102 = arith.constant 0 : index
    %c0_103 = arith.constant 0 : index
    %677 = vector.load %arg9[%c0_101, %c0_102, %c0_103] : memref<2x27x59xf32, #tpu.memory_space<vmem>>, vector<2x27x59xf32>
    tpu.vector_store %arg9[%c0_101, %c0_102, %c0_103], %676 {strides = array<i32>} : memref<2x27x59xf32, #tpu.memory_space<vmem>>, vector<2x27x59xf32>,
    return
  }
  func.func @transform_0(%arg0: i32) -> (i32, i32, i32) {
    %c0_i32 = arith.constant 0 : i32
    %c0_i32_0 = arith.constant 0 : i32
    %c0_i32_1 = arith.constant 0 : i32
    %c0_i32_2 = arith.constant 0 : i32
    return %c0_i32, %c0_i32_0, %c0_i32_1 : i32, i32, i32
  }
  func.func @transform_1(%arg0: i32) -> (i32, i32, i32) {
    %c0_i32 = arith.constant 0 : i32
    %c0_i32_0 = arith.constant 0 : i32
    %c0_i32_1 = arith.constant 0 : i32
    %c0_i32_2 = arith.constant 0 : i32
    return %c0_i32, %c0_i32_0, %c0_i32_1 : i32, i32, i32
  }
  func.func @transform_2(%arg0: i32) -> i32 {
    %c0_i32 = arith.constant 0 : i32
    %c0_i32_0 = arith.constant 0 : i32
    return %c0_i32 : i32
  }
  func.func @transform_3(%arg0: i32) -> i32 {
    %c0_i32 = arith.constant 0 : i32
    %c0_i32_0 = arith.constant 0 : i32
    return %c0_i32 : i32
  }
  func.func @transform_4(%arg0: i32) -> i32 {
    %c0_i32 = arith.constant 0 : i32
    %c0_i32_0 = arith.constant 0 : i32
    return %c0_i32 : i32
  }
  func.func @transform_5(%arg0: i32) -> i32 {
    %c0_i32 = arith.constant 0 : i32
    %c0_i32_0 = arith.constant 0 : i32
    return %c0_i32 : i32
  }
  func.func @transform_6(%arg0: i32) -> i32 {
    %c0_i32 = arith.constant 0 : i32
    %c0_i32_0 = arith.constant 0 : i32
    return %c0_i32 : i32
  }
  func.func @transform_7(%arg0: i32) -> i32 {
    %c0_i32 = arith.constant 0 : i32
    %c0_i32_0 = arith.constant 0 : i32
    return %c0_i32 : i32
  }
  func.func @transform_8(%arg0: i32) -> (i32, i32, i32) {
    %c0_i32 = arith.constant 0 : i32
    %c0_i32_0 = arith.constant 0 : i32
    %c0_i32_1 = arith.constant 0 : i32
    %c0_i32_2 = arith.constant 0 : i32
    return %c0_i32, %c0_i32_0, %c0_i32_1 : i32, i32, i32
  }
}

</mosaic_0001>

<bundles_post_ra>
// kernel: tpu_custom_call.1
= control target key start
LH: loop header
LB: loop body
LE: loop exit
PB: predicated region body
PF: predicated region fallthrough
CT: control target
= control target key end

     0   :  { %13 = vsyncpa [#allocation3], 0  ;;  %s7591_s0 = inlined_call_operand.hbm [shape: f32[4,32,64], index: 0, kind: input, shape index: {}]   ;;  %s7592_s1 = inlined_call_operand.vmem [shape: f32[2,31,63], index: 1, kind: input, shape index: {}]   ;;  %s7593_s2 = inlined_call_operand.vmem [shape: f32[32], index: 2, kind: input, shape index: {}]   ;;  %s7594_s3 = inlined_call_operand.vmem [shape: f32[2], index: 3, kind: input, shape index: {}]   ;;  %s7595_s4 = inlined_call_operand.vmem [shape: f32[72], index: 4, kind: input, shape index: {}]   ;;  %s7596_s5 = inlined_call_operand.vmem [shape: f32[2], index: 5, kind: input, shape index: {}]   ;;  %s7597_s6 = inlined_call_operand.vmem [shape: f32[36], index: 6, kind: input, shape index: {}]   ;;  %s7598_s7 = inlined_call_operand.vmem [shape: f32[2], index: 7, kind: input, shape index: {}]   ;;  %s7599_s8 = inlined_call_operand.vmem [shape: f32[2,27,59], index: 8, kind: output, shape index: {}]  }
   0x1   :  { %14 = vsyncpa [#allocation4], 0 }
   0x2   :  { %15 = vsyncpa [#allocation7], 0 }
   0x3   :  { %16 = vsyncpa [#allocation10], 0  ;;  %s48_s29 = sshll.u32 %s7594_s3, 4  ;;  %s49_s29 = int_to_ptr.vmem [resolvable:$true] %s48_s29 }
   0x4   :  { %17 = vsyncpa [#allocation13], 0  ;;  %s68_s10 = sshll.u32 %s7596_s5, 4  ;;  %s4036_s11 = scalar_lea.vmem %s49_s29, 16  ;;  %s69_s10 = int_to_ptr.vmem [resolvable:$true] %s68_s10 }
   0x5   :  { %p4037_p0 = scmp.ne.s32.totalorder %s49_s29, %s4036_s11  ;;  %p4041_p1 = scmp.lt.s32.totalorder %s49_s29, %s49_s29 }
   0x6   :  { %p4042_p2 = scmp.lt.s32.totalorder %s4036_s11, %s4036_s11 }
   0x8   :  { %p4043_p3 = por %p4042_p2, %p4041_p1 }
   0xa   :  { %p4044_p4 = pnand %p4043_p3, %p4037_p0 }
   0xc   :  { %4047 = shalt.err (!%p4044_p4)
}
   0xd   :  { %s4140_s12 = smov [#allocation6]   ;;  %s4048_s13 = scalar_lea.vmem %s69_s10, 16 }
   0xe   :  { %51 = dma.vmem_to_smem %s49_s29, 16, %s4140_s12, [#allocation7]  }
   0xf   :  { %p4049_p5 = scmp.ne.s32.totalorder %s69_s10, %s4048_s13  ;;  %p4053_p6 = scmp.lt.s32.totalorder %s69_s10, %s69_s10 }
  0x10   :  { %p4054_p7 = scmp.lt.s32.totalorder %s4048_s13, %s4048_s13 }
  0x12   :  { %p4055_p8 = por %p4054_p7, %p4053_p6 }
  0x14   :  { %p4056_p9 = pnand %p4055_p8, %p4049_p5 }
  0x16   :  { %4059 = shalt.err (!%p4056_p9)
}
  0x17   :  { %s4141_s3 = smov [#allocation9]   ;;  %s4142_s5 = smov [#allocation2]  }
  0x18   :  { %71 = dma.vmem_to_smem %s69_s10, 16, %s4141_s3, [#allocation10]  }
  0x19   :  { %s23_s14 = sshll.u32 %s4142_s5, 4  ;;  %s38_s17 = sshll.u32 %s7593_s2, 4  ;;  %s24_s14 = int_to_ptr.vmem [resolvable:$true] %s23_s14  ;;  %s39_s17 = int_to_ptr.vmem [resolvable:$true] %s38_s17 }
  0x1a   :  { %s4060_s20 = scalar_lea.hbm %s7591_s0, 2048 }
  0x1b   :  { %p4061_p10 = scmp.ne.s32.totalorder %s7591_s0, %s4060_s20  ;;  %p4064_p11 = scmp.lt.u32.totalorder %s4060_s20, %s7591_s0 }
  0x1d   :  { %p4066_p12 = pnand %p4064_p11, %p4061_p10 }
  0x1f   :  { %4069 = shalt.err (!%p4066_p12)
}
  0x20   :  { %s4070_s25 = scalar_lea.vmem %s24_s14, 2048  ;;  %p4075_p0 = scmp.lt.s32.totalorder %s24_s14, %s24_s14 }
  0x21   :  { %p4071_p13 = scmp.ne.s32.totalorder %s24_s14, %s4070_s25  ;;  %p4076_p1 = scmp.lt.s32.totalorder %s4070_s25, %s4070_s25 }
  0x23   :  { %p4077_p2 = por %p4076_p1, %p4075_p0 }
  0x25   :  { %p4078_p3 = pnand %p4077_p2, %p4071_p13 }
  0x27   :  { %4081 = shalt.err (!%p4078_p3)
}
  0x28   :  { %s4143_s2 = smov 128   ;;  %s4144_s26 = smov 8  }
  0x29   :  { %29 = dma.hbm_to_vmem [thread:$0]  %s7591_s0, 2048, %s24_s14, [#allocation3], %s4143_s2, %s4143_s2, %s4144_s26  }
  0x2a   :  { %s4082_s29 = scalar_lea.vmem %s39_s17, 16  ;;  %p4087_p5 = scmp.lt.s32.totalorder %s39_s17, %s39_s17 }
  0x2b   :  { %p4083_p4 = scmp.ne.s32.totalorder %s39_s17, %s4082_s29  ;;  %p4088_p6 = scmp.lt.s32.totalorder %s4082_s29, %s4082_s29 }
  0x2d   :  { %p4089_p7 = por %p4088_p6, %p4087_p5 }
  0x2f   :  { %p4090_p8 = pnand %p4089_p7, %p4083_p4 }
  0x31   :  { %4093 = shalt.err (!%p4090_p8)
}
  0x32   :  { %s4145_s30 = smov [#allocation5]   ;;  %s58_s11 = sshll.u32 %s7595_s4, 4  ;;  %s59_s11 = int_to_ptr.vmem [resolvable:$true] %s58_s11 }
  0x33   :  { %41 = dma.vmem_to_smem %s39_s17, 16, %s4145_s30, [#allocation4]  }
  0x34   :  { %s78_s3 = sshll.u32 %s7597_s6, 4  ;;  %s4094_s0 = scalar_lea.vmem %s59_s11, 16  ;;  %s79_s3 = int_to_ptr.vmem [resolvable:$true] %s78_s3 }
  0x35   :  { %p4095_p9 = scmp.ne.s32.totalorder %s59_s11, %s4094_s0  ;;  %p4099_p10 = scmp.lt.s32.totalorder %s59_s11, %s59_s11 }
  0x36   :  { %p4100_p11 = scmp.lt.s32.totalorder %s4094_s0, %s4094_s0 }
  0x38   :  { %p4101_p12 = por %p4100_p11, %p4099_p10 }
  0x3a   :  { %p4102_p13 = pnand %p4101_p12, %p4095_p9 }
  0x3c   :  { %4105 = shalt.err (!%p4102_p13)
}
  0x3d   :  { %s4146_s5 = smov [#allocation8]   ;;  %s4106_s14 = scalar_lea.vmem %s79_s3, 16 }
  0x3e   :  { %61 = dma.vmem_to_smem %s59_s11, 16, %s4146_s5, [#allocation7]  }
  0x3f   :  { %p4107_p0 = scmp.ne.s32.totalorder %s79_s3, %s4106_s14  ;;  %p4111_p1 = scmp.lt.s32.totalorder %s79_s3, %s79_s3 }
  0x40   :  { %p4112_p2 = scmp.lt.s32.totalorder %s4106_s14, %s4106_s14 }
  0x42   :  { %p4113_p3 = por %p4112_p2, %p4111_p1 }
  0x44   :  { %p4114_p4 = pnand %p4113_p3, %p4107_p0 }
  0x46   :  { %4117 = shalt.err (!%p4114_p4)
}
  0x47   :  { %s4147_s4 = smov [#allocation11]   ;;  %s88_s16 = sshll.u32 %s7598_s7, 4  ;;  %s89_s16 = int_to_ptr.vmem [resolvable:$true] %s88_s16 }
  0x48   :  { %81 = dma.vmem_to_smem %s79_s3, 16, %s4147_s4, [#allocation10]  }
  0x49   :  { %s4118_s17 = scalar_lea.vmem %s89_s16, 16  ;;  %p4123_p6 = scmp.lt.s32.totalorder %s89_s16, %s89_s16 }
  0x4a   :  { %p4119_p5 = scmp.ne.s32.totalorder %s89_s16, %s4118_s17  ;;  %p4124_p7 = scmp.lt.s32.totalorder %s4118_s17, %s4118_s17 }
  0x4c   :  { %p4125_p8 = por %p4124_p7, %p4123_p6 }
  0x4e   :  { %p4126_p9 = pnand %p4125_p8, %p4119_p5 }
  0x50   :  { %4129 = shalt.err (!%p4126_p9)
}
  0x51   :  { %s4148_s18 = smov [#allocation12]  }
  0x52   :  { %91 = dma.vmem_to_smem %s89_s16, 16, %s4148_s18, [#allocation13]  }
  0x53   :  { %4130 = dma.done.wait [#allocation3], 2048  }
  0x54   :  { %4131 = vsyncadd [#allocation3], 4294965248 }
  0x55   :  { %4132 = dma.done.wait [#allocation4], 16  }
  0x56   :  { %4133 = vsyncadd [#allocation4], 4294967280 }
  0x57   :  { %4134 = dma.done.wait [#allocation7], 32  }
  0x58   :  { %4135 = vsyncadd [#allocation7], 4294967264 }
  0x59   :  { %4136 = dma.done.wait [#allocation10], 32  }
  0x5a   :  { %4137 = vsyncadd [#allocation10], 4294967264 }
  0x5b   :  { %4138 = dma.done.wait [#allocation13], 16  }
  0x5c   :  { %4139 = vsyncadd [#allocation13], 4294967280 }
  0x5d   :  { %113 = sfence }
  0x5e   :  { %s3879_s7 = sld [smem:[#allocation5 + $0x1]]  ;;  %s3883_s20 = sld [smem:[#allocation5 + $0x3]]  ;;  %v4226_v0 = vld [vmem:[#allocation2 + $0x10] sm:$0xff]  ;;  %v4228_v1 = vld [vmem:[#allocation2] sm:$0xff]  ;;  %v4230_v3 = vld [vmem:[#allocation2 + $0x18] sm:$0xff]  ;;  %vm221_vm0 = vcmask 1046528  }
  0x5f   :  { %s3880_s19 = sld [smem:[#allocation5 + $0x11]]  ;;  %v4232_v4 = vld [vmem:[#allocation2 + $0x8] sm:$0xff]  ;;  %s4149_s21 = smov 127   ;;  %v4272_v40 = vld [vmem:[#allocation2 + $0x20] sm:$0xff]  ;;  %v4278_v43 = vld [vmem:[#allocation2 + $0x38] sm:$0xff]  ;;  %vm1223_vm1 = vcmask 1045504  }
  0x60   :  { %s3884_s22 = sld [smem:[#allocation5 + $0x13]]  ;;  %s3887_s23 = sld [smem:[#allocation5 + $0x5]]  ;;  %v4270_v38 = vld [vmem:[#allocation2 + $0x28] sm:$0xff]  ;;  %v4280_v44 = vld [vmem:[#allocation2 + $0x30] sm:$0xff]  ;;  %vm3858_vm2 = vcmask 482304   ;;  %vm3862_vm3 = vcmask 477184  }
  0x61   :  { %s3891_s24 = sld [smem:[#allocation5 + $0x7]]  ;;  %s3888_s25 = sld [smem:[#allocation5 + $0x15]] }
  0x62   :  { %s3881_s2 = sld [smem:[#allocation5 + $0x2]]  ;;  %s3892_s26 = sld [smem:[#allocation5 + $0x17]] }
  0x63   :  { %s3882_s27 = sld [smem:[#allocation5 + $0x12]]  ;;  %s4298_s28 = sld [smem:[#allocation5 + $0x6]] }
  0x64   :  { %v160_v2 = vstv %s3879_s7  ;;  %v263_v10 = vstv %s3883_s20  ;;  %s4312_s29 = sld [smem:[#allocation5 + $0x16]]  ;;  %s4336_s30 = sld [smem:[#allocation5 + $0xa]] }
  0x65   :  { %v163_v5 = vmul.f32 %v160_v2, %v4226_v0  ;;  %v161_v6 = vmul.f32 %v160_v2, %v4228_v1  ;;  %v164_v7 = vmul.f32 %v160_v2, %v4230_v3  ;;  %v162_v8 = vmul.f32 %v160_v2, %v4232_v4  ;;  %s4357_s9 = sld [smem:[#allocation5 + $0x9]]  ;;  %s3898_s10 = sld [smem:[#allocation5 + $0x1a]] }
  0x66   :  { %v186_v9 = vstv %s3880_s19  ;;  %v265_v13 = vmul.f32 %v263_v10, %v4232_v4  ;;  %v266_v14 = vmul.f32 %v263_v10, %v4226_v0  ;;  %v264_v15 = vmul.f32 %v263_v10, %v4228_v1  ;;  %s3896_s11 = sld [smem:[#allocation5 + $0x19]]  ;;  %s3899_s12 = sld [smem:[#allocation5 + $0xb]] }
  0x67   :  { %173 = vrot.lane.b32.xlu1 %v163_v5, %s4149_s21  ;;  %169 = vrot.lane.b32.xlu0 %v161_v6, %s4149_s21  ;;  %v188_v11 = vmul.f32 %v186_v9, %v4232_v4  ;;  %v187_v12 = vmul.f32 %v186_v9, %v4228_v1  ;;  %v190_v16 = vmul.f32 %v186_v9, %v4230_v3  ;;  %v296_v18 = vstv %s3884_s22  ;;  %s3900_s13 = sld [smem:[#allocation5 + $0x1b]]  ;;  %s3903_s3 = sld [smem:[#allocation5 + $0xd]] }
  0x68   :  { %v189_v17 = vmul.f32 %v186_v9, %v4226_v0  ;;  %v273_v19 = vrot.slane %v265_v13, 1  ;;  %v275_v20 = vrot.slane %v266_v14, 1  ;;  %v272_v21 = vrot.slane %v264_v15, 1  ;;  %s3904_s0 = sld [smem:[#allocation5 + $0x1d]]  ;;  %s3907_s5 = sld [smem:[#allocation5 + $0xf]] }
  0x69   :  { %v267_v22 = vmul.f32 %v263_v10, %v4230_v3  ;;  %v298_v23 = vmul.f32 %v296_v18, %v4232_v4  ;;  %v299_v24 = vmul.f32 %v296_v18, %v4226_v0  ;;  %v297_v28 = vmul.f32 %v296_v18, %v4228_v1  ;;  %s139_s14 = sld [smem:[#allocation5]]  ;;  %s3908_s4 = sld [smem:[#allocation5 + $0x1f]] }
  0x6a   :  { %v276_v25 = vsel %vm221_vm0, %v273_v19, %v275_v20  ;;  %v274_v26 = vsel %vm221_vm0, %v272_v21, %v273_v19  ;;  %v300_v29 = vmul.f32 %v296_v18, %v4230_v3  ;;  %v349_v39 = vstv %s3887_s23  ;;  %s133_s6 = sld [smem:[#allocation6]]  ;;  %s3877_s16 = sld [smem:[#allocation6 + $0x1]] }
  0x6b   :  { %175 = vrot.lane.b32.xlu1 %v164_v7, %s4149_s21  ;;  %171 = vrot.lane.b32.xlu0 %v162_v8, %s4149_s21  ;;  %v277_v27 = vrot.slane %v267_v22, 1  ;;  %v306_v31 = vrot.slane %v298_v23, 1  ;;  %v308_v32 = vrot.slane %v299_v24, 1  ;;  %v305_v33 = vrot.slane %v297_v28, 1  ;;  %s3878_s15 = sld [smem:[#allocation5 + $0x10]]  ;;  %s3885_s17 = sld [smem:[#allocation5 + $0x4]] }
  0x6c   :  { %v310_v36 = vrot.slane %v300_v29, 1  ;;  %v351_v41 = vmul.f32 %v349_v39, %v4270_v38  ;;  %v350_v42 = vmul.f32 %v349_v39, %v4272_v40  ;;  %v451_v45 = vstv %s3891_s24  ;;  %s3886_s18 = sld [smem:[#allocation5 + $0x14]]  ;;  %s3893_s7 = sld [smem:[#allocation5 + $0x8]] }
  0x6d   :  { %v278_v30 = vsel %vm221_vm0, %v275_v20, %v277_v27  ;;  %v309_v34 = vsel %vm221_vm0, %v306_v31, %v308_v32  ;;  %v307_v35 = vsel %vm221_vm0, %v305_v33, %v306_v31  ;;  %v353_v46 = vmul.f32 %v349_v39, %v4278_v43  ;;  %s3894_s19 = sld [smem:[#allocation5 + $0x18]]  ;;  %s3901_s20 = sld [smem:[#allocation5 + $0xc]] }
  0x6e   :  { %v311_v37 = vsel %vm221_vm0, %v308_v32, %v310_v36  ;;  %v375_v47 = vstv %s3888_s25  ;;  %v352_v48 = vmul.f32 %v349_v39, %v4280_v44  ;;  %v453_v49 = vmul.f32 %v451_v45, %v4270_v38  ;;  %s3905_s22 = sld [smem:[#allocation5 + $0xe]]  ;;  %s3902_s23 = sld [smem:[#allocation5 + $0x1c]] }
  0x6f   :  { %197 = vrot.lane.b32.xlu1 %v188_v11, %s4149_s21  ;;  %195 = vrot.lane.b32.xlu0 %v187_v12, %s4149_s21  ;;  %v454_v50 = vmul.f32 %v451_v45, %v4280_v44  ;;  %v452_v51 = vmul.f32 %v451_v45, %v4272_v40  ;;  %v377_v52 = vmul.f32 %v375_v47, %v4270_v38  ;;  %v212_v53 = vstv %s3881_s2  ;;  %s3906_s24 = sld [smem:[#allocation5 + $0x1e]]  ;;  %s3915_s25 = sld [smem:[#allocation8 + $0x1]] }
  0x70   :  { %v376_v54 = vmul.f32 %v375_v47, %v4272_v40  ;;  %v379_v55 = vmul.f32 %v375_v47, %v4278_v43  ;;  %v378_v56 = vmul.f32 %v375_v47, %v4280_v44  ;;  %v4294_v57 = vmul.f32 %v451_v45, %v4278_v43  ;;  %s3921_s2 = sld [smem:[#allocation8 + $0x4]] }
  0x71   :  { %v461_v58 = vrot.slane %v453_v49, 1  ;;  %v463_v59 = vrot.slane %v454_v50, 1  ;;  %v484_v60 = vstv %s3892_s26  ;;  %v238_v61 = vstv %s3882_s27  ;;  %s3922_s26 = sld [smem:[#allocation8 + $0x28]]  ;;  %s3916_s27 = sld [smem:[#allocation8 + $0x25]] }
  0x72   :  { %v460_v62 = vrot.slane %v452_v51, 1  ;;  %v214_v63 = vmul.f32 %v212_v53, %v4232_v4  ;;  %v215_v2 = vmul.f32 %v212_v53, %v4226_v0  ;;  %v213_v5 = vmul.f32 %v212_v53, %v4228_v1 }
  0x73   :  { %201 = vrot.lane.b32.xlu1 %v190_v16, %s4149_s21  ;;  %199 = vrot.lane.b32.xlu0 %v189_v17, %s4149_s21  ;;  %v4304_v6 = vmul.f32 %v212_v53, %v4230_v3  ;;  %v240_v7 = vmul.f32 %v238_v61, %v4232_v4  ;;  %v241_v8 = vmul.f32 %v238_v61, %v4226_v0  ;;  %v465_v18 = vrot.slane %v4294_v57, 1 }
  0x74   :  { %v239_v9 = vmul.f32 %v238_v61, %v4228_v1  ;;  %v223_v10 = vrot.slane %v214_v63, 1  ;;  %v225_v11 = vrot.slane %v215_v2, 1  ;;  %v222_v12 = vrot.slane %v213_v5, 1  ;;  %v4394_v5 = vld [vmem:[#allocation2 + $0x48] sm:$0xff] }
  0x75   :  { %v4310_v13 = vmul.f32 %v238_v61, %v4230_v3  ;;  %v7605_v14 = vrot.slane %v4304_v6, 1  ;;  %v248_v15 = vrot.slane %v240_v7, 1  ;;  %v250_v16 = vrot.slane %v241_v8, 1 }
  0x76   :  { %v247_v17 = vrot.slane %v239_v9, 1  ;;  %v4319_v19 = vsel %vm221_vm0, %v223_v10, %v225_v11  ;;  %v4322_v20 = vsel %vm221_vm0, %v222_v12, %v223_v10  ;;  %v401_v29 = vstv %s4298_s28  ;;  %v4410_v12 = vld [vmem:[#allocation2 + $0x58] sm:$0xff]  ;;  %s3923_s28 = sld [smem:[#allocation8 + $0x5]] }
  0x77   :  { %281 = vrot.lane.b32.xlu1 %v276_v25, %s4149_s21  ;;  %279 = vrot.lane.b32.xlu0 %v274_v26, %s4149_s21  ;;  %v7604_v21 = vrot.slane %v4310_v13, 1  ;;  %v4328_v22 = vsel %vm221_vm0, %v225_v11, %v7605_v14  ;;  %v4331_v23 = vsel %vm221_vm0, %v248_v15, %v250_v16  ;;  %v486_v25 = vmul.f32 %v484_v60, %v4270_v38  ;;  %v4408_v11 = vld [vmem:[#allocation2 + $0x40] sm:$0xff] }
  0x78   :  { %v4334_v24 = vsel %vm221_vm0, %v247_v17, %v248_v15  ;;  %v4340_v26 = vmul.f32 %v484_v60, %v4280_v44  ;;  %v462_v31 = vsel %vm221_vm0, %v460_v62, %v461_v58  ;;  %v466_v32 = vsel %vm221_vm0, %v463_v59, %v465_v18  ;;  %v4412_v15 = vld [vmem:[#allocation2 + $0x50] sm:$0xff] }
  0x79   :  { %v4346_v28 = vsel %vm221_vm0, %v250_v16, %v7604_v21  ;;  %v4355_v33 = vmul.f32 %v484_v60, %v4278_v43  ;;  %v494_v39 = vrot.slane %v486_v25, 1  ;;  %v426_v45 = vstv %s4312_s29  ;;  %s3917_s29 = sld [smem:[#allocation8 + $0x2]] }
  0x7a   :  { %v428_v50 = vmul.f32 %v426_v45, %v4270_v38  ;;  %v429_v51 = vmul.f32 %v426_v45, %v4280_v44  ;;  %v4374_v53 = vmul.f32 %v426_v45, %v4278_v43  ;;  %v589_v57 = vstv %s4336_s30  ;;  %s3918_s30 = sld [smem:[#allocation8 + $0x26]] }
  0x7b   :  { %285 = vrot.lane.b32.xlu1 %v277_v27, %s4149_s21  ;;  %283 = vrot.lane.b32.xlu0 %v278_v30, %s4149_s21  ;;  %v485_v27 = vmul.f32 %v484_v60, %v4272_v40  ;;  %v464_v30 = vsel %vm221_vm0, %v461_v58, %v463_v59  ;;  %v498_v63 = vrot.slane %v4355_v33, 1  ;;  %v537_v10 = vstv %s4357_s9  ;;  %s4660_s9 = sld [smem:[#allocation8 + $0x29]] }
  0x7c   :  { %v436_v58 = vrot.slane %v428_v50, 1  ;;  %v438_v59 = vrot.slane %v429_v51, 1  ;;  %v7602_v61 = vrot.slane %v4374_v53, 1  ;;  %v591_v16 = vmul.f32 %v589_v57, %v4394_v5 }
  0x7d   :  { %v592_v17 = vmul.f32 %v589_v57, %v4412_v15  ;;  %v4418_v25 = vmul.f32 %v589_v57, %v4410_v12 }
  0x7e   :  { %v4397_v7 = vsel %vm221_vm0, %v436_v58, %v438_v59  ;;  %v4405_v9 = vsel %vm221_vm0, %v438_v59, %v7602_v61  ;;  %v540_v59 = vmul.f32 %v537_v10, %v4412_v15 }
  0x7f   :  { %314 = vrot.lane.b32.xlu1 %v309_v34, %s4149_s21  ;;  %312 = vrot.lane.b32.xlu0 %v307_v35, %s4149_s21  ;;  %v403_v34 = vmul.f32 %v401_v29, %v4270_v38  ;;  %v404_v35 = vmul.f32 %v401_v29, %v4280_v44  ;;  %v601_v33 = vrot.slane %v592_v17, 1 }
  0x81   :  { %v413_v47 = vrot.slane %v404_v35, 1  ;;  %v7601_v35 = vrot.slane %v4418_v25, 1 }
  0x83   :  { %318 = vrot.lane.b32.xlu1 %v310_v36, %s4149_s21  ;;  %316 = vrot.lane.b32.xlu0 %v311_v37, %s4149_s21  ;;  %v402_v36 = vmul.f32 %v401_v29, %v4272_v40  ;;  %v4363_v37 = vmul.f32 %v401_v29, %v4278_v43 }
  0x85   :  { %v7603_v49 = vrot.slane %v4363_v37, 1 }
  0x87   :  { %360 = vrot.lane.b32.xlu1 %v351_v41, %s4149_s21  ;;  %358 = vrot.lane.b32.xlu0 %v350_v42, %s4149_s21  ;;  %v496_v41 = vrot.slane %v4340_v26, 1  ;;  %v493_v42 = vrot.slane %v485_v27, 1  ;;  %v614_v26 = vstv %s3898_s10  ;;  %v599_v27 = vrot.slane %v591_v16, 1  ;;  %s4670_s10 = sld [smem:[#allocation8 + $0x7]] }
  0x88   :  { %v616_v29 = vmul.f32 %v614_v26, %v4394_v5 }
  0x89   :  { %v497_v62 = vsel %vm221_vm0, %v494_v39, %v496_v41  ;;  %v495_v2 = vsel %vm221_vm0, %v493_v42, %v494_v39 }
  0x8a   :  { %v624_v39 = vrot.slane %v616_v29, 1  ;;  %v672_v29 = vstv %s3900_s13  ;;  %s4783_s13 = sld [smem:[#allocation8 + $0x2c]] }
  0x8b   :  { %364 = vrot.lane.b32.xlu1 %v353_v46, %s4149_s21  ;;  %362 = vrot.lane.b32.xlu0 %v352_v48, %s4149_s21  ;;  %v411_v46 = vrot.slane %v403_v34, 1  ;;  %v410_v48 = vrot.slane %v402_v36, 1  ;;  %v539_v36 = vmul.f32 %v537_v10, %v4394_v5 }
  0x8f   :  { %386 = vrot.lane.b32.xlu1 %v377_v52, %s4149_s21  ;;  %384 = vrot.lane.b32.xlu0 %v376_v54, %s4149_s21  ;;  %v427_v52 = vmul.f32 %v426_v45, %v4272_v40  ;;  %v4377_v54 = vsel %vm221_vm0, %v411_v46, %v413_v47 }
  0x91   :  { %v435_v60 = vrot.slane %v427_v52, 1  ;;  %v4449_v52 = vmul.f32 %v614_v26, %v4410_v12 }
  0x93   :  { %390 = vrot.lane.b32.xlu1 %v379_v55, %s4149_s21  ;;  %388 = vrot.lane.b32.xlu0 %v378_v56, %s4149_s21  ;;  %v4380_v55 = vsel %vm221_vm0, %v410_v48, %v411_v46  ;;  %v4385_v56 = vsel %vm221_vm0, %v413_v47, %v7603_v49  ;;  %v4400_v8 = vsel %vm221_vm0, %v435_v60, %v436_v58 }
  0x94   :  { %v538_v46 = vmul.f32 %v537_v10, %v4408_v11  ;;  %v4430_v47 = vsel %vm221_vm0, %v599_v27, %v601_v33  ;;  %v541_v58 = vmul.f32 %v537_v10, %v4410_v12 }
  0x97   :  { %469 = vrot.lane.b32.xlu1 %v464_v30, %s4149_s21  ;;  %467 = vrot.lane.b32.xlu0 %v462_v31, %s4149_s21  ;;  %v617_v30 = vmul.f32 %v614_v26, %v4412_v15  ;;  %v615_v31 = vmul.f32 %v614_v26, %v4408_v11 }
  0x99   :  { %v626_v42 = vrot.slane %v617_v30, 1  ;;  %v623_v45 = vrot.slane %v615_v31, 1 }
  0x9b   :  { %473 = vrot.lane.b32.xlu1 %v465_v18, %s4149_s21  ;;  %471 = vrot.lane.b32.xlu0 %v466_v32, %s4149_s21  ;;  %v590_v18 = vmul.f32 %v589_v57, %v4408_v11  ;;  %v499_v32 = vsel %vm221_vm0, %v496_v41, %v498_v63  ;;  %v4438_v41 = vsel %vm221_vm0, %v601_v33, %v7601_v35  ;;  %v7600_v57 = vrot.slane %v4449_v52, 1 }
  0x9c   :  { %v4443_v50 = vsel %vm221_vm0, %v624_v39, %v626_v42  ;;  %v4446_v51 = vsel %vm221_vm0, %v623_v45, %v624_v39 }
  0x9d   :  { %v598_v34 = vrot.slane %v590_v18, 1  ;;  %v4459_v60 = vsel %vm221_vm0, %v626_v42, %v7600_v57 }
  0x9f   :  { %502 = vrot.lane.b32.xlu1 %v497_v62, %s4149_s21  ;;  %500 = vrot.lane.b32.xlu0 %v495_v2, %s4149_s21  ;;  %v4433_v48 = vsel %vm221_vm0, %v598_v34, %v599_v27  ;;  %v563_v62 = vstv %s3896_s11  ;;  %v674_v34 = vmul.f32 %v672_v29, %v4394_v5  ;;  %s4696_s11 = sld [smem:[#allocation8 + $0x2b]] }
  0xa0   :  { %v565_v2 = vmul.f32 %v563_v62, %v4394_v5  ;;  %v564_v16 = vmul.f32 %v563_v62, %v4408_v11  ;;  %v567_v26 = vmul.f32 %v563_v62, %v4410_v12  ;;  %v566_v27 = vmul.f32 %v563_v62, %v4412_v15 }
  0xa1   :  { %v682_v62 = vrot.slane %v674_v34, 1 }
  0xa3   :  { %506 = vrot.lane.b32.xlu1 %v498_v63, %s4149_s21  ;;  %504 = vrot.lane.b32.xlu0 %v499_v32, %s4149_s21  ;;  %v639_v63 = vstv %s3899_s12  ;;  %s4707_s12 = sld [smem:[#allocation8 + $0x8]] }
  0xa4   :  { %v641_v17 = vmul.f32 %v639_v63, %v4394_v5  ;;  %v642_v10 = vmul.f32 %v639_v63, %v4412_v15  ;;  %v640_v18 = vmul.f32 %v639_v63, %v4408_v11  ;;  %v643_v33 = vmul.f32 %v639_v63, %v4410_v12 }
  0xa6   :  { %v649_v30 = vrot.slane %v641_v17, 1  ;;  %v651_v31 = vrot.slane %v642_v10, 1  ;;  %v648_v32 = vrot.slane %v640_v18, 1  ;;  %v653_v45 = vrot.slane %v643_v33, 1  ;;  %v4501_v33 = vld [vmem:[#allocation2 + $0x70] sm:$0xff] }
  0xa7   :  { %548 = vrot.lane.b32.xlu1 %v539_v36, %s4149_s21  ;;  %546 = vrot.lane.b32.xlu0 %v538_v46, %s4149_s21  ;;  %v675_v36 = vmul.f32 %v672_v29, %v4412_v15  ;;  %v673_v46 = vmul.f32 %v672_v29, %v4408_v11 }
  0xa8   :  { %v652_v39 = vsel %vm221_vm0, %v649_v30, %v651_v31  ;;  %v650_v42 = vsel %vm221_vm0, %v648_v32, %v649_v30  ;;  %v4499_v32 = vld [vmem:[#allocation2 + $0x78] sm:$0xff] }
  0xa9   :  { %v684_v63 = vrot.slane %v675_v36, 1 }
  0xab   :  { %552 = vrot.lane.b32.xlu1 %v541_v58, %s4149_s21  ;;  %550 = vrot.lane.b32.xlu0 %v540_v59, %s4149_s21  ;;  %v676_v58 = vmul.f32 %v672_v29, %v4410_v12  ;;  %v654_v59 = vsel %vm221_vm0, %v651_v31, %v653_v45  ;;  %v4493_v29 = vld [vmem:[#allocation2 + $0x60] sm:$0xff] }
  0xac   :  { %7709 = vst [vmem:[#allocation20_spill] sm:$0xff] %v4493_v29 }
  0xad   :  { %v686_v10 = vrot.slane %v676_v58, 1 }
  0xaf   :  { %574 = vrot.lane.b32.xlu1 %v565_v2, %s4149_s21  ;;  %572 = vrot.lane.b32.xlu0 %v564_v16, %s4149_s21  ;;  %v681_v2 = vrot.slane %v673_v46, 1  ;;  %v685_v16 = vsel %vm221_vm0, %v682_v62, %v684_v63  ;;  %v687_v18 = vsel %vm221_vm0, %v684_v63, %v686_v10 }
  0xb1   :  { %v683_v17 = vsel %vm221_vm0, %v681_v2, %v682_v62 }
  0xb3   :  { %578 = vrot.lane.b32.xlu1 %v567_v26, %s4149_s21  ;;  %576 = vrot.lane.b32.xlu0 %v566_v27, %s4149_s21  ;;  %v4491_v26 = vld [vmem:[#allocation2 + $0x68] sm:$0xff]  ;;  %v725_v27 = vstv %s3903_s3  ;;  %s4150_s3 = smov 126  }
  0xb4   :  { %7708 = vst [vmem:[#allocation19_spill] sm:$0xff] %v4491_v26  ;;  %v727_v30 = vmul.f32 %v725_v27, %v4491_v26  ;;  %v726_v31 = vmul.f32 %v725_v27, %v4493_v29  ;;  %v729_v34 = vmul.f32 %v725_v27, %v4499_v32  ;;  %v728_v36 = vmul.f32 %v725_v27, %v4501_v33 }
  0xb7   :  { %657 = vrot.lane.b32.xlu1 %v652_v39, %s4149_s21  ;;  %655 = vrot.lane.b32.xlu0 %v650_v42, %s4149_s21  ;;  %v751_v39 = vstv %s3904_s0  ;;  %v827_v42 = vstv %s3907_s5  ;;  %s4875_s0 = sld [smem:[#allocation8 + $0xd]]  ;;  %s4877_s5 = sld [smem:[#allocation8 + $0x3]] }
  0xb8   :  { %v752_v46 = vmul.f32 %v751_v39, %v4493_v29  ;;  %v829_v58 = vmul.f32 %v827_v42, %v4491_v26  ;;  %v828_v62 = vmul.f32 %v827_v42, %v4493_v29  ;;  %v755_v63 = vmul.f32 %v751_v39, %v4499_v32 }
  0xb9   :  { %v754_v2 = vmul.f32 %v751_v39, %v4501_v33 }
  0xba   :  { %v836_v27 = vrot.slane %v828_v62, 1 }
  0xbb   :  { %661 = vrot.lane.b32.xlu1 %v653_v45, %s4149_s21  ;;  %659 = vrot.lane.b32.xlu0 %v654_v59, %s4149_s21  ;;  %v753_v45 = vmul.f32 %v751_v39, %v4491_v26  ;;  %v830_v59 = vmul.f32 %v827_v42, %v4501_v33  ;;  %v134_v39 = vstv %s133_s6  ;;  %s4903_s6 = sld [smem:[#allocation8 + $0x27]] }
  0xbf   :  { %690 = vrot.lane.b32.xlu1 %v685_v16, %s4149_s21  ;;  %688 = vrot.lane.b32.xlu0 %v683_v17, %s4149_s21  ;;  %v837_v16 = vrot.slane %v829_v58, 1  ;;  %v839_v17 = vrot.slane %v830_v59, 1 }
  0xc3   :  { %694 = vrot.lane.b32.xlu1 %v686_v10, %s4149_s21  ;;  %692 = vrot.lane.b32.xlu0 %v687_v18, %s4149_s21  ;;  %v140_v10 = vstv %s139_s14  ;;  %v831_v18 = vmul.f32 %v827_v42, %v4499_v32  ;;  %s4889_s14 = sld [smem:[#allocation8 + $0x31]] }
  0xc4   :  { %v142_v62 = vmul.f32 %v140_v10, %v4232_v4 }
  0xc6   :  { %v146_v14 = vadd.f32 %v142_v62, %v134_v39 }
  0xc7   :  { %736 = vrot.lane.b32.xlu1 %v727_v30, %s4149_s21  ;;  %734 = vrot.lane.b32.xlu0 %v726_v31, %s4149_s21  ;;  %v860_v30 = vstv %s3908_s4  ;;  %v143_v31 = vmul.f32 %v140_v10, %v4226_v0  ;;  %s4891_s4 = sld [smem:[#allocation8 + $0xe]] }
  0xc8   :  { %v862_v42 = vmul.f32 %v860_v30, %v4491_v26  ;;  %v863_v58 = vmul.f32 %v860_v30, %v4501_v33  ;;  %v861_v59 = vmul.f32 %v860_v30, %v4493_v29 }
  0xc9   :  { %v147_v57 = vadd.f32 %v143_v31, %v134_v39 }
  0xca   :  { %v869_v61 = vrot.slane %v861_v59, 1 }
  0xcb   :  { %740 = vrot.lane.b32.xlu1 %v729_v34, %s4149_s21  ;;  %738 = vrot.lane.b32.xlu0 %v728_v36, %s4149_s21  ;;  %v141_v34 = vmul.f32 %v140_v10, %v4228_v1  ;;  %v840_v36 = vsel %vm221_vm0, %v837_v16, %v839_v17 }
  0xcd   :  { %v145_v35 = vadd.f32 %v141_v34, %v134_v39 }
  0xcf   :  { %762 = vrot.lane.b32.xlu1 %v753_v45, %s4149_s21  ;;  %760 = vrot.lane.b32.xlu0 %v752_v46, %s4149_s21  ;;  %v841_v45 = vrot.slane %v831_v18, 1  ;;  %v838_v46 = vsel %vm221_vm0, %v836_v27, %v837_v16  ;;  %v870_v16 = vrot.slane %v862_v42, 1  ;;  %v872_v27 = vrot.slane %v863_v58, 1 }
  0xd1   :  { %v842_v18 = vsel %vm221_vm0, %v839_v17, %v841_v45  ;;  %v873_v17 = vsel %vm221_vm0, %v870_v16, %v872_v27 }
  0xd3   :  { %766 = vrot.lane.b32.xlu1 %v755_v63, %s4149_s21  ;;  %764 = vrot.lane.b32.xlu0 %v754_v2, %s4149_s21  ;;  %v150_v63 = vstv %s3878_s15  ;;  %v864_v2 = vmul.f32 %v860_v30, %v4499_v32  ;;  %s4905_s15 = sld [smem:[#allocation8 + $0x6]] }
  0xd4   :  { %v152_v31 = vmul.f32 %v150_v63, %v4232_v4  ;;  %v151_v34 = vmul.f32 %v150_v63, %v4228_v1 }
  0xd5   :  { %v874_v30 = vrot.slane %v864_v2, 1 }
  0xd7   :  { %845 = vrot.lane.b32.xlu1 %v840_v36, %s4149_s21  ;;  %843 = vrot.lane.b32.xlu0 %v838_v46, %s4149_s21  ;;  %v137_v36 = vstv %s3877_s16  ;;  %v871_v46 = vsel %vm221_vm0, %v869_v61, %v870_v16  ;;  %v875_v61 = vsel %vm221_vm0, %v872_v27, %v874_v30  ;;  %v329_v16 = vstv %s3885_s17  ;;  %s4919_s16 = sld [smem:[#allocation8 + $0x32]]  ;;  %s4921_s17 = sld [smem:[#allocation8 + $0x10]] }
  0xd8   :  { %v155_v1 = vadd.f32 %v151_v34, %v137_v36 }
  0xd9   :  { %v174_v49 = vpop.permute.xlu1 %173  ;;  %v170_v21 = vpop.permute.xlu0 %169 }
  0xda   :  { %v183_v29 = vadd.f32 %v174_v49, %v147_v57  ;;  %v181_v26 = vadd.f32 %v170_v21, %v145_v35  ;;  %v156_v35 = vadd.f32 %v152_v31, %v137_v36  ;;  %v153_v57 = vmul.f32 %v150_v63, %v4226_v0 }
  0xdb   :  { %849 = vrot.lane.b32.xlu1 %v841_v45, %s4149_s21  ;;  %847 = vrot.lane.b32.xlu0 %v842_v18, %s4149_s21  ;;  %v144_v45 = vmul.f32 %v140_v10, %v4230_v3 }
  0xdc   :  { %v233_v42 = vadd.f32 %v4322_v20, %v181_v26  ;;  %v235_v58 = vadd.f32 %v4328_v22, %v183_v29  ;;  %v157_v62 = vadd.f32 %v153_v57, %v137_v36 }
  0xdd   :  { %v176_v49 = vpop.permute.xlu1 %175  ;;  %v172_v21 = vpop.permute.xlu0 %171  ;;  %v148_v0 = vadd.f32 %v144_v45, %v134_v39 }
  0xde   :  { %v182_v4 = vadd.f32 %v172_v21, %v146_v14 }
  0xdf   :  { %878 = vrot.lane.b32.xlu1 %v873_v17, %s4149_s21  ;;  %876 = vrot.lane.b32.xlu0 %v871_v46, %s4149_s21  ;;  %v184_v31 = vadd.f32 %v176_v49, %v148_v0  ;;  %v331_v17 = vmul.f32 %v329_v16, %v4270_v38  ;;  %v339_v49 = vstv %s3886_s18  ;;  %s4928_s18 = sld [smem:[#allocation8 + $0x34]] }
  0xe0   :  { %v234_v20 = vadd.f32 %v4319_v19, %v182_v4  ;;  %v154_v19 = vmul.f32 %v150_v63, %v4230_v3 }
  0xe1   :  { %v198_v26 = vpop.permute.xlu1 %197  ;;  %v196_v22 = vpop.permute.xlu0 %195 }
  0xe2   :  { %v208_v29 = vadd.f32 %v198_v26, %v156_v35  ;;  %v207_v59 = vadd.f32 %v196_v22, %v155_v1  ;;  %v158_v4 = vadd.f32 %v154_v19, %v137_v36  ;;  %v332_v35 = vmul.f32 %v329_v16, %v4280_v44 }
  0xe3   :  { %882 = vrot.lane.b32.xlu1 %v874_v30, %s4149_s21  ;;  %880 = vrot.lane.b32.xlu0 %v875_v61, %s4149_s21  ;;  %v330_v30 = vmul.f32 %v329_v16, %v4272_v40  ;;  %v7710_v1 = vrot.slane %v4304_v6, 1  ;;  %v341_v22 = vmul.f32 %v339_v49, %v4270_v38  ;;  %v340_v36 = vmul.f32 %v339_v49, %v4272_v40 }
  0xe4   :  { %v259_v14 = vadd.f32 %v4331_v23, %v208_v29  ;;  %v258_v2 = vadd.f32 %v4334_v24, %v207_v59  ;;  %v333_v24 = vmul.f32 %v329_v16, %v4278_v43  ;;  %v343_v6 = vmul.f32 %v339_v49, %v4278_v43 }
  0xe5   :  { %v202_v10 = vpop.permute.xlu1 %201  ;;  %v200_v18 = vpop.permute.xlu0 %199  ;;  %v236_v57 = vadd.f32 %v7710_v1, %v184_v31  ;;  %v7711_v16 = vrot.slane %v4310_v13, 1 }
  0xe6   :  { %v209_v27 = vadd.f32 %v200_v18, %v157_v62  ;;  %v210_v29 = vadd.f32 %v202_v10, %v158_v4 }
  0xe8   :  { %v260_v34 = vadd.f32 %v4346_v28, %v209_v27  ;;  %v261_v27 = vadd.f32 %v7711_v16, %v210_v29  ;;  %v7713_v29 = vrot.slane %v4374_v53, 1  ;;  %v527_v53 = vstv %s3894_s19  ;;  %s4941_s19 = sld [smem:[#allocation8 + $0x35]] }
  0xe9   :  { %v282_v46 = vpop.permute.xlu1 %281  ;;  %v280_v39 = vpop.permute.xlu0 %279 }
  0xea   :  { %v292_v21 = vadd.f32 %v282_v46, %v234_v20  ;;  %v291_v23 = vadd.f32 %v280_v39, %v233_v42 }
  0xec   :  { %v335_v3 = vadd.f32 %v331_v17, %v292_v21  ;;  %v334_v63 = vadd.f32 %v330_v30, %v291_v23 }
  0xed   :  { %v286_v28 = vpop.permute.xlu1 %285  ;;  %v284_v45 = vpop.permute.xlu0 %283 }
  0xee   :  { %v294_v61 = vadd.f32 %v286_v28, %v236_v57  ;;  %v293_v26 = vadd.f32 %v284_v45, %v235_v58  ;;  %v342_v58 = vmul.f32 %v339_v49, %v4280_v44  ;;  %v7712_v44 = vrot.slane %v4363_v37, 1 }
  0xf0   :  { %v337_v20 = vadd.f32 %v333_v24, %v294_v61  ;;  %v336_v42 = vadd.f32 %v332_v35, %v293_v26  ;;  %v517_v61 = vstv %s3893_s7  ;;  %s4930_s7 = sld [smem:[#allocation8 + $0x11]] }
  0xf1   :  { %v315_v59 = vpop.permute.xlu1 %314  ;;  %v313_v62 = vpop.permute.xlu0 %312 }
  0xf2   :  { %v325_v0 = vadd.f32 %v315_v59, %v259_v14  ;;  %v324_v18 = vadd.f32 %v313_v62, %v258_v2 }
  0xf4   :  { %v345_v19 = vadd.f32 %v341_v22, %v325_v0  ;;  %v344_v31 = vadd.f32 %v340_v36, %v324_v18  ;;  %v521_v18 = vmul.f32 %v517_v61, %v4410_v12 }
  0xf5   :  { %v319_v17 = vpop.permute.xlu1 %318  ;;  %v317_v38 = vpop.permute.xlu0 %316 }
  0xf6   :  { %v327_v10 = vadd.f32 %v319_v17, %v261_v27  ;;  %v326_v30 = vadd.f32 %v317_v38, %v260_v34  ;;  %v529_v17 = vmul.f32 %v527_v53, %v4394_v5  ;;  %v528_v38 = vmul.f32 %v527_v53, %v4408_v11 }
  0xf8   :  { %v347_v46 = vadd.f32 %v343_v6, %v327_v10  ;;  %v346_v39 = vadd.f32 %v342_v58, %v326_v30  ;;  %v520_v6 = vmul.f32 %v517_v61, %v4412_v15 }
  0xf9   :  { %v361_v40 = vpop.permute.xlu1 %360  ;;  %v359_v21 = vpop.permute.xlu0 %358 }
  0xfa   :  { %v371_v23 = vadd.f32 %v361_v40, %v335_v3  ;;  %v370_v14 = vadd.f32 %v359_v21, %v334_v63 }
  0xfc   :  { %v422_v2 = vadd.f32 %v4377_v54, %v371_v23  ;;  %v421_v43 = vadd.f32 %v4380_v55, %v370_v14  ;;  %v531_v23 = vmul.f32 %v527_v53, %v4410_v12  ;;  %v530_v14 = vmul.f32 %v527_v53, %v4412_v15 }
  0xfd   :  { %v365_v13 = vpop.permute.xlu1 %364  ;;  %v363_v4 = vpop.permute.xlu0 %362  ;;  %v7714_v15 = vrot.slane %v4418_v25, 1  ;;  %v7715_v25 = vrot.slane %v4449_v52, 1  ;;  %v7716_v52 = vld [vmem:[#allocation19_spill] sm:$0xff] }
  0xfe   :  { %v373_v24 = vadd.f32 %v365_v13, %v337_v20  ;;  %v372_v35 = vadd.f32 %v363_v4, %v336_v42  ;;  %v518_v42 = vmul.f32 %v517_v61, %v4408_v11 }
 0x100   :  { %v424_v1 = vadd.f32 %v7712_v44, %v373_v24  ;;  %v423_v34 = vadd.f32 %v4385_v56, %v372_v35  ;;  %v519_v56 = vmul.f32 %v517_v61, %v4394_v5 }
 0x101   :  { %v387_v57 = vpop.permute.xlu1 %386  ;;  %v385_v49 = vpop.permute.xlu0 %384 }
 0x102   :  { %v397_v28 = vadd.f32 %v387_v57, %v345_v19  ;;  %v396_v45 = vadd.f32 %v385_v49, %v344_v31 }
 0x104   :  { %v447_v3 = vadd.f32 %v4397_v7, %v397_v28  ;;  %v446_v54 = vadd.f32 %v4400_v8, %v396_v45 }
 0x105   :  { %v391_v63 = vpop.permute.xlu1 %390  ;;  %v389_v55 = vpop.permute.xlu0 %388 }
 0x106   :  { %v399_v26 = vadd.f32 %v391_v63, %v347_v46  ;;  %v398_v22 = vadd.f32 %v389_v55, %v346_v39 }
 0x108   :  { %v449_v37 = vadd.f32 %v7713_v29, %v399_v26  ;;  %v448_v20 = vadd.f32 %v4405_v9, %v398_v22 }
 0x109   :  { %v470_v36 = vpop.permute.xlu1 %469  ;;  %v468_v59 = vpop.permute.xlu0 %467 }
 0x10a   :  { %v480_v7 = vadd.f32 %v470_v36, %v422_v2  ;;  %v479_v62 = vadd.f32 %v468_v59, %v421_v43  ;;  %v705_v59 = vstv %s3901_s20  ;;  %s4943_s20 = sld [smem:[#allocation8 + $0x2a]] }
 0x10c   :  { %v523_v8 = vadd.f32 %v519_v56, %v480_v7  ;;  %v522_v0 = vadd.f32 %v518_v42, %v479_v62 }
 0x10d   :  { %v474_v16 = vpop.permute.xlu1 %473  ;;  %v472_v27 = vpop.permute.xlu0 %471 }
 0x10e   :  { %v482_v19 = vadd.f32 %v474_v16, %v424_v1  ;;  %v481_v31 = vadd.f32 %v472_v27, %v423_v34 }
 0x110   :  { %v525_v9 = vadd.f32 %v521_v18, %v482_v19  ;;  %v524_v58 = vadd.f32 %v520_v6, %v481_v31  ;;  %v707_v19 = vmul.f32 %v705_v59, %v7716_v52 }
 0x111   :  { %v503_v10 = vpop.permute.xlu1 %502  ;;  %v501_v30 = vpop.permute.xlu0 %500 }
 0x112   :  { %v513_v46 = vadd.f32 %v503_v10, %v447_v3  ;;  %v512_v39 = vadd.f32 %v501_v30, %v446_v54 }
 0x114   :  { %v533_v40 = vadd.f32 %v529_v17, %v513_v46  ;;  %v532_v21 = vadd.f32 %v528_v38, %v512_v39  ;;  %v4614_v46 = vstv %s3906_s24  ;;  %s3943_s24 = sld [smem:[#allocation8 + $0xf]] }
 0x115   :  { %v507_v2 = vpop.permute.xlu1 %506  ;;  %v505_v43 = vpop.permute.xlu0 %504 }
 0x116   :  { %v515_v13 = vadd.f32 %v507_v2, %v449_v37  ;;  %v514_v4 = vadd.f32 %v505_v43, %v448_v20  ;;  %v4619_v43 = vmul.f32 %v4614_v46, %v7716_v52 }
 0x118   :  { %v535_v24 = vadd.f32 %v531_v23, %v515_v13  ;;  %v534_v35 = vadd.f32 %v530_v14, %v514_v4  ;;  %v805_v13 = vmul.f32 %v4614_v46, %v4501_v33 }
 0x119   :  { %v549_v44 = vpop.permute.xlu1 %548  ;;  %v547_v5 = vpop.permute.xlu0 %546 }
 0x11a   :  { %v559_v1 = vadd.f32 %v549_v44, %v523_v8  ;;  %v558_v11 = vadd.f32 %v547_v5, %v522_v0  ;;  %v777_v8 = vstv %s3905_s22  ;;  %v7717_v44 = vld [vmem:[#allocation20_spill] sm:$0xff]  ;;  %s5253_s22 = sld [smem:[#allocation8 + $0xc]] }
 0x11b   :  { %v779_v16 = vmul.f32 %v777_v8, %v7716_v52  ;;  %v780_v27 = vmul.f32 %v777_v8, %v4501_v33  ;;  %v781_v10 = vmul.f32 %v777_v8, %v4499_v32  ;;  %v778_v5 = vmul.f32 %v777_v8, %v7717_v44 }
 0x11c   :  { %v610_v34 = vadd.f32 %v4430_v47, %v559_v1  ;;  %v4585_v57 = vadd.f32 %v4433_v48, %v558_v11 }
 0x11d   :  { %v553_v49 = vpop.permute.xlu1 %552  ;;  %v551_v28 = vpop.permute.xlu0 %550  ;;  %v787_v17 = vrot.slane %v779_v16, 1  ;;  %v789_v38 = vrot.slane %v780_v27, 1  ;;  %v791_v2 = vrot.slane %v781_v10, 1  ;;  %v928_v16 = vstv %s3915_s25  ;;  %s5328_s25 = sld [smem:[#allocation8 + $0x33]] }
 0x11e   :  { %v561_v12 = vadd.f32 %v553_v49, %v525_v9  ;;  %v560_v45 = vadd.f32 %v551_v28, %v524_v58  ;;  %v812_v28 = vrot.slane %v4619_v43, 1  ;;  %v4658_v10 = vstv %s3921_s2  ;;  %s3933_s2 = sld [smem:[#allocation8 + $0xa]] }
 0x120   :  { %v4589_v3 = vadd.f32 %v7714_v15, %v561_v12  ;;  %v611_v54 = vadd.f32 %v4438_v41, %v560_v45  ;;  %v814_v12 = vrot.slane %v805_v13, 1  ;;  %v4630_v45 = vmul.f32 %v4614_v46, %v4499_v32 }
 0x121   :  { %v575_v63 = vpop.permute.xlu1 %574  ;;  %v573_v55 = vpop.permute.xlu0 %572  ;;  %v706_v15 = vmul.f32 %v705_v59, %v7717_v44  ;;  %v4678_v13 = vstv %s3923_s28  ;;  %s3936_s28 = sld [smem:[#allocation8 + $0x2f]] }
 0x122   :  { %v585_v61 = vadd.f32 %v575_v63, %v533_v40  ;;  %v584_v26 = vadd.f32 %v573_v55, %v532_v21  ;;  %v790_v21 = vsel %vm221_vm0, %v787_v17, %v789_v38 }
 0x124   :  { %v635_v47 = vadd.f32 %v4443_v50, %v585_v61  ;;  %v4594_v48 = vadd.f32 %v4446_v51, %v584_v26  ;;  %v708_v50 = vmul.f32 %v705_v59, %v4501_v33  ;;  %v786_v61 = vrot.slane %v778_v5, 1 }
 0x125   :  { %v579_v22 = vpop.permute.xlu1 %578  ;;  %v577_v29 = vpop.permute.xlu0 %576  ;;  %v815_v26 = vsel %vm221_vm0, %v812_v28, %v814_v12 }
 0x126   :  { %v587_v37 = vadd.f32 %v579_v22, %v535_v24  ;;  %v586_v20 = vadd.f32 %v577_v29, %v534_v35  ;;  %v7623_v29 = vrot.slane %v4630_v45, 1 }
 0x128   :  { %v4598_v56 = vadd.f32 %v7715_v25, %v587_v37  ;;  %v636_v41 = vadd.f32 %v4459_v60, %v586_v20  ;;  %v4606_v60 = vstv %s3902_s23  ;;  %s3938_s23 = sld [smem:[#allocation8 + $0x30]] }
 0x129   :  { %v658_v42 = vpop.permute.xlu1 %657  ;;  %v656_v36 = vpop.permute.xlu0 %655  ;;  %v718_v31 = vmul.f32 %v4606_v60, %v4501_v33  ;;  %v717_v1 = vmul.f32 %v4606_v60, %v7716_v52 }
 0x12a   :  { %v668_v53 = vadd.f32 %v658_v42, %v610_v34  ;;  %v792_v34 = vsel %vm221_vm0, %v789_v38, %v791_v2  ;;  %v667_v33 = vadd.f32 %v656_v36, %v4585_v57  ;;  %v709_v57 = vmul.f32 %v705_v59, %v4499_v32 }
 0x12b   :  { %v788_v36 = vsel %vm221_vm0, %v786_v61, %v787_v17 }
 0x12c   :  { %v711_v39 = vadd.f32 %v707_v19, %v668_v53  ;;  %v710_v20 = vadd.f32 %v706_v15, %v667_v33 }
 0x12d   :  { %v662_v7 = vpop.permute.xlu1 %661  ;;  %v660_v51 = vpop.permute.xlu0 %659 }
 0x12e   :  { %v669_v62 = vadd.f32 %v660_v51, %v611_v54  ;;  %v670_v37 = vadd.f32 %v662_v7, %v4589_v3  ;;  %v817_v51 = vsel %vm221_vm0, %v814_v12, %v7623_v29 }
 0x130   :  { %v712_v0 = vadd.f32 %v708_v50, %v669_v62  ;;  %v713_v8 = vadd.f32 %v709_v57, %v670_v37  ;;  %v4742_v57 = vstv %s4670_s10  ;;  %s3913_s10 = sld [smem:[#allocation9 + $0x1]] }
 0x131   :  { %v691_v18 = vpop.permute.xlu1 %690  ;;  %v4602_v6 = vpop.permute.xlu0 %688 }
 0x132   :  { %v701_v24 = vadd.f32 %v691_v18, %v635_v47 }
 0x134   :  { %v721_v55 = vadd.f32 %v717_v1, %v701_v24  ;;  %v4686_v24 = vmul.f32 %v4614_v46, %v7717_v44  ;;  %v4703_v46 = vstv %s3918_s30  ;;  %s901_s30 = sld [smem:[#allocation9]] }
 0x135   :  { %v4611_v9 = vpop.permute.xlu1 %694  ;;  %v693_v58 = vpop.permute.xlu0 %692 }
 0x136   :  { %v702_v30 = vadd.f32 %v693_v58, %v636_v41 }
 0x138   :  { %v722_v40 = vadd.f32 %v718_v31, %v702_v30 }
 0x139   :  { %v737_v23 = vpop.permute.xlu1 %736  ;;  %v735_v14 = vpop.permute.xlu0 %734 }
 0x13a   :  { %v747_v4 = vadd.f32 %v737_v23, %v711_v39  ;;  %v746_v41 = vadd.f32 %v735_v14, %v710_v20 }
 0x13c   :  { %v798_v35 = vadd.f32 %v790_v21, %v747_v4  ;;  %v797_v3 = vadd.f32 %v788_v36, %v746_v41  ;;  %v954_v21 = vstv %s3916_s27  ;;  %v4682_v4 = vmul.f32 %v4606_v60, %v7717_v44  ;;  %s3935_s27 = sld [smem:[#allocation8 + $0xb]] }
 0x13d   :  { %v741_v11 = vpop.permute.xlu1 %740  ;;  %v739_v49 = vpop.permute.xlu0 %738 }
 0x13e   :  { %v748_v54 = vadd.f32 %v739_v49, %v712_v0  ;;  %v749_v59 = vadd.f32 %v741_v11, %v713_v8  ;;  %v4701_v11 = vstv %s3917_s29  ;;  %s907_s29 = sld [smem:[#allocation8]] }
 0x140   :  { %v799_v63 = vadd.f32 %v792_v34, %v748_v54  ;;  %v800_v19 = vadd.f32 %v791_v2, %v749_v59 }
 0x141   :  { %v763_v47 = vpop.permute.xlu1 %762  ;;  %v4637_v22 = vpop.permute.xlu0 %760 }
 0x142   :  { %v773_v25 = vadd.f32 %v763_v47, %v721_v55 }
 0x144   :  { %v4642_v42 = vadd.f32 %v815_v26, %v773_v25  ;;  %v4730_v26 = vstv %s4660_s9  ;;  %s3914_s9 = sld [smem:[#allocation8 + $0x24]] }
 0x145   :  { %v4645_v50 = vpop.permute.xlu1 %766  ;;  %v765_v62 = vpop.permute.xlu0 %764 }
 0x146   :  { %v774_v0 = vadd.f32 %v765_v62, %v722_v40  ;;  %v4668_v40 = vstv %s3922_s26  ;;  %s3934_s26 = sld [smem:[#allocation8 + $0x2e]] }
 0x148   :  { %v4650_v7 = vadd.f32 %v817_v51, %v774_v0 }
 0x149   :  { %v846_v18 = vpop.permute.xlu1 %845  ;;  %v844_v52 = vpop.permute.xlu0 %843 }
 0x14a   :  { %v4652_v27 = vadd.f32 %v846_v18, %v798_v35  ;;  %v4654_v53 = vadd.f32 %v844_v52, %v797_v3  ;;  %v4690_v35 = vmul.f32 %v4606_v60, %v4499_v32 }
 0x14c   :  { %v930_v31 = vmul.f32 %v928_v16, %v4652_v27  ;;  %v929_v58 = vmul.f32 %v928_v16, %v4654_v53  ;;  %v4676_v2 = vmul.f32 %v4658_v10, %v4652_v27  ;;  %v4694_v5 = vmul.f32 %v4668_v40, %v4652_v27 }
 0x14d   :  { %v850_v17 = vpop.permute.xlu1 %849  ;;  %v848_v38 = vpop.permute.xlu0 %847  ;;  %v956_v1 = vmul.f32 %v954_v21, %v4652_v27  ;;  %v955_v60 = vmul.f32 %v954_v21, %v4654_v53  ;;  %v4718_v49 = vmul.f32 %v4678_v13, %v4652_v27  ;;  %v4767_v3 = vmul.f32 %v4730_v26, %v4652_v27 }
 0x14e   :  { %v4662_v30 = vadd.f32 %v850_v17, %v800_v19  ;;  %v4664_v39 = vadd.f32 %v848_v38, %v799_v63  ;;  %939 = vrot.lane.b32.xlu1 %v930_v31, %s4149_s21  ;;  %937 = vrot.lane.b32.xlu0 %v929_v58, %s4149_s21  ;;  %v7621_v12 = vrot.slane %v4676_v2, 1  ;;  %v7620_v55 = vrot.slane %v4694_v5, 1 }
 0x14f   :  { %v7614_v36 = vrot.slane %v4718_v49, 1  ;;  %v700_v19 = vadd.f32 %v4602_v6, %v4594_v48  ;;  %v4792_v58 = vmul.f32 %v4742_v57, %v4652_v27  ;;  %v4795_v17 = vstv %s4707_s12  ;;  %s5629_s12 = sld [smem:[#allocation8 + $0x9]] }
 0x150   :  { %v932_v23 = vmul.f32 %v928_v16, %v4662_v30  ;;  %v931_v14 = vmul.f32 %v928_v16, %v4664_v39  ;;  %v1085_v32 = vmul.f32 %v4658_v10, %v4664_v39  ;;  %v4712_v44 = vmul.f32 %v4658_v10, %v4662_v30 }
 0x151   :  { %v1118_v34 = vmul.f32 %v4668_v40, %v4664_v39  ;;  %v4723_v15 = vmul.f32 %v4668_v40, %v4662_v30  ;;  %v1151_v54 = vmul.f32 %v4678_v13, %v4664_v39  ;;  %v958_v47 = vmul.f32 %v954_v21, %v4662_v30 }
 0x152   :  { %943 = vrot.lane.b32.xlu1 %v932_v23, %s4149_s21  ;;  %941 = vrot.lane.b32.xlu0 %v931_v14, %s4149_s21  ;;  %v1094_v33 = vrot.slane %v1085_v32, 1  ;;  %v7619_v63 = vrot.slane %v4712_v44, 1  ;;  %v957_v62 = vmul.f32 %v954_v21, %v4664_v39  ;;  %v4763_v0 = vmul.f32 %v4678_v13, %v4662_v30 }
 0x153   :  { %v1127_v61 = vrot.slane %v1118_v34, 1  ;;  %v7615_v20 = vrot.slane %v4723_v15, 1  ;;  %v1160_v51 = vrot.slane %v1151_v54, 1  ;;  %v1184_v18 = vmul.f32 %v4730_v26, %v4664_v39 }
 0x154   :  { %v4738_v37 = vsel %vm221_vm0, %v7621_v12, %v1094_v33  ;;  %v4747_v25 = vsel %vm221_vm0, %v1094_v33, %v7619_v63  ;;  %v4778_v52 = vmul.f32 %v4730_v26, %v4662_v30  ;;  %v4781_v16 = vstv %s4696_s11  ;;  %s3951_s11 = sld [smem:[#allocation8 + $0x13]] }
 0x155   :  { %v4752_v41 = vsel %vm221_vm0, %v7620_v55, %v1127_v61  ;;  %v4759_v8 = vsel %vm221_vm0, %v1127_v61, %v7615_v20  ;;  %v4772_v59 = vsel %vm221_vm0, %v7614_v36, %v1160_v51  ;;  %v7612_v31 = vrot.slane %v4763_v0, 1 }
 0x156   :  { %965 = vrot.lane.b32.xlu1 %v956_v1, %s4149_s21  ;;  %963 = vrot.lane.b32.xlu0 %v955_v60, %s4149_s21  ;;  %v7613_v38 = vrot.slane %v4767_v3, 1  ;;  %v1193_v21 = vrot.slane %v1184_v18, 1  ;;  %v7610_v23 = vrot.slane %v4778_v52, 1  ;;  %v1268_v48 = vmul.f32 %v4742_v57, %v4664_v39 }
 0x157   :  { %v703_v6 = vadd.f32 %v4611_v9, %v4598_v56  ;;  %v982_v14 = vmul.f32 %v4701_v11, %v4652_v27  ;;  %v981_v1 = vmul.f32 %v4701_v11, %v4654_v53  ;;  %v4810_v32 = vsel %vm221_vm0, %v1160_v51, %v7612_v31 }
 0x158   :  { %v4815_v60 = vsel %vm221_vm0, %v7613_v38, %v1193_v21  ;;  %v4820_v56 = vsel %vm221_vm0, %v1193_v21, %v7610_v23  ;;  %v7611_v9 = vrot.slane %v4792_v58, 2  ;;  %v1277_v34 = vrot.slane %v1268_v48, 2 }
 0x159   :  { %v4827_v33 = vmul.f32 %v4742_v57, %v4662_v30  ;;  %v4831_v54 = vmul.f32 %v4781_v16, %v4652_v27  ;;  %v1301_v61 = vmul.f32 %v4781_v16, %v4664_v39  ;;  %v4848_v18 = vmul.f32 %v4795_v17, %v4652_v27 }
 0x15a   :  { %969 = vrot.lane.b32.xlu1 %v958_v47, %s4149_s21  ;;  %967 = vrot.lane.b32.xlu0 %v957_v62, %s4149_s21  ;;  %v984_v47 = vmul.f32 %v4701_v11, %v4662_v30  ;;  %v4840_v51 = vsel %vm1223_vm1, %v7611_v9, %v1277_v34  ;;  %v4844_v62 = vmul.f32 %v4781_v16, %v4662_v30  ;;  %v4859_v38 = vstv %s4783_s13  ;;  %s6317_s13 = sld [smem:[#allocation8 + $0x3f]] }
 0x15b   :  { %v983_v21 = vmul.f32 %v4701_v11, %v4664_v39  ;;  %v7618_v48 = vrot.slane %v4827_v33, 2  ;;  %v720_v23 = vadd.f32 %v4682_v4, %v700_v19  ;;  %v1334_v31 = vmul.f32 %v4795_v17, %v4664_v39 }
 0x15c   :  { %v7616_v9 = vrot.slane %v4844_v62, 2  ;;  %v811_v36 = vrot.slane %v4686_v24, 1  ;;  %v723_v20 = vadd.f32 %v4690_v35, %v703_v6  ;;  %v879_v24 = vpop.permute.xlu1 %878  ;;  %v877_v35 = vpop.permute.xlu0 %876  ;;  %v7622_v6 = vrot.slane %v4848_v18, 2 }
 0x15d   :  { %v4868_v11 = vsel %vm1223_vm1, %v1277_v34, %v7618_v48  ;;  %v1343_v34 = vrot.slane %v1334_v31, 2  ;;  %v1367_v31 = vmul.f32 %v4859_v38, %v4664_v39  ;;  %v4917_v63 = vmul.f32 %v4859_v38, %v4662_v30 }
 0x15e   :  { %991 = vrot.lane.b32.xlu1 %v982_v14, %s4150_s3  ;;  %989 = vrot.lane.b32.xlu0 %v981_v1, %s4150_s3  ;;  %v7617_v14 = vrot.slane %v4831_v54, 2  ;;  %v1310_v1 = vrot.slane %v1301_v61, 2  ;;  %v4887_v61 = vmul.f32 %v4795_v17, %v4662_v30  ;;  %v772_v55 = vadd.f32 %v4637_v22, %v720_v23 }
 0x15f   :  { %7721 = vst [vmem:[#allocation22_spill] sm:$0xff] %v4917_v63  ;;  %v775_v12 = vadd.f32 %v4645_v50, %v723_v20  ;;  %v813_v29 = vsel %vm221_vm0, %v811_v36, %v812_v28  ;;  %v7627_v50 = vrot.slane %v4917_v63, 2  ;;  %v1010_v43 = vmul.f32 %v4703_v46, %v4662_v30 }
 0x160   :  { %v4873_v4 = vsel %vm1223_vm1, %v7617_v14, %v1310_v1  ;;  %v4882_v19 = vsel %vm1223_vm1, %v1310_v1, %v7616_v9  ;;  %7718 = vst [vmem:[#allocation19_spill] sm:$0xff] %v4887_v61  ;;  %v4899_v1 = vmul.f32 %v4859_v38, %v4652_v27  ;;  %v1083_v9 = vmul.f32 %v4658_v10, %v4654_v53  ;;  %v883_v36 = vpop.permute.xlu1 %882  ;;  %v881_v23 = vpop.permute.xlu0 %880 }
 0x161   :  { %v4912_v14 = vsel %vm1223_vm1, %v7622_v6, %v1343_v34  ;;  %v7624_v48 = vrot.slane %v4887_v61, 2  ;;  %v1376_v6 = vrot.slane %v1367_v31, 2  ;;  %v1009_v28 = vmul.f32 %v4703_v46, %v4664_v39 }
 0x162   :  { %995 = vrot.lane.b32.xlu1 %v984_v47, %s4150_s3  ;;  %993 = vrot.lane.b32.xlu0 %v983_v21, %s4150_s3  ;;  %v1008_v47 = vmul.f32 %v4703_v46, %v4652_v27  ;;  %v1007_v21 = vmul.f32 %v4703_v46, %v4654_v53  ;;  %7719 = vst [vmem:[#allocation20_spill] sm:$0xff] %v4899_v1  ;;  %7720 = vst [vmem:[#allocation21_spill] sm:$0xff] %v4912_v14  ;;  %v7625_v10 = vrot.slane %v4899_v1, 2 }
 0x163   :  { %v4938_v22 = vsel %vm1223_vm1, %v1343_v34, %v7624_v48  ;;  %v1091_v34 = vrot.slane %v1083_v9, 1  ;;  %v822_v31 = vadd.f32 %v813_v29, %v772_v55  ;;  %v7725_v46 = vrot.slane %v4630_v45, 1 }
 0x164   :  { %7722 = vst [vmem:[#allocation23_spill] sm:$0xff] %v4938_v22  ;;  %v4952_v20 = vsel %vm1223_vm1, %v7625_v10, %v1376_v6  ;;  %v1571_v9 = vstv %s4875_s0  ;;  %v1637_v10 = vstv %s4891_s4  ;;  %v4969_v63 = vstv %s4877_s5  ;;  %s5647_s4 = sld [smem:[#allocation8 + $0x37]]  ;;  %s6319_s0 = sld [smem:[#allocation8 + $0x1e]] }
 0x165   :  { %7723 = vst [vmem:[#allocation24_spill] sm:$0xff] %v4952_v20  ;;  %v825_v48 = vadd.f32 %v7725_v46, %v775_v12  ;;  %7726 = vst [vmem:[#allocation26_spill] sm:$0xff] %v4969_v63  ;;  %v4972_v29 = vadd.f32 %v879_v24, %v4642_v42  ;;  %v4974_v45 = vadd.f32 %v877_v35, %v822_v31  ;;  %v4985_v46 = vstv %s4903_s6  ;;  %s3975_s6 = sld [smem:[#allocation8 + $0x1f]]  ;;  %s6380_s5 = sld [smem:[#allocation8 + $0x42]] }
 0x166   :  { %1017 = vrot.lane.b32.xlu1 %v1008_v47, %s4150_s3  ;;  %1015 = vrot.lane.b32.xlu0 %v1007_v21, %s4150_s3  ;;  %v1116_v47 = vmul.f32 %v4668_v40, %v4654_v53  ;;  %v4959_v21 = vsel %vm1223_vm1, %v1376_v6, %v7627_v50  ;;  %v1604_v40 = vstv %s4889_s14  ;;  %v4979_v55 = vadd.f32 %v881_v23, %v4650_v7  ;;  %s3971_s14 = sld [smem:[#allocation8 + $0x1d]] }
 0x167   :  { %7724 = vst [vmem:[#allocation25_spill] sm:$0xff] %v4959_v21  ;;  %v4976_v12 = vadd.f32 %v883_v36, %v825_v48  ;;  %v7727_v6 = vrot.slane %v4676_v2, 1  ;;  %7728 = vst [vmem:[#allocation27_spill] sm:$0xff] %v4985_v46  ;;  %v4988_v50 = vstv %s4905_s15  ;;  %v4994_v42 = vstv %s4919_s16  ;;  %s3976_s15 = sld [smem:[#allocation8 + $0x43]]  ;;  %s3977_s16 = sld [smem:[#allocation8 + $0x20]] }
 0x168   :  { %v4997_v48 = vstv %s4921_s17  ;;  %v5000_v7 = vstv %s4928_s18  ;;  %v5003_v24 = vstv %s4930_s7  ;;  %v5006_v2 = vstv %s4941_s19  ;;  %s5690_s18 = sld [smem:[#allocation8 + $0x2d]]  ;;  %s5698_s7 = sld [smem:[#allocation8 + $0x14]] }
 0x169   :  { %v5009_v35 = vstv %s4943_s20  ;;  %v1573_v36 = vmul.f32 %v1571_v9, %v4972_v29  ;;  %v1574_v23 = vmul.f32 %v1571_v9, %v4979_v55  ;;  %v1607_v21 = vmul.f32 %v1604_v40, %v4979_v55  ;;  %s3954_s19 = sld [smem:[#allocation8 + $0x38]]  ;;  %s3957_s20 = sld [smem:[#allocation8 + $0x16]] }
 0x16a   :  { %1021 = vrot.lane.b32.xlu1 %v1010_v43, %s4150_s3  ;;  %1019 = vrot.lane.b32.xlu0 %v1009_v28, %s4150_s3  ;;  %v1093_v43 = vsel %vm221_vm0, %v1091_v34, %v7727_v6  ;;  %v1124_v28 = vrot.slane %v1116_v47, 1  ;;  %7729 = vst [vmem:[#allocation28_spill] sm:$0xff] %v5009_v35  ;;  %v5015_v34 = vmul.f32 %v1571_v9, %v4976_v12  ;;  %v7731_v47 = vrot.slane %v4694_v5, 1  ;;  %s3978_s17 = sld [smem:[#allocation8 + $0x44]] }
 0x16b   :  { %v1149_v6 = vmul.f32 %v4678_v13, %v4654_v53  ;;  %v7732_v20 = vrot.slane %v4712_v44, 1  ;;  %v1583_v1 = vrot.slane %v1574_v23, 1  ;;  %v1605_v13 = vmul.f32 %v1604_v40, %v4974_v45 }
 0x16c   :  { %7730 = vst [vmem:[#allocation29_spill] sm:$0xff] %v5015_v34  ;;  %v1126_v31 = vsel %vm221_vm0, %v1124_v28, %v7731_v47  ;;  %v7630_v5 = vrot.slane %v5015_v34, 1  ;;  %v1616_v47 = vrot.slane %v1607_v21, 1  ;;  %v5032_v61 = vmul.f32 %v1604_v40, %v4976_v12 }
 0x16d   :  { %v1640_v23 = vmul.f32 %v1637_v10, %v4979_v55  ;;  %v1157_v34 = vrot.slane %v1149_v6, 1 }
 0x16e   :  { %1100 = vrot.lane.b32.xlu1 %v4738_v37, %s4149_s21  ;;  %1098 = vrot.lane.b32.xlu0 %v1093_v43, %s4149_s21  ;;  %v1572_v37 = vmul.f32 %v1571_v9, %v4974_v45  ;;  %v1606_v43 = vmul.f32 %v1604_v40, %v4972_v29  ;;  %v1581_v9 = vrot.slane %v1573_v36, 1  ;;  %v1613_v36 = vrot.slane %v1605_v13, 1 }
 0x16f   :  { %v7633_v40 = vrot.slane %v5032_v61, 1 }
 0x170   :  { %v1580_v22 = vrot.slane %v1572_v37, 1  ;;  %v1614_v28 = vrot.slane %v1606_v43, 1  ;;  %v5035_v14 = vsel %vm221_vm0, %v1581_v9, %v1583_v1  ;;  %v1638_v37 = vmul.f32 %v1637_v10, %v4974_v45 }
 0x171   :  { %v1035_v43 = vmul.f32 %v4969_v63, %v4664_v39 }
 0x172   :  { %1104 = vrot.lane.b32.xlu1 %v7732_v20, %s4149_s21  ;;  %1102 = vrot.lane.b32.xlu0 %v4747_v25, %s4149_s21  ;;  %v5038_v44 = vsel %vm221_vm0, %v1580_v22, %v1581_v9  ;;  %v5043_v25 = vsel %vm221_vm0, %v1583_v1, %v7630_v5  ;;  %v1639_v20 = vmul.f32 %v1637_v10, %v4972_v29 }
 0x173   :  { %7733 = vst [vmem:[#allocation30_spill] sm:$0xff] %v5038_v44  ;;  %7734 = vst [vmem:[#allocation31_spill] sm:$0xff] %v5043_v25  ;;  %v5047_v21 = vsel %vm221_vm0, %v1614_v28, %v1616_v47  ;;  %v5057_v1 = vmul.f32 %v4969_v63, %v4652_v27  ;;  %v1182_v9 = vmul.f32 %v4730_v26, %v4654_v53 }
 0x174   :  { %7735 = vst [vmem:[#allocation32_spill] sm:$0xff] %v5047_v21  ;;  %v1647_v22 = vrot.slane %v1639_v20, 1  ;;  %v5064_v13 = vsel %vm221_vm0, %v1613_v36, %v1614_v28  ;;  %v1646_v20 = vrot.slane %v1638_v37, 1  ;;  %v1044_v21 = vrot.slane %v1035_v43, 1 }
 0x175   :  { %7736 = vst [vmem:[#allocation33_spill] sm:$0xff] %v5057_v1  ;;  %v7632_v5 = vrot.slane %v5057_v1, 1  ;;  %v5073_v25 = vmul.f32 %v1637_v10, %v4976_v12  ;;  %v5080_v26 = vmul.f32 %v4969_v63, %v4662_v30  ;;  %v1672_v28 = vmul.f32 %v4994_v42, %v4972_v29 }
 0x176   :  { %1133 = vrot.lane.b32.xlu1 %v4752_v41, %s4149_s21  ;;  %1131 = vrot.lane.b32.xlu0 %v1126_v31, %s4149_s21  ;;  %v5069_v41 = vsel %vm221_vm0, %v1616_v47, %v7633_v40  ;;  %v1649_v31 = vrot.slane %v1640_v23, 1  ;;  %v7738_v47 = vrot.slane %v4723_v15, 1  ;;  %v5090_v10 = vsel %vm221_vm0, %v1646_v20, %v1647_v22 }
 0x177   :  { %7737 = vst [vmem:[#allocation34_spill] sm:$0xff] %v5080_v26  ;;  %v5095_v6 = vsel %vm221_vm0, %v7632_v5, %v1044_v21  ;;  %v7636_v36 = vrot.slane %v5073_v25, 1  ;;  %v1673_v23 = vmul.f32 %v4994_v42, %v4979_v55  ;;  %v1190_v37 = vrot.slane %v1182_v9, 1 }
 0x178   :  { %v5076_v44 = vsel %vm221_vm0, %v1647_v22, %v1649_v31  ;;  %v7635_v15 = vrot.slane %v5080_v26, 1  ;;  %v1680_v43 = vrot.slane %v1672_v28, 1  ;;  %v1060_v5 = vmul.f32 %v4985_v46, %v4664_v39 }
 0x179   :  { %v5106_v22 = vsel %vm221_vm0, %v1649_v31, %v7636_v36  ;;  %v1682_v20 = vrot.slane %v1673_v23, 1  ;;  %v7740_v9 = vrot.slane %v4718_v49, 1  ;;  %v5124_v31 = vmul.f32 %v4994_v42, %v4976_v12 }
 0x17a   :  { %1137 = vrot.lane.b32.xlu1 %v7738_v47, %s4149_s21  ;;  %1135 = vrot.lane.b32.xlu0 %v4759_v8, %s4149_s21  ;;  %v1671_v8 = vmul.f32 %v4994_v42, %v4974_v45  ;;  %v5110_v47 = vmul.f32 %v4985_v46, %v4652_v27  ;;  %v5120_v40 = vsel %vm221_vm0, %v1044_v21, %v7635_v15 }
 0x17b   :  { %v1159_v28 = vsel %vm221_vm0, %v1157_v34, %v7740_v9  ;;  %v5130_v23 = vsel %vm221_vm0, %v1680_v43, %v1682_v20  ;;  %v1069_v34 = vrot.slane %v1060_v5, 1  ;;  %v5135_v21 = vmul.f32 %v4985_v46, %v4662_v30 }
 0x17c   :  { %7739 = vst [vmem:[#allocation35_spill] sm:$0xff] %v5110_v47  ;;  %v1679_v1 = vrot.slane %v1671_v8, 1  ;;  %v7638_v49 = vrot.slane %v5110_v47, 1  ;;  %v5139_v8 = vmul.f32 %v4742_v57, %v4654_v53  ;;  %v1755_v9 = vmul.f32 %v4997_v48, %v4972_v29 }
 0x17d   :  { %7741 = vst [vmem:[#allocation36_spill] sm:$0xff] %v5135_v21  ;;  %v1756_v15 = vmul.f32 %v4997_v48, %v4979_v55  ;;  %v1754_v57 = vmul.f32 %v4997_v48, %v4974_v45 }
 0x17e   :  { %1166 = vrot.lane.b32.xlu1 %v4772_v59, %s4150_s3  ;;  %1164 = vrot.lane.b32.xlu0 %v1159_v28, %s4150_s3  ;;  %v5142_v42 = vsel %vm221_vm0, %v1679_v1, %v1680_v43  ;;  %v7639_v59 = vrot.slane %v5124_v31, 1  ;;  %v5150_v5 = vsel %vm221_vm0, %v7638_v49, %v1069_v34  ;;  %v7742_v1 = vrot.slane %v4767_v3, 1 }
 0x17f   :  { %v1763_v47 = vrot.slane %v1755_v9, 2  ;;  %v5167_v49 = vmul.f32 %v4997_v48, %v4976_v12  ;;  %v7743_v28 = vrot.slane %v4763_v0, 1  ;;  %v7744_v3 = vrot.slane %v5135_v21, 1 }
 0x180   :  { %v1192_v43 = vsel %vm221_vm0, %v1190_v37, %v7742_v1  ;;  %v5163_v36 = vsel %vm221_vm0, %v1682_v20, %v7639_v59  ;;  %v1765_v1 = vrot.slane %v1756_v15, 2  ;;  %v1762_v20 = vrot.slane %v1754_v57, 2 }
 0x181   :  { %v5177_v37 = vsel %vm221_vm0, %v1069_v34, %v7744_v3  ;;  %v1788_v9 = vmul.f32 %v5000_v7, %v4972_v29  ;;  %v7642_v48 = vrot.slane %v5167_v49, 2  ;;  %v1789_v59 = vmul.f32 %v5000_v7, %v4979_v55 }
 0x182   :  { %1170 = vrot.lane.b32.xlu1 %v7743_v28, %s4150_s3  ;;  %1168 = vrot.lane.b32.xlu0 %v4810_v32, %s4150_s3  ;;  %v1787_v0 = vmul.f32 %v5000_v7, %v4974_v45  ;;  %v5188_v32 = vmul.f32 %v5000_v7, %v4976_v12  ;;  %v5191_v34 = vsel %vm1223_vm1, %v1763_v47, %v1765_v1 }
 0x183   :  { %v5194_v15 = vsel %vm1223_vm1, %v1762_v20, %v1763_v47  ;;  %v1796_v28 = vrot.slane %v1788_v9, 2  ;;  %v1821_v57 = vmul.f32 %v5003_v24, %v4972_v29  ;;  %v5201_v3 = vsel %vm1223_vm1, %v1765_v1, %v7642_v48 }
 0x184   :  { %7745 = vst [vmem:[#allocation37_spill] sm:$0xff] %v5201_v3  ;;  %v1798_v21 = vrot.slane %v1789_v59, 2  ;;  %v1795_v26 = vrot.slane %v1787_v0, 2  ;;  %v7645_v7 = vrot.slane %v5188_v32, 2  ;;  %v1822_v47 = vmul.f32 %v5003_v24, %v4979_v55 }
 0x185   :  { %v1829_v20 = vrot.slane %v1821_v57, 2  ;;  %v1820_v9 = vmul.f32 %v5003_v24, %v4974_v45  ;;  %v5213_v1 = vmul.f32 %v4988_v50, %v4652_v27  ;;  %v1274_v57 = vrot.slane %v5139_v8, 2 }
 0x186   :  { %1199 = vrot.lane.b32.xlu1 %v4815_v60, %s4150_s3  ;;  %1197 = vrot.lane.b32.xlu0 %v1192_v43, %s4150_s3  ;;  %v5216_v59 = vsel %vm1223_vm1, %v1796_v28, %v1798_v21  ;;  %v5219_v0 = vsel %vm1223_vm1, %v1795_v26, %v1796_v28  ;;  %v5224_v60 = vsel %vm1223_vm1, %v1798_v21, %v7645_v7  ;;  %v1831_v48 = vrot.slane %v1822_v47, 2 }
 0x187   :  { %7746 = vst [vmem:[#allocation38_spill] sm:$0xff] %v5213_v1  ;;  %7747 = vst [vmem:[#allocation39_spill] sm:$0xff] %v5216_v59  ;;  %v1217_v43 = vmul.f32 %v4988_v50, %v4664_v39  ;;  %v1828_v46 = vrot.slane %v1820_v9, 2  ;;  %v7646_v63 = vrot.slane %v5213_v1, 2  ;;  %v5232_v59 = vmul.f32 %v5003_v24, %v4976_v12 }
 0x188   :  { %v5236_v26 = vmul.f32 %v4988_v50, %v4662_v30  ;;  %v1854_v21 = vmul.f32 %v5006_v2, %v4972_v29  ;;  %v7749_v28 = vrot.slane %v4778_v52, 1  ;;  %v5246_v8 = vsel %vm1223_vm1, %v1829_v20, %v1831_v48 }
 0x189   :  { %v1227_v3 = vrot.slane %v1217_v43, 2  ;;  %v5249_v24 = vsel %vm1223_vm1, %v1828_v46, %v1829_v20  ;;  %v1855_v47 = vmul.f32 %v5006_v2, %v4979_v55  ;;  %v1299_v9 = vmul.f32 %v4781_v16, %v4654_v53 }
 0x18a   :  { %7748 = vst [vmem:[#allocation40_spill] sm:$0xff] %v5236_v26  ;;  %1203 = vrot.lane.b32.xlu1 %v7749_v28, %s4150_s3  ;;  %1201 = vrot.lane.b32.xlu0 %v4820_v56, %s4150_s3  ;;  %v7649_v56 = vrot.slane %v5232_v59, 2  ;;  %v7648_v43 = vrot.slane %v5236_v26, 2  ;;  %v1862_v46 = vrot.slane %v1854_v21, 2  ;;  %v1853_v28 = vmul.f32 %v5006_v2, %v4974_v45 }
 0x18b   :  { %v5260_v52 = vsel %vm1223_vm1, %v7646_v63, %v1227_v3  ;;  %v1864_v20 = vrot.slane %v1855_v47, 2  ;;  %v5268_v7 = vmul.f32 %v5009_v35, %v4652_v27  ;;  %v7751_v16 = vrot.slane %v4792_v58, 2 }
 0x18c   :  { %v5276_v1 = vsel %vm1223_vm1, %v1831_v48, %v7649_v56  ;;  %v5281_v21 = vsel %vm1223_vm1, %v1227_v3, %v7648_v43  ;;  %v1243_v47 = vmul.f32 %v5009_v35, %v4664_v39  ;;  %v5293_v48 = vmul.f32 %v5006_v2, %v4976_v12 }
 0x18d   :  { %7750 = vst [vmem:[#allocation41_spill] sm:$0xff] %v5268_v7  ;;  %v1276_v63 = vsel %vm1223_vm1, %v1274_v57, %v7751_v16  ;;  %v5289_v58 = vsel %vm1223_vm1, %v1862_v46, %v1864_v20  ;;  %v1861_v57 = vrot.slane %v1853_v28, 2  ;;  %v7650_v3 = vrot.slane %v5268_v7, 2 }
 0x18e   :  { %1283 = vrot.lane.b32.xlu1 %v4840_v51, %s4149_s21  ;;  %1281 = vrot.lane.b32.xlu0 %v1276_v63, %s4149_s21  ;;  %7752 = vst [vmem:[#allocation42_spill] sm:$0xff] %v5293_v48  ;;  %v1252_v16 = vrot.slane %v1243_v47, 2  ;;  %v5298_v43 = vmul.f32 %v5009_v35, %v4662_v30  ;;  %v1307_v56 = vrot.slane %v1299_v9, 2  ;;  %v7653_v63 = vrot.slane %v5293_v48, 2 }
 0x18f   :  { %v5301_v51 = vsel %vm1223_vm1, %v1861_v57, %v1862_v46  ;;  %v7755_v47 = vrot.slane %v4827_v33, 2  ;;  %v1332_v9 = vmul.f32 %v4795_v17, %v4654_v53  ;;  %v1521_v57 = vstv %s5253_s22  ;;  %s3958_s22 = sld [smem:[#allocation8 + $0x3a]] }
 0x190   :  { %7753 = vst [vmem:[#allocation43_spill] sm:$0xff] %v5298_v43  ;;  %7754 = vst [vmem:[#allocation44_spill] sm:$0xff] %v5301_v51  ;;  %v5307_v28 = vsel %vm1223_vm1, %v7650_v3, %v1252_v16  ;;  %v7654_v2 = vrot.slane %v5298_v43, 2  ;;  %v5320_v46 = vsel %vm1223_vm1, %v1864_v20, %v7653_v63  ;;  %v1546_v7 = vstv %s3938_s23  ;;  %s3959_s23 = sld [smem:[#allocation8 + $0x17]] }
 0x191   :  { %7756 = vst [vmem:[#allocation45_spill] sm:$0xff] %v5320_v46  ;;  %v7757_v33 = vrot.slane %v4831_v54, 2  ;;  %v1523_v17 = vmul.f32 %v1521_v57, %v4972_v29  ;;  %v1524_v26 = vmul.f32 %v1521_v57, %v4979_v55  ;;  %v1522_v20 = vmul.f32 %v1521_v57, %v4974_v45 }
 0x192   :  { %1287 = vrot.lane.b32.xlu1 %v7755_v47, %s4149_s21  ;;  %1285 = vrot.lane.b32.xlu0 %v4868_v11, %s4149_s21  ;;  %v5326_v3 = vsel %vm1223_vm1, %v1252_v16, %v7654_v2  ;;  %v1703_v47 = vstv %s3943_s24  ;;  %v5337_v63 = vmul.f32 %v1521_v57, %v4976_v12  ;;  %v1340_v16 = vrot.slane %v1332_v9, 2  ;;  %s5788_s24 = sld [smem:[#allocation8 + $0x3b]] }
 0x193   :  { %v1309_v11 = vsel %vm1223_vm1, %v1307_v56, %v7757_v33  ;;  %v1548_v54 = vmul.f32 %v1546_v7, %v4972_v29  ;;  %v1549_v56 = vmul.f32 %v1546_v7, %v4979_v55  ;;  %v1547_v33 = vmul.f32 %v1546_v7, %v4974_v45 }
 0x194   :  { %7758 = vst [vmem:[#allocation46_spill] sm:$0xff] %v5337_v63  ;;  %v1531_v2 = vrot.slane %v1523_v17, 1  ;;  %v1533_v43 = vrot.slane %v1524_v26, 1  ;;  %v1530_v35 = vrot.slane %v1522_v20, 1  ;;  %v7658_v46 = vrot.slane %v5337_v63, 1  ;;  %v7787_v63 = vld [vmem:[#allocation29_spill] sm:$0xff] }
 0x195   :  { %v1556_v48 = vrot.slane %v1548_v54, 1  ;;  %v1558_v57 = vrot.slane %v1549_v56, 1  ;;  %v1555_v51 = vrot.slane %v1547_v33, 1  ;;  %v1705_v17 = vmul.f32 %v1703_v47, %v4972_v29 }
 0x196   :  { %1316 = vrot.lane.b32.xlu1 %v4873_v4, %s4149_s21  ;;  %1314 = vrot.lane.b32.xlu0 %v1309_v11, %s4149_s21  ;;  %v5347_v4 = vmul.f32 %v1546_v7, %v4976_v12  ;;  %v5350_v9 = vsel %vm221_vm0, %v1531_v2, %v1533_v43  ;;  %v5353_v11 = vsel %vm221_vm0, %v1530_v35, %v1531_v2  ;;  %v7763_v20 = vrot.slane %v4844_v62, 2 }
 0x197   :  { %7760 = vst [vmem:[#allocation48_spill] sm:$0xff] %v5350_v9  ;;  %7761 = vst [vmem:[#allocation49_spill] sm:$0xff] %v5353_v11  ;;  %v5358_v26 = vsel %vm221_vm0, %v1533_v43, %v7658_v46  ;;  %v5367_v7 = vsel %vm221_vm0, %v1556_v48, %v1558_v57  ;;  %v5370_v35 = vsel %vm221_vm0, %v1555_v51, %v1556_v48  ;;  %v1713_v54 = vrot.slane %v1705_v17, 2 }
 0x198   :  { %7759 = vst [vmem:[#allocation47_spill] sm:$0xff] %v5347_v4  ;;  %7762 = vst [vmem:[#allocation50_spill] sm:$0xff] %v5358_v26  ;;  %v7659_v2 = vrot.slane %v5347_v4, 1  ;;  %v1706_v43 = vmul.f32 %v1703_v47, %v4979_v55  ;;  %v1704_v56 = vmul.f32 %v1703_v47, %v4974_v45  ;;  %v5376_v33 = vmul.f32 %v1703_v47, %v4976_v12  ;;  %v7769_v47 = vld [vmem:[#allocation21_spill] sm:$0xff] }
 0x199   :  { %7764 = vst [vmem:[#allocation51_spill] sm:$0xff] %v5367_v7  ;;  %7765 = vst [vmem:[#allocation52_spill] sm:$0xff] %v5370_v35  ;;  %v1728_v62 = vstv %s5328_s25  ;;  %v1365_v46 = vmul.f32 %v4859_v38, %v4654_v53  ;;  %v5498_v26 = vstv %s3913_s10  ;;  %v7788_v11 = vrot.slane %v7787_v63, 1  ;;  %s5822_s25 = sld [smem:[#allocation8 + $0x19]]  ;;  %s6862_s10 = sld [smem:[#allocation11 + $0x20]] }
 0x19a   :  { %1320 = vrot.lane.b32.xlu1 %v7763_v20, %s4149_s21  ;;  %1318 = vrot.lane.b32.xlu0 %v4882_v19, %s4149_s21  ;;  %7766 = vst [vmem:[#allocation53_spill] sm:$0xff] %v5376_v33  ;;  %v7767_v20 = vrot.slane %v4848_v18, 2  ;;  %v5387_v48 = vsel %vm221_vm0, %v1558_v57, %v7659_v2  ;;  %v1715_v51 = vrot.slane %v1706_v43, 2  ;;  %v1712_v17 = vrot.slane %v1704_v56, 2 }
 0x19b   :  { %7768 = vst [vmem:[#allocation54_spill] sm:$0xff] %v5387_v48  ;;  %v7662_v35 = vrot.slane %v5376_v33, 2  ;;  %v1730_v18 = vmul.f32 %v1728_v62, %v4972_v29  ;;  %v1729_v38 = vmul.f32 %v1728_v62, %v4974_v45  ;;  %v5408_v56 = vmul.f32 %v1728_v62, %v4976_v12 }
 0x19c   :  { %v1342_v19 = vsel %vm1223_vm1, %v1340_v16, %v7767_v20  ;;  %v1731_v16 = vmul.f32 %v1728_v62, %v4979_v55  ;;  %v5397_v20 = vsel %vm1223_vm1, %v1713_v54, %v1715_v51  ;;  %v5400_v57 = vsel %vm1223_vm1, %v1712_v17, %v1713_v54  ;;  %v7776_v54 = vld [vmem:[#allocation23_spill] sm:$0xff]  ;;  %v7780_v17 = vld [vmem:[#allocation20_spill] sm:$0xff] }
 0x19d   :  { %7770 = vst [vmem:[#allocation21_spill] sm:$0xff] %v5397_v20  ;;  %7771 = vst [vmem:[#allocation55_spill] sm:$0xff] %v5400_v57  ;;  %v5405_v43 = vsel %vm1223_vm1, %v1715_v51, %v7662_v35  ;;  %v1737_v2 = vrot.slane %v1729_v38, 2  ;;  %v1373_v48 = vrot.slane %v1365_v46, 2  ;;  %v7661_v4 = vrot.slane %v5408_v56, 2  ;;  %v7774_v20 = vld [vmem:[#allocation19_spill] sm:$0xff] }
 0x19e   :  { %1349 = vrot.lane.b32.xlu1 %v7769_v47, %s4150_s3  ;;  %1347 = vrot.lane.b32.xlu0 %v1342_v19, %s4150_s3  ;;  %7772 = vst [vmem:[#allocation56_spill] sm:$0xff] %v5405_v43  ;;  %7773 = vst [vmem:[#allocation57_spill] sm:$0xff] %v5408_v56  ;;  %v1738_v19 = vrot.slane %v1730_v18, 2  ;;  %v1740_v47 = vrot.slane %v1731_v16, 2  ;;  %v7775_v7 = vrot.slane %v7774_v20, 2  ;;  %v7781_v18 = vrot.slane %v7780_v17, 2 }
 0x19f   :  { %v1417_v38 = vstv %s3933_s2  ;;  %v7783_v20 = vld [vmem:[#allocation22_spill] sm:$0xff]  ;;  %s3964_s2 = sld [smem:[#allocation8 + $0x3d]] }
 0x1a0   :  { %v5417_v51 = vsel %vm1223_vm1, %v1738_v19, %v1740_v47  ;;  %v5420_v62 = vsel %vm1223_vm1, %v1737_v2, %v1738_v19  ;;  %v5425_v46 = vsel %vm1223_vm1, %v1740_v47, %v7661_v4  ;;  %v1375_v16 = vsel %vm1223_vm1, %v1373_v48, %v7781_v18  ;;  %v7785_v19 = vld [vmem:[#allocation25_spill] sm:$0xff] }
 0x1a1   :  { %7777 = vst [vmem:[#allocation19_spill] sm:$0xff] %v5417_v51  ;;  %7778 = vst [vmem:[#allocation23_spill] sm:$0xff] %v5420_v62  ;;  %v7784_v2 = vrot.slane %v7783_v20, 2  ;;  %v1419_v47 = vmul.f32 %v1417_v38, %v4972_v29  ;;  %v1421_v48 = vmul.f32 %v1417_v38, %v4976_v12  ;;  %v1420_v17 = vmul.f32 %v1417_v38, %v4979_v55 }
 0x1a2   :  { %1353 = vrot.lane.b32.xlu1 %v7775_v7, %s4150_s3  ;;  %1351 = vrot.lane.b32.xlu0 %v7776_v54, %s4150_s3  ;;  %7779 = vst [vmem:[#allocation58_spill] sm:$0xff] %v5425_v46  ;;  %v7782_v7 = vld [vmem:[#allocation24_spill] sm:$0xff]  ;;  %v1418_v54 = vmul.f32 %v1417_v38, %v4974_v45  ;;  %v1443_v18 = vstv %s3934_s26  ;;  %v5478_v46 = vstv %s901_s30  ;;  %s3965_s26 = sld [smem:[#allocation8 + $0x1a]]  ;;  %s6848_s30 = sld [smem:[#allocation11 + $0x18]] }
 0x1a3   :  { %v1447_v20 = vmul.f32 %v1443_v18, %v4976_v12  ;;  %v5487_v51 = vstv %s3914_s9  ;;  %s6246_s9 = sld [smem:[#allocation8 + $0x18]] }
 0x1a6   :  { %1382 = vrot.lane.b32.xlu1 %v7782_v7, %s4150_s3  ;;  %1380 = vrot.lane.b32.xlu0 %v1375_v16, %s4150_s3  ;;  %v1445_v16 = vmul.f32 %v1443_v18, %v4972_v29  ;;  %v1444_v7 = vmul.f32 %v1443_v18, %v4974_v45 }
 0x1aa   :  { %1386 = vrot.lane.b32.xlu1 %v7784_v2, %s4150_s3  ;;  %1384 = vrot.lane.b32.xlu0 %v7785_v19, %s4150_s3  ;;  %v1446_v2 = vmul.f32 %v1443_v18, %v4979_v55  ;;  %v1469_v19 = vstv %s3935_s27  ;;  %s5872_s27 = sld [smem:[#allocation8 + $0x3e]] }
 0x1ab   :  { %v1471_v38 = vmul.f32 %v1469_v19, %v4972_v29  ;;  %v1472_v18 = vmul.f32 %v1469_v19, %v4979_v55 }
 0x1ae   :  { %1428 = vrot.lane.b32.xlu1 %v1419_v47, %s4149_s21  ;;  %1426 = vrot.lane.b32.xlu0 %v1418_v54, %s4149_s21  ;;  %v1470_v47 = vmul.f32 %v1469_v19, %v4974_v45 }
 0x1b2   :  { %1432 = vrot.lane.b32.xlu1 %v1421_v48, %s4149_s21  ;;  %1430 = vrot.lane.b32.xlu0 %v1420_v17, %s4149_s21  ;;  %v1473_v17 = vmul.f32 %v1469_v19, %v4976_v12 }
 0x1b6   :  { %1454 = vrot.lane.b32.xlu1 %v1445_v16, %s4149_s21  ;;  %1452 = vrot.lane.b32.xlu0 %v1444_v7, %s4149_s21  ;;  %v1495_v16 = vstv %s3936_s28  ;;  %s3969_s28 = sld [smem:[#allocation8 + $0x1c]] }
 0x1ba   :  { %1458 = vrot.lane.b32.xlu1 %v1447_v20, %s4149_s21  ;;  %1456 = vrot.lane.b32.xlu0 %v1446_v2, %s4149_s21  ;;  %v1497_v2 = vmul.f32 %v1495_v16, %v4972_v29 }
 0x1be   :  { %1480 = vrot.lane.b32.xlu1 %v1471_v38, %s4150_s3  ;;  %1478 = vrot.lane.b32.xlu0 %v1470_v47, %s4150_s3  ;;  %v1496_v38 = vmul.f32 %v1495_v16, %v4974_v45  ;;  %v5468_v47 = vstv %s907_s29  ;;  %s6846_s29 = sld [smem:[#allocation11 + $0x1f]] }
 0x1bf   :  { %v910_v35 = vmul.f32 %v5468_v47, %v4652_v27  ;;  %v911_v62 = vmul.f32 %v5468_v47, %v4664_v39 }
 0x1c0   :  { %v940_v54 = vpop.permute.xlu1 %939  ;;  %v5458_v48 = vpop.permute.xlu0 %937 }
 0x1c1   :  { %v914_v56 = vadd.f32 %v910_v35, %v5478_v46  ;;  %v920_v35 = vmul.f32 %v5487_v51, %v4652_v27  ;;  %v921_v27 = vmul.f32 %v5487_v51, %v4664_v39 }
 0x1c2   :  { %1484 = vrot.lane.b32.xlu1 %v1473_v17, %s4150_s3  ;;  %1482 = vrot.lane.b32.xlu0 %v1472_v18, %s4150_s3  ;;  %v1499_v17 = vmul.f32 %v1495_v16, %v4976_v12  ;;  %v1498_v18 = vmul.f32 %v1495_v16, %v4979_v55  ;;  %v7786_v16 = vld [vmem:[#allocation30_spill] sm:$0xff] }
 0x1c3   :  { %v950_v43 = vadd.f32 %v940_v54, %v914_v56 }
 0x1c4   :  { %v5464_v7 = vpop.permute.xlu1 %943  ;;  %v942_v20 = vpop.permute.xlu0 %941 }
 0x1c6   :  { %1506 = vrot.lane.b32.xlu1 %v1497_v2, %s4150_s3  ;;  %1504 = vrot.lane.b32.xlu0 %v1496_v38, %s4150_s3 }
 0x1c8   :  { %v966_v19 = vpop.permute.xlu1 %965  ;;  %v5472_v4 = vpop.permute.xlu0 %963 }
 0x1ca   :  { %1510 = vrot.lane.b32.xlu1 %v1499_v17, %s4150_s3  ;;  %1508 = vrot.lane.b32.xlu0 %v1498_v18, %s4150_s3  ;;  %v915_v18 = vadd.f32 %v911_v62, %v5478_v46  ;;  %v924_v62 = vadd.f32 %v920_v35, %v5498_v26  ;;  %v7791_v35 = vrot.slane %v5032_v61, 1 }
 0x1cc   :  { %v5482_v2 = vpop.permute.xlu1 %969  ;;  %v968_v38 = vpop.permute.xlu0 %967  ;;  %v976_v63 = vadd.f32 %v966_v19, %v924_v62 }
 0x1ce   :  { %1589 = vrot.lane.b32.xlu1 %v5035_v14, %s4149_s21  ;;  %1587 = vrot.lane.b32.xlu0 %v7786_v16, %s4149_s21  ;;  %v7789_v14 = vld [vmem:[#allocation31_spill] sm:$0xff]  ;;  %v951_v16 = vadd.f32 %v942_v20, %v915_v18 }
 0x1d0   :  { %v992_v17 = vpop.permute.xlu1 %991  ;;  %v5493_v33 = vpop.permute.xlu0 %989 }
 0x1d1   :  { %v1002_v57 = vadd.f32 %v992_v17, %v950_v43  ;;  %v7790_v17 = vld [vmem:[#allocation32_spill] sm:$0xff] }
 0x1d2   :  { %1593 = vrot.lane.b32.xlu1 %v7788_v11, %s4149_s21  ;;  %1591 = vrot.lane.b32.xlu0 %v7789_v14, %s4149_s21 }
 0x1d3   :  { %v1053_v56 = vadd.f32 %v5095_v6, %v1002_v57  ;;  %v925_v57 = vadd.f32 %v921_v27, %v5498_v26 }
 0x1d4   :  { %v5506_v54 = vpop.permute.xlu1 %995  ;;  %v994_v9 = vpop.permute.xlu0 %993 }
 0x1d5   :  { %v1003_v43 = vadd.f32 %v994_v9, %v951_v16  ;;  %v977_v39 = vadd.f32 %v968_v38, %v925_v57 }
 0x1d6   :  { %1622 = vrot.lane.b32.xlu1 %v7790_v17, %s4149_s21  ;;  %1620 = vrot.lane.b32.xlu0 %v5064_v13, %s4149_s21 }
 0x1d7   :  { %v1054_v11 = vadd.f32 %v5120_v40, %v1003_v43 }
 0x1d8   :  { %v1018_v20 = vpop.permute.xlu1 %1017  ;;  %v5516_v6 = vpop.permute.xlu0 %1015 }
 0x1d9   :  { %v1028_v18 = vadd.f32 %v1018_v20, %v976_v63 }
 0x1da   :  { %1626 = vrot.lane.b32.xlu1 %v7791_v35, %s4149_s21  ;;  %1624 = vrot.lane.b32.xlu0 %v5069_v41, %s4149_s21  ;;  %v7792_v41 = vrot.slane %v5073_v25, 1  ;;  %v7797_v35 = vrot.slane %v5188_v32, 2 }
 0x1db   :  { %v1078_v9 = vadd.f32 %v5150_v5, %v1028_v18 }
 0x1dc   :  { %v5525_v13 = vpop.permute.xlu1 %1021  ;;  %v1020_v19 = vpop.permute.xlu0 %1019 }
 0x1dd   :  { %v1029_v40 = vadd.f32 %v1020_v19, %v977_v39 }
 0x1de   :  { %1655 = vrot.lane.b32.xlu1 %v5076_v44, %s4150_s3  ;;  %1653 = vrot.lane.b32.xlu0 %v5090_v10, %s4150_s3 }
 0x1df   :  { %v1079_v14 = vadd.f32 %v5177_v37, %v1029_v40  ;;  %v7793_v37 = vrot.slane %v5124_v31, 1  ;;  %v7794_v31 = vrot.slane %v5167_v49, 2 }
 0x1e0   :  { %v1101_v61 = vpop.permute.xlu1 %1100  ;;  %v5532_v16 = vpop.permute.xlu0 %1098 }
 0x1e2   :  { %1659 = vrot.lane.b32.xlu1 %v7792_v41, %s4150_s3  ;;  %1657 = vrot.lane.b32.xlu0 %v5106_v22, %s4150_s3  ;;  %v912_v41 = vmul.f32 %v5468_v47, %v4662_v30 }
 0x1e4   :  { %v5539_v5 = vpop.permute.xlu1 %1104  ;;  %v1103_v38 = vpop.permute.xlu0 %1102 }
 0x1e5   :  { %v1112_v43 = vadd.f32 %v1103_v38, %v1054_v11 }
 0x1e6   :  { %1688 = vrot.lane.b32.xlu1 %v5130_v23, %s4150_s3  ;;  %1686 = vrot.lane.b32.xlu0 %v5142_v42, %s4150_s3  ;;  %v1111_v23 = vadd.f32 %v1101_v61, %v1053_v56  ;;  %v7796_v56 = vld [vmem:[#allocation39_spill] sm:$0xff] }
 0x1e8   :  { %v1134_v44 = vpop.permute.xlu1 %1133  ;;  %v5545_v10 = vpop.permute.xlu0 %1131 }
 0x1e9   :  { %v1144_v20 = vadd.f32 %v1134_v44, %v1078_v9 }
 0x1ea   :  { %1692 = vrot.lane.b32.xlu1 %v7793_v37, %s4150_s3  ;;  %1690 = vrot.lane.b32.xlu0 %v5163_v36, %s4150_s3  ;;  %v7795_v36 = vld [vmem:[#allocation37_spill] sm:$0xff]  ;;  %v916_v37 = vadd.f32 %v912_v41, %v5478_v46 }
 0x1ec   :  { %v5552_v25 = vpop.permute.xlu1 %1137  ;;  %v1136_v22 = vpop.permute.xlu0 %1135 }
 0x1ed   :  { %v1145_v39 = vadd.f32 %v1136_v22, %v1079_v14 }
 0x1ee   :  { %1771 = vrot.lane.b32.xlu1 %v5191_v34, %s4149_s21  ;;  %1769 = vrot.lane.b32.xlu0 %v5194_v15, %s4149_s21 }
 0x1f0   :  { %v1167_v42 = vpop.permute.xlu1 %1166  ;;  %v5558_v62 = vpop.permute.xlu0 %1164 }
 0x1f1   :  { %v1177_v27 = vadd.f32 %v1167_v42, %v1111_v23  ;;  %v7802_v42 = vld [vmem:[#allocation27_spill] sm:$0xff] }
 0x1f2   :  { %1775 = vrot.lane.b32.xlu1 %v7794_v31, %s4149_s21  ;;  %1773 = vrot.lane.b32.xlu0 %v7795_v36, %s4149_s21 }
 0x1f3   :  { %v5566_v17 = vadd.f32 %v5260_v52, %v1177_v27  ;;  %v909_v52 = vmul.f32 %v5468_v47, %v4654_v53  ;;  %v919_v47 = vmul.f32 %v5487_v51, %v4654_v53  ;;  %v1058_v27 = vmul.f32 %v7802_v42, %v4654_v53 }
 0x1f4   :  { %v5568_v34 = vpop.permute.xlu1 %1170  ;;  %v1169_v63 = vpop.permute.xlu0 %1168 }
 0x1f5   :  { %v1178_v15 = vadd.f32 %v1169_v63, %v1112_v43  ;;  %v913_v61 = vadd.f32 %v909_v52, %v5478_v46  ;;  %v5640_v43 = vld [vmem:[%s7592_s1 + $0x8] sm:$0xff]  ;;  %v1905_v63 = vstv %s3951_s11  ;;  %s3970_s11 = sld [smem:[#allocation8 + $0x40]] }
 0x1f6   :  { %1804 = vrot.lane.b32.xlu1 %v7796_v56, %s4149_s21  ;;  %1802 = vrot.lane.b32.xlu0 %v5219_v0, %s4149_s21 }
 0x1f7   :  { %v5575_v49 = vadd.f32 %v5281_v21, %v1178_v15  ;;  %v7798_v21 = vld [vmem:[#allocation26_spill] sm:$0xff]  ;;  %v1066_v15 = vrot.slane %v1058_v27, 1 }
 0x1f8   :  { %v1200_v57 = vpop.permute.xlu1 %1199  ;;  %v5577_v18 = vpop.permute.xlu0 %1197  ;;  %v1033_v9 = vmul.f32 %v7798_v21, %v4654_v53  ;;  %v7806_v21 = vld [vmem:[#allocation42_spill] sm:$0xff] }
 0x1f9   :  { %v1210_v11 = vadd.f32 %v1200_v57, %v1144_v20  ;;  %v7804_v57 = vld [vmem:[#allocation34_spill] sm:$0xff] }
 0x1fa   :  { %1808 = vrot.lane.b32.xlu1 %v7797_v35, %s4149_s21  ;;  %1806 = vrot.lane.b32.xlu0 %v5224_v60, %s4149_s21  ;;  %v949_v60 = vadd.f32 %v5458_v48, %v913_v61  ;;  %v1041_v14 = vrot.slane %v1033_v9, 1  ;;  %v7800_v48 = vld [vmem:[#allocation33_spill] sm:$0xff]  ;;  %v7805_v52 = vrot.slane %v7804_v57, 1  ;;  %v7807_v9 = vrot.slane %v7806_v21, 2 }
 0x1fb   :  { %v5587_v0 = vadd.f32 %v5307_v28, %v1210_v11  ;;  %v7801_v23 = vrot.slane %v7800_v48, 1 }
 0x1fc   :  { %v5591_v19 = vpop.permute.xlu1 %1203  ;;  %v1202_v40 = vpop.permute.xlu0 %1201  ;;  %v1001_v22 = vadd.f32 %v5493_v33, %v949_v60  ;;  %v1215_v33 = vmul.f32 %v4988_v50, %v4654_v53 }
 0x1fd   :  { %v1211_v32 = vadd.f32 %v1202_v40, %v1145_v39  ;;  %v1043_v46 = vsel %vm221_vm0, %v1041_v14, %v7801_v23  ;;  %v1907_v40 = vmul.f32 %v1905_v63, %v5640_v43 }
 0x1fe   :  { %1837 = vrot.lane.b32.xlu1 %v5246_v8, %s4150_s3  ;;  %1835 = vrot.lane.b32.xlu0 %v5249_v24, %s4150_s3  ;;  %v7799_v8 = vrot.slane %v5232_v59, 2  ;;  %v952_v24 = vadd.f32 %v5464_v7, %v916_v37  ;;  %v1052_v36 = vadd.f32 %v1043_v46, %v1001_v22  ;;  %v1224_v56 = vrot.slane %v1215_v33, 2  ;;  %v7811_v37 = vld [vmem:[#allocation38_spill] sm:$0xff]  ;;  %v7813_v22 = vld [vmem:[#allocation28_spill] sm:$0xff] }
 0x1ff   :  { %v5602_v28 = vadd.f32 %v5326_v3, %v1211_v32  ;;  %v922_v3 = vmul.f32 %v5487_v51, %v4662_v30  ;;  %v7803_v30 = vld [vmem:[#allocation44_spill] sm:$0xff]  ;;  %v7809_v32 = vld [vmem:[#allocation35_spill] sm:$0xff]  ;;  %v1397_v46 = vstv %s5629_s12  ;;  %s6253_s12 = sld [smem:[#allocation8 + $0x3c]] }
 0x200   :  { %v1284_v38 = vpop.permute.xlu1 %1283  ;;  %v1282_v44 = vpop.permute.xlu0 %1281  ;;  %v1004_v7 = vadd.f32 %v5506_v54, %v952_v24  ;;  %v1110_v50 = vadd.f32 %v5532_v16, %v1052_v36  ;;  %v5645_v54 = vld [vmem:[%s7592_s1] sm:$0xff]  ;;  %v7810_v60 = vrot.slane %v7809_v32, 1  ;;  %v7814_v36 = vld [vmem:[#allocation36_spill] sm:$0xff]  ;;  %v1407_v32 = vstv %s5690_s18  ;;  %s3981_s18 = sld [smem:[#allocation8 + $0x22]] }
 0x201   :  { %v1906_v61 = vmul.f32 %v1905_v63, %v5645_v54  ;;  %v1294_v33 = vadd.f32 %v1284_v38, %v5566_v17 }
 0x202   :  { %1841 = vrot.lane.b32.xlu1 %v7799_v8, %s4150_s3  ;;  %1839 = vrot.lane.b32.xlu0 %v5276_v1, %s4150_s3  ;;  %v923_v1 = vadd.f32 %v919_v47, %v5498_v26  ;;  %v1055_v11 = vadd.f32 %v7805_v52, %v1004_v7  ;;  %v1176_v35 = vadd.f32 %v5558_v62, %v1110_v50  ;;  %v5670_v62 = vld [vmem:[%s7592_s1 + $0x18] sm:$0x7f]  ;;  %v7812_v47 = vrot.slane %v7811_v37, 2 }
 0x203   :  { %v1068_v14 = vsel %vm221_vm0, %v1066_v15, %v7810_v60  ;;  %v1241_v8 = vmul.f32 %v7813_v22, %v4654_v53  ;;  %v1909_v42 = vmul.f32 %v1905_v63, %v5670_v62  ;;  %v1931_v7 = vstv %s5647_s4  ;;  %s3972_s4 = sld [smem:[#allocation8 + $0x41]] }
 0x204   :  { %v5623_v59 = vpop.permute.xlu1 %1287  ;;  %v5625_v31 = vpop.permute.xlu0 %1285  ;;  %v975_v51 = vadd.f32 %v5472_v4, %v923_v1  ;;  %v1399_v15 = vmul.f32 %v1397_v46, %v4972_v29 }
 0x206   :  { %1870 = vrot.lane.b32.xlu1 %v5289_v58, %s4150_s3  ;;  %1868 = vrot.lane.b32.xlu0 %v7803_v30, %s4150_s3  ;;  %v926_v58 = vadd.f32 %v922_v3, %v5498_v26  ;;  %v1027_v20 = vadd.f32 %v5516_v6, %v975_v51  ;;  %v7808_v26 = vld [vmem:[#allocation45_spill] sm:$0xff]  ;;  %v1113_v6 = vadd.f32 %v5539_v5, %v1055_v11  ;;  %v1249_v51 = vrot.slane %v1241_v8, 2 }
 0x207   :  { %v1226_v5 = vsel %vm1223_vm1, %v1224_v56, %v7812_v47  ;;  %v1398_v56 = vmul.f32 %v1397_v46, %v4974_v45  ;;  %v1932_v11 = vmul.f32 %v1931_v7, %v5645_v54  ;;  %v1957_v47 = vstv %s5698_s7  ;;  %s3982_s7 = sld [smem:[#allocation8 + $0x46]] }
 0x208   :  { %v5650_v4 = vpop.permute.xlu1 %1316  ;;  %v5652_v16 = vpop.permute.xlu0 %1314  ;;  %v978_v39 = vadd.f32 %v5482_v2, %v926_v58  ;;  %v5675_v2 = vld [vmem:[%s7592_s1 + $0x10] sm:$0xff]  ;;  %v1077_v48 = vadd.f32 %v1068_v14, %v1027_v20  ;;  %v1235_v23 = vadd.f32 %v1226_v5, %v1176_v35  ;;  %v7816_v20 = vld [vmem:[#allocation40_spill] sm:$0xff]  ;;  %v1935_v14 = vmul.f32 %v1931_v7, %v5670_v62 }
 0x209   :  { %v1908_v53 = vmul.f32 %v1905_v63, %v5675_v2  ;;  %v7817_v57 = vrot.slane %v7816_v20, 2  ;;  %v1934_v37 = vmul.f32 %v1931_v7, %v5675_v2  ;;  %v1327_v5 = vadd.f32 %v5650_v4, %v5587_v0 }
 0x20a   :  { %1874 = vrot.lane.b32.xlu1 %v7807_v9, %s4150_s3  ;;  %1872 = vrot.lane.b32.xlu0 %v7808_v26, %s4150_s3  ;;  %v1030_v41 = vadd.f32 %v5525_v13, %v978_v39  ;;  %v1179_v13 = vadd.f32 %v5568_v34, %v1113_v6  ;;  %v1143_v27 = vadd.f32 %v5545_v10, %v1077_v48  ;;  %v7815_v34 = vrot.slane %v7814_v36, 1  ;;  %v7818_v9 = vld [vmem:[#allocation41_spill] sm:$0xff] }
 0x20b   :  { %v1293_v1 = vadd.f32 %v1282_v44, %v1235_v23  ;;  %v1933_v44 = vmul.f32 %v1931_v7, %v5640_v43  ;;  %v1401_v6 = vmul.f32 %v1397_v46, %v4976_v12  ;;  %v1409_v23 = vmul.f32 %v1407_v32, %v4972_v29 }
 0x20c   :  { %v5686_v24 = vpop.permute.xlu1 %1320  ;;  %v5688_v3 = vpop.permute.xlu0 %1318  ;;  %v1080_v30 = vadd.f32 %v7815_v34, %v1030_v41  ;;  %v1209_v63 = vadd.f32 %v5577_v18, %v1143_v27  ;;  %v1238_v52 = vadd.f32 %v7817_v57, %v1179_v13  ;;  %v1295_v18 = vadd.f32 %v5625_v31, %v5575_v49 }
 0x20d   :  { %v1400_v41 = vmul.f32 %v1397_v46, %v4979_v55  ;;  %v7820_v46 = vld [vmem:[#allocation43_spill] sm:$0xff]  ;;  %v1959_v0 = vmul.f32 %v1957_v47, %v5640_v43  ;;  %v1958_v4 = vmul.f32 %v1957_v47, %v5645_v54  ;;  %v1328_v29 = vadd.f32 %v5688_v3, %v5602_v28 }
 0x20e   :  { %1916 = vrot.lane.b32.xlu1 %v1907_v40, %s4149_s21  ;;  %1914 = vrot.lane.b32.xlu0 %v1906_v61, %s4149_s21  ;;  %v1146_v38 = vadd.f32 %v5552_v25, %v1080_v30  ;;  %v1296_v35 = vadd.f32 %v5623_v59, %v1238_v52  ;;  %v7819_v25 = vrot.slane %v7818_v9, 2  ;;  %v1960_v28 = vmul.f32 %v1957_v47, %v5675_v2 }
 0x20f   :  { %v1983_v3 = vstv %s3954_s19  ;;  %v2059_v57 = vstv %s3957_s20  ;;  %s3983_s19 = sld [smem:[#allocation8 + $0x23]]  ;;  %s3984_s20 = sld [smem:[#allocation8 + $0x47]] }
 0x210   :  { %v1350_v50 = vpop.permute.xlu1 %1349  ;;  %v1348_v58 = vpop.permute.xlu0 %1347  ;;  %v1251_v26 = vsel %vm1223_vm1, %v1249_v51, %v7819_v25  ;;  %v1212_v59 = vadd.f32 %v5591_v19, %v1146_v38  ;;  %v2061_v52 = vmul.f32 %v2059_v57, %v5640_v43 }
 0x211   :  { %v1360_v10 = vadd.f32 %v1350_v50, %v1294_v33  ;;  %v1359_v17 = vadd.f32 %v1348_v58, %v1293_v1  ;;  %v1260_v60 = vadd.f32 %v1251_v26, %v1209_v63  ;;  %v1408_v1 = vmul.f32 %v1407_v32, %v4974_v45 }
 0x212   :  { %1920 = vrot.lane.b32.xlu1 %v1909_v42, %s4149_s21  ;;  %1918 = vrot.lane.b32.xlu0 %v1908_v53, %s4149_s21  ;;  %v7821_v42 = vrot.slane %v7820_v46, 2  ;;  %v1411_v50 = vmul.f32 %v1407_v32, %v4976_v12  ;;  %v1410_v58 = vmul.f32 %v1407_v32, %v4979_v55  ;;  %v1985_v12 = vmul.f32 %v1983_v3, %v5640_v43 }
 0x213   :  { %v5718_v39 = vadd.f32 %v1399_v15, %v1360_v10  ;;  %v5720_v21 = vadd.f32 %v1398_v56, %v1359_v17  ;;  %v1326_v22 = vadd.f32 %v5652_v16, %v1260_v60  ;;  %v1984_v55 = vmul.f32 %v1983_v3, %v5645_v54 }
 0x214   :  { %v1354_v40 = vpop.permute.xlu1 %1353  ;;  %v1352_v61 = vpop.permute.xlu0 %1351  ;;  %v1263_v53 = vadd.f32 %v7821_v42, %v1212_v59  ;;  %v2062_v10 = vmul.f32 %v2059_v57, %v5675_v2  ;;  %v2060_v17 = vmul.f32 %v2059_v57, %v5645_v54  ;;  %v2069_v9 = vrot.slane %v2061_v52, 1 }
 0x215   :  { %v1362_v49 = vadd.f32 %v1354_v40, %v1296_v35  ;;  %v1361_v31 = vadd.f32 %v1352_v61, %v1295_v18  ;;  %v1986_v35 = vmul.f32 %v1983_v3, %v5675_v2  ;;  %v2063_v18 = vmul.f32 %v2059_v57, %v5670_v62 }
 0x216   :  { %1942 = vrot.lane.b32.xlu1 %v1933_v44, %s4149_s21  ;;  %1940 = vrot.lane.b32.xlu0 %v1932_v11, %s4149_s21  ;;  %v1329_v16 = vadd.f32 %v5686_v24, %v1263_v53  ;;  %v1961_v24 = vmul.f32 %v1957_v47, %v5670_v62  ;;  %v1987_v11 = vmul.f32 %v1983_v3, %v5670_v62  ;;  %v2071_v25 = vrot.slane %v2062_v10, 1 }
 0x217   :  { %v5737_v8 = vadd.f32 %v1401_v6, %v1362_v49  ;;  %v5739_v19 = vadd.f32 %v1400_v41, %v1361_v31  ;;  %v2068_v26 = vrot.slane %v2060_v17, 1  ;;  %v2092_v40 = vstv %s3958_s22  ;;  %v7824_v17 = vld [vmem:[#allocation46_spill] sm:$0xff]  ;;  %s3955_s22 = sld [smem:[#allocation8 + $0x15]] }
 0x218   :  { %v1383_v48 = vpop.permute.xlu1 %1382  ;;  %v1381_v13 = vpop.permute.xlu0 %1380  ;;  %v2094_v41 = vmul.f32 %v2092_v40, %v5640_v43  ;;  %v2095_v32 = vmul.f32 %v2092_v40, %v5675_v2  ;;  %v2093_v59 = vmul.f32 %v2092_v40, %v5645_v54  ;;  %v2072_v60 = vsel %vm221_vm0, %v2069_v9, %v2071_v25 }
 0x219   :  { %v1393_v27 = vadd.f32 %v1383_v48, %v1327_v5  ;;  %v1392_v33 = vadd.f32 %v1381_v13, %v1326_v22  ;;  %v2070_v49 = vsel %vm221_vm0, %v2068_v26, %v2069_v9  ;;  %v2073_v31 = vrot.slane %v2063_v18, 1 }
 0x21a   :  { %1946 = vrot.lane.b32.xlu1 %v1935_v14, %s4149_s21  ;;  %1944 = vrot.lane.b32.xlu0 %v1934_v37, %s4149_s21  ;;  %v2125_v47 = vstv %s3959_s23  ;;  %v2102_v5 = vrot.slane %v2094_v41, 1  ;;  %v2104_v22 = vrot.slane %v2095_v32, 1  ;;  %v2101_v48 = vrot.slane %v2093_v59, 1  ;;  %s3949_s23 = sld [smem:[#allocation8 + $0x12]] }
 0x21b   :  { %v5752_v7 = vadd.f32 %v1409_v23, %v1393_v27  ;;  %v5754_v36 = vadd.f32 %v1408_v1, %v1392_v33  ;;  %v2096_v13 = vmul.f32 %v2092_v40, %v5670_v62  ;;  %v2074_v42 = vsel %vm221_vm0, %v2071_v25, %v2073_v31 }
 0x21c   :  { %v1387_v34 = vpop.permute.xlu1 %1386  ;;  %v1385_v30 = vpop.permute.xlu0 %1384  ;;  %v2127_v33 = vmul.f32 %v2125_v47, %v5640_v43 }
 0x21d   :  { %v1395_v45 = vadd.f32 %v1387_v34, %v1329_v16  ;;  %v1394_v51 = vadd.f32 %v1385_v30, %v1328_v29  ;;  %v2126_v16 = vmul.f32 %v2125_v47, %v5645_v54  ;;  %v2106_v29 = vrot.slane %v2096_v13, 1 }
 0x21e   :  { %1968 = vrot.lane.b32.xlu1 %v1959_v0, %s4150_s3  ;;  %1966 = vrot.lane.b32.xlu0 %v1958_v4, %s4150_s3  ;;  %v2128_v4 = vmul.f32 %v2125_v47, %v5675_v2  ;;  %v2135_v3 = vrot.slane %v2127_v33, 1 }
 0x21f   :  { %v5762_v15 = vadd.f32 %v1411_v50, %v1395_v45  ;;  %v5764_v56 = vadd.f32 %v1410_v58, %v1394_v51  ;;  %v7822_v45 = vld [vmem:[#allocation48_spill] sm:$0xff]  ;;  %v7823_v50 = vld [vmem:[#allocation49_spill] sm:$0xff] }
 0x220   :  { %v1429_v63 = vpop.permute.xlu1 %1428  ;;  %v1427_v20 = vpop.permute.xlu0 %1426  ;;  %v2137_v57 = vrot.slane %v2128_v4, 1  ;;  %v2241_v4 = vstv %s5822_s25  ;;  %s3950_s25 = sld [smem:[#allocation8 + $0x36]] }
 0x221   :  { %v1439_v23 = vadd.f32 %v1429_v63, %v5718_v39  ;;  %v1438_v46 = vadd.f32 %v1427_v20, %v5720_v21  ;;  %v2105_v39 = vsel %vm221_vm0, %v2102_v5, %v2104_v22  ;;  %v2103_v21 = vsel %vm221_vm0, %v2101_v48, %v2102_v5 }
 0x222   :  { %1972 = vrot.lane.b32.xlu1 %v1961_v24, %s4150_s3  ;;  %1970 = vrot.lane.b32.xlu0 %v1960_v28, %s4150_s3  ;;  %v2138_v40 = vsel %vm221_vm0, %v2135_v3, %v2137_v57 }
 0x224   :  { %v1433_v38 = vpop.permute.xlu1 %1432  ;;  %v1431_v44 = vpop.permute.xlu0 %1430 }
 0x225   :  { %v1441_v34 = vadd.f32 %v1433_v38, %v5737_v8  ;;  %v1440_v30 = vadd.f32 %v1431_v44, %v5739_v19  ;;  %v2107_v8 = vsel %vm221_vm0, %v2104_v22, %v2106_v29  ;;  %v2129_v19 = vmul.f32 %v2125_v47, %v5670_v62 }
 0x226   :  { %1994 = vrot.lane.b32.xlu1 %v1985_v12, %s4150_s3  ;;  %1992 = vrot.lane.b32.xlu0 %v1984_v55, %s4150_s3  ;;  %v2134_v12 = vrot.slane %v2126_v16, 1  ;;  %v2158_v55 = vstv %s5788_s24  ;;  %v7825_v38 = vrot.slane %v7824_v17, 1  ;;  %s3956_s24 = sld [smem:[#allocation8 + $0x39]] }
 0x228   :  { %v1455_v61 = vpop.permute.xlu1 %1454  ;;  %v1453_v6 = vpop.permute.xlu0 %1452  ;;  %v2136_v41 = vsel %vm221_vm0, %v2134_v12, %v2135_v3 }
 0x229   :  { %v1465_v52 = vadd.f32 %v1455_v61, %v5752_v7  ;;  %v1464_v10 = vadd.f32 %v1453_v6, %v5754_v36  ;;  %v2139_v7 = vrot.slane %v2129_v19, 1  ;;  %v2160_v36 = vmul.f32 %v2158_v55, %v5640_v43 }
 0x22a   :  { %1998 = vrot.lane.b32.xlu1 %v1987_v11, %s4150_s3  ;;  %1996 = vrot.lane.b32.xlu0 %v1986_v35, %s4150_s3  ;;  %v7826_v11 = vld [vmem:[#allocation50_spill] sm:$0xff]  ;;  %v2161_v61 = vmul.f32 %v2158_v55, %v5675_v2  ;;  %v2159_v6 = vmul.f32 %v2158_v55, %v5645_v54 }
 0x22c   :  { %v1459_v14 = vpop.permute.xlu1 %1458  ;;  %v1457_v37 = vpop.permute.xlu0 %1456 }
 0x22d   :  { %v1467_v32 = vadd.f32 %v1459_v14, %v5762_v15  ;;  %v1466_v59 = vadd.f32 %v1457_v37, %v5764_v56  ;;  %v2162_v15 = vmul.f32 %v2158_v55, %v5670_v62  ;;  %v2140_v56 = vsel %vm221_vm0, %v2137_v57, %v2139_v7  ;;  %v7829_v37 = vld [vmem:[#allocation47_spill] sm:$0xff] }
 0x22e   :  { %2077 = vrot.lane.b32.xlu1 %v2072_v60, %s4149_s21  ;;  %2075 = vrot.lane.b32.xlu0 %v2070_v49, %s4149_s21  ;;  %v7827_v60 = vld [vmem:[#allocation51_spill] sm:$0xff]  ;;  %v2167_v14 = vrot.slane %v2159_v6, 1  ;;  %v2274_v57 = vstv %s3964_s2  ;;  %s6809_s2 = sld [smem:[#allocation11 + $0x3]] }
 0x22f   :  { %v2276_v19 = vmul.f32 %v2274_v57, %v5640_v43  ;;  %v2277_v55 = vmul.f32 %v2274_v57, %v5675_v2 }
 0x230   :  { %v1481_v53 = vpop.permute.xlu1 %1480  ;;  %v1479_v27 = vpop.permute.xlu0 %1478 }
 0x231   :  { %v1491_v1 = vadd.f32 %v1481_v53, %v1439_v23  ;;  %v1490_v0 = vadd.f32 %v1479_v27, %v1438_v46  ;;  %v2168_v23 = vrot.slane %v2160_v36, 1  ;;  %v2170_v46 = vrot.slane %v2161_v61, 1  ;;  %v7831_v27 = vld [vmem:[#allocation54_spill] sm:$0xff] }
 0x232   :  { %2081 = vrot.lane.b32.xlu1 %v2073_v31, %s4149_s21  ;;  %2079 = vrot.lane.b32.xlu0 %v2074_v42, %s4149_s21  ;;  %v7828_v31 = vld [vmem:[#allocation52_spill] sm:$0xff]  ;;  %v7830_v42 = vrot.slane %v7829_v37, 1 }
 0x233   :  { %v5803_v51 = vadd.f32 %v7822_v45, %v1491_v1  ;;  %v5806_v58 = vadd.f32 %v7823_v50, %v1490_v0  ;;  %v2171_v16 = vsel %vm221_vm0, %v2168_v23, %v2170_v46 }
 0x234   :  { %v1485_v24 = vpop.permute.xlu1 %1484  ;;  %v1483_v28 = vpop.permute.xlu0 %1482 }
 0x235   :  { %v1493_v63 = vadd.f32 %v1485_v24, %v1441_v34  ;;  %v1492_v20 = vadd.f32 %v1483_v28, %v1440_v30  ;;  %v2244_v34 = vmul.f32 %v2241_v4, %v5675_v2  ;;  %v2242_v30 = vmul.f32 %v2241_v4, %v5645_v54 }
 0x236   :  { %2110 = vrot.lane.b32.xlu1 %v2105_v39, %s4149_s21  ;;  %2108 = vrot.lane.b32.xlu0 %v2103_v21, %s4149_s21  ;;  %v2172_v39 = vrot.slane %v2162_v15, 1  ;;  %v2169_v21 = vsel %vm221_vm0, %v2167_v14, %v2168_v23  ;;  %v2245_v28 = vmul.f32 %v2241_v4, %v5670_v62 }
 0x237   :  { %v5817_v44 = vadd.f32 %v7825_v38, %v1493_v63  ;;  %v5820_v35 = vadd.f32 %v7826_v11, %v1492_v20  ;;  %v2253_v63 = vrot.slane %v2244_v34, 2  ;;  %v2250_v20 = vrot.slane %v2242_v30, 2  ;;  %v7834_v34 = vld [vmem:[#allocation53_spill] sm:$0xff] }
 0x238   :  { %v1507_v18 = vpop.permute.xlu1 %1506  ;;  %v1505_v9 = vpop.permute.xlu0 %1504  ;;  %v2173_v24 = vsel %vm221_vm0, %v2170_v46, %v2172_v39  ;;  %v2255_v38 = vrot.slane %v2245_v28, 2  ;;  %v7832_v46 = vld [vmem:[#allocation21_spill] sm:$0xff]  ;;  %v7835_v30 = vrot.slane %v7834_v34, 2 }
 0x239   :  { %v1517_v25 = vadd.f32 %v1507_v18, %v1465_v52  ;;  %v1516_v26 = vadd.f32 %v1505_v9, %v1464_v10  ;;  %v2275_v52 = vmul.f32 %v2274_v57, %v5645_v54  ;;  %v2307_v9 = vstv %s3965_s26  ;;  %s6811_s26 = sld [smem:[#allocation11 + $0x15]] }
 0x23a   :  { %2114 = vrot.lane.b32.xlu1 %v2106_v29, %s4149_s21  ;;  %2112 = vrot.lane.b32.xlu0 %v2107_v8, %s4149_s21  ;;  %v2243_v29 = vmul.f32 %v2241_v4, %v5640_v43  ;;  %v2256_v61 = vsel %vm1223_vm1, %v2253_v63, %v2255_v38 }
 0x23b   :  { %v5834_v49 = vadd.f32 %v7827_v60, %v1517_v25  ;;  %v5837_v47 = vadd.f32 %v7828_v31, %v1516_v26  ;;  %v2284_v25 = vrot.slane %v2276_v19, 2  ;;  %v2286_v26 = vrot.slane %v2277_v55, 2 }
 0x23c   :  { %v1511_v5 = vpop.permute.xlu1 %1510  ;;  %v1509_v22 = vpop.permute.xlu0 %1508  ;;  %v2251_v3 = vrot.slane %v2243_v29, 2 }
 0x23d   :  { %v1519_v48 = vadd.f32 %v1511_v5, %v1467_v32  ;;  %v1518_v13 = vadd.f32 %v1509_v22, %v1466_v59  ;;  %v2309_v59 = vmul.f32 %v2307_v9, %v5640_v43  ;;  %v2310_v5 = vmul.f32 %v2307_v9, %v5675_v2 }
 0x23e   :  { %2143 = vrot.lane.b32.xlu1 %v2138_v40, %s4150_s3  ;;  %2141 = vrot.lane.b32.xlu0 %v2136_v41, %s4150_s3  ;;  %v2254_v10 = vsel %vm1223_vm1, %v2251_v3, %v2253_v63  ;;  %v2252_v17 = vsel %vm1223_vm1, %v2250_v20, %v2251_v3  ;;  %v2283_v40 = vrot.slane %v2275_v52, 2  ;;  %v2278_v41 = vmul.f32 %v2274_v57, %v5670_v62 }
 0x23f   :  { %v5845_v53 = vadd.f32 %v7830_v42, %v1519_v48  ;;  %v5848_v33 = vadd.f32 %v7831_v27, %v1518_v13  ;;  %v2308_v22 = vmul.f32 %v2307_v9, %v5645_v54  ;;  %v2317_v27 = vrot.slane %v2309_v59, 2 }
 0x240   :  { %v1590_v1 = vpop.permute.xlu1 %1589  ;;  %v1588_v0 = vpop.permute.xlu0 %1587  ;;  %v2288_v48 = vrot.slane %v2278_v41, 2  ;;  %v2319_v4 = vrot.slane %v2310_v5, 2 }
 0x241   :  { %v1599_v36 = vadd.f32 %v1588_v0, %v5806_v58  ;;  %v2285_v58 = vsel %vm1223_vm1, %v2283_v40, %v2284_v25 }
 0x242   :  { %2147 = vrot.lane.b32.xlu1 %v2139_v7, %s4150_s3  ;;  %2145 = vrot.lane.b32.xlu0 %v2140_v56, %s4150_s3  ;;  %v1600_v7 = vadd.f32 %v1590_v1, %v5803_v51  ;;  %v2287_v51 = vsel %vm1223_vm1, %v2284_v25, %v2286_v26  ;;  %v7833_v56 = vld [vmem:[#allocation55_spill] sm:$0xff]  ;;  %v2320_v57 = vsel %vm1223_vm1, %v2317_v27, %v2319_v4 }
 0x244   :  { %v1594_v45 = vpop.permute.xlu1 %1593  ;;  %v1592_v50 = vpop.permute.xlu0 %1591 }
 0x245   :  { %v1602_v13 = vadd.f32 %v1594_v45, %v5817_v44  ;;  %v1601_v23 = vadd.f32 %v1592_v50, %v5820_v35  ;;  %v2289_v44 = vsel %vm1223_vm1, %v2286_v26, %v2288_v48  ;;  %v2311_v35 = vmul.f32 %v2307_v9, %v5670_v62  ;;  %v7836_v50 = vld [vmem:[#allocation56_spill] sm:$0xff] }
 0x246   :  { %2176 = vrot.lane.b32.xlu1 %v2171_v16, %s4150_s3  ;;  %2174 = vrot.lane.b32.xlu0 %v2169_v21, %s4150_s3  ;;  %v2316_v16 = vrot.slane %v2308_v22, 2 }
 0x248   :  { %v1623_v12 = vpop.permute.xlu1 %1622  ;;  %v1621_v8 = vpop.permute.xlu0 %1620  ;;  %v2318_v19 = vsel %vm1223_vm1, %v2316_v16, %v2317_v27  ;;  %v2419_v16 = vstv %s3970_s11  ;;  %s6867_s11 = sld [smem:[#allocation11 + $0x10]] }
 0x249   :  { %v1633_v21 = vadd.f32 %v1623_v12, %v5834_v49  ;;  %v1632_v29 = vadd.f32 %v1621_v8, %v5837_v47  ;;  %v2321_v49 = vrot.slane %v2311_v35, 2 }
 0x24a   :  { %2180 = vrot.lane.b32.xlu1 %v2172_v39, %s4150_s3  ;;  %2178 = vrot.lane.b32.xlu0 %v2173_v24, %s4150_s3  ;;  %v2340_v39 = vstv %s5872_s27  ;;  %s6820_s27 = sld [smem:[#allocation11 + $0xd]] }
 0x24b   :  { %v2342_v47 = vmul.f32 %v2340_v39, %v5640_v43  ;;  %v2343_v12 = vmul.f32 %v2340_v39, %v5675_v2  ;;  %v2341_v8 = vmul.f32 %v2340_v39, %v5645_v54  ;;  %v2322_v43 = vsel %vm1223_vm1, %v2319_v4, %v2321_v49 }
 0x24c   :  { %v1627_v11 = vpop.permute.xlu1 %1626  ;;  %v1625_v18 = vpop.permute.xlu0 %1624  ;;  %v2344_v2 = vmul.f32 %v2340_v39, %v5670_v62 }
 0x24d   :  { %v1635_v55 = vadd.f32 %v1627_v11, %v5845_v53  ;;  %v1634_v52 = vadd.f32 %v1625_v18, %v5848_v33  ;;  %v2350_v54 = vrot.slane %v2342_v47, 2  ;;  %v2352_v53 = vrot.slane %v2343_v12, 2  ;;  %v7839_v11 = vld [vmem:[#allocation57_spill] sm:$0xff] }
 0x24e   :  { %2259 = vrot.lane.b32.xlu1 %v2254_v10, %s4149_s21  ;;  %2257 = vrot.lane.b32.xlu0 %v2252_v17, %s4149_s21  ;;  %v7837_v10 = vld [vmem:[#allocation19_spill] sm:$0xff]  ;;  %v2349_v33 = vrot.slane %v2341_v8, 2  ;;  %v7840_v18 = vrot.slane %v7839_v11, 2  ;;  %v2471_v8 = vstv %s3972_s4  ;;  %s6479_s4 = sld [smem:[#allocation8 + $0x45]] }
 0x24f   :  { %v2353_v62 = vsel %vm1223_vm1, %v2350_v54, %v2352_v53 }
 0x250   :  { %v1656_v6 = vpop.permute.xlu1 %1655  ;;  %v1654_v32 = vpop.permute.xlu0 %1653  ;;  %v2351_v59 = vsel %vm1223_vm1, %v2349_v33, %v2350_v54 }
 0x251   :  { %v1666_v60 = vadd.f32 %v1656_v6, %v1600_v7  ;;  %v1665_v31 = vadd.f32 %v1654_v32, %v1599_v36  ;;  %v7841_v36 = vld [vmem:[#allocation58_spill] sm:$0xff] }
 0x252   :  { %2263 = vrot.lane.b32.xlu1 %v2255_v38, %s4149_s21  ;;  %2261 = vrot.lane.b32.xlu0 %v2256_v61, %s4149_s21  ;;  %v7838_v38 = vld [vmem:[#allocation23_spill] sm:$0xff] }
 0x253   :  { %v5887_v15 = vadd.f32 %v7832_v46, %v1666_v60  ;;  %v5890_v14 = vadd.f32 %v7833_v56, %v1665_v31  ;;  %v2354_v60 = vrot.slane %v2344_v2, 2 }
 0x254   :  { %v1660_v37 = vpop.permute.xlu1 %1659  ;;  %v1658_v42 = vpop.permute.xlu0 %1657 }
 0x255   :  { %v1668_v1 = vadd.f32 %v1660_v37, %v1602_v13  ;;  %v1667_v0 = vadd.f32 %v1658_v42, %v1601_v23  ;;  %v2355_v22 = vsel %vm1223_vm1, %v2352_v53, %v2354_v60  ;;  %v5968_v37 = vld [vmem:[%s7592_s1 + $0x38] sm:$0x7f]  ;;  %v5973_v42 = vld [vmem:[%s7592_s1 + $0x30] sm:$0xff] }
 0x256   :  { %2292 = vrot.lane.b32.xlu1 %v2287_v51, %s4149_s21  ;;  %2290 = vrot.lane.b32.xlu0 %v2285_v58, %s4149_s21  ;;  %v5950_v51 = vld [vmem:[%s7592_s1 + $0x28] sm:$0xff]  ;;  %v2393_v58 = vstv %s3969_s28  ;;  %v2475_v2 = vmul.f32 %v5968_v37, %v2471_v8  ;;  %v2474_v53 = vmul.f32 %v5973_v42, %v2471_v8  ;;  %s6822_s28 = sld [smem:[#allocation11 + $0x6]] }
 0x257   :  { %v5901_v45 = vadd.f32 %v7835_v30, %v1668_v1  ;;  %v5904_v24 = vadd.f32 %v7836_v50, %v1667_v0  ;;  %v2395_v46 = vmul.f32 %v5950_v51, %v2393_v58  ;;  %v2397_v0 = vmul.f32 %v5968_v37, %v2393_v58 }
 0x258   :  { %v1689_v28 = vpop.permute.xlu1 %1688  ;;  %v1687_v3 = vpop.permute.xlu0 %1686  ;;  %v2396_v4 = vmul.f32 %v5973_v42, %v2393_v58  ;;  %v2421_v39 = vmul.f32 %v5950_v51, %v2419_v16  ;;  %v2423_v30 = vmul.f32 %v5968_v37, %v2419_v16  ;;  %v2422_v50 = vmul.f32 %v5973_v42, %v2419_v16 }
 0x259   :  { %v1699_v63 = vadd.f32 %v1689_v28, %v1633_v21  ;;  %v1698_v20 = vadd.f32 %v1687_v3, %v1632_v29  ;;  %v2445_v28 = vstv %s3971_s14  ;;  %s6416_s14 = sld [smem:[#allocation8 + $0x21]] }
 0x25a   :  { %2296 = vrot.lane.b32.xlu1 %v2288_v48, %s4149_s21  ;;  %2294 = vrot.lane.b32.xlu0 %v2289_v44, %s4149_s21  ;;  %v5955_v48 = vld [vmem:[%s7592_s1 + $0x20] sm:$0xff]  ;;  %v2449_v47 = vmul.f32 %v5968_v37, %v2445_v28  ;;  %v2448_v12 = vmul.f32 %v5973_v42, %v2445_v28 }
 0x25b   :  { %v5916_v17 = vadd.f32 %v7837_v10, %v1699_v63  ;;  %v5919_v9 = vadd.f32 %v7838_v38, %v1698_v20  ;;  %v2394_v56 = vmul.f32 %v5955_v48, %v2393_v58  ;;  %v2420_v21 = vmul.f32 %v5955_v48, %v2419_v16 }
 0x25c   :  { %v1693_v25 = vpop.permute.xlu1 %1692  ;;  %v1691_v26 = vpop.permute.xlu0 %1690  ;;  %v2447_v20 = vmul.f32 %v5950_v51, %v2445_v28  ;;  %v2473_v38 = vmul.f32 %v5950_v51, %v2471_v8 }
 0x25d   :  { %v1701_v40 = vadd.f32 %v1693_v25, %v1635_v55  ;;  %v1700_v41 = vadd.f32 %v1691_v26, %v1634_v52  ;;  %v2547_v55 = vstv %s3975_s6  ;;  %v2472_v25 = vmul.f32 %v5955_v48, %v2471_v8  ;;  %s6527_s6 = sld [smem:[#allocation11 + $0x1]] }
 0x25e   :  { %2325 = vrot.lane.b32.xlu1 %v2320_v57, %s4150_s3  ;;  %2323 = vrot.lane.b32.xlu0 %v2318_v19, %s4150_s3  ;;  %v2446_v57 = vmul.f32 %v5955_v48, %v2445_v28  ;;  %v2549_v26 = vmul.f32 %v5950_v51, %v2547_v55 }
 0x25f   :  { %v5927_v7 = vadd.f32 %v7840_v18, %v1701_v40  ;;  %v5930_v61 = vadd.f32 %v7841_v36, %v1700_v41  ;;  %v2550_v40 = vmul.f32 %v5973_v42, %v2547_v55  ;;  %v2548_v41 = vmul.f32 %v5955_v48, %v2547_v55 }
 0x260   :  { %v5932_v6 = vpop.permute.xlu1 %1771  ;;  %v5934_v32 = vpop.permute.xlu0 %1769  ;;  %v2557_v33 = vrot.slane %v2549_v26, 1  ;;  %v2551_v18 = vmul.f32 %v5968_v37, %v2547_v55 }
 0x261   :  { %7842 = vst [vmem:[#allocation20_spill] sm:$0xff] %v5930_v61  ;;  %v2559_v11 = vrot.slane %v2550_v40, 1  ;;  %v2556_v36 = vrot.slane %v2548_v41, 1 }
 0x262   :  { %2329 = vrot.lane.b32.xlu1 %v2321_v49, %s4150_s3  ;;  %2327 = vrot.lane.b32.xlu0 %v2322_v43, %s4150_s3  ;;  %v2561_v58 = vrot.slane %v2551_v18, 1 }
 0x264   :  { %v5940_v31 = vpop.permute.xlu1 %1775  ;;  %v5942_v5 = vpop.permute.xlu0 %1773 }
 0x266   :  { %2358 = vrot.lane.b32.xlu1 %v2353_v62, %s4150_s3  ;;  %2356 = vrot.lane.b32.xlu0 %v2351_v59, %s4150_s3 }
 0x268   :  { %v5957_v13 = vpop.permute.xlu1 %1804  ;;  %v5959_v23 = vpop.permute.xlu0 %1802 }
 0x26a   :  { %2362 = vrot.lane.b32.xlu1 %v2354_v60, %s4150_s3  ;;  %2360 = vrot.lane.b32.xlu0 %v2355_v22, %s4150_s3  ;;  %v2580_v60 = vstv %s3976_s15  ;;  %v2560_v22 = vsel %vm221_vm0, %v2557_v33, %v2559_v11  ;;  %s6574_s15 = sld [smem:[#allocation11 + $0x13]] }
 0x26c   :  { %v5975_v27 = vpop.permute.xlu1 %1808  ;;  %v5977_v1 = vpop.permute.xlu0 %1806 }
 0x26d   :  { %7843 = vst [vmem:[#allocation24_spill] sm:$0xff] %v5977_v1 }
 0x26e   :  { %2404 = vrot.lane.b32.xlu1 %v2395_v46, %s4149_s21  ;;  %2402 = vrot.lane.b32.xlu0 %v2394_v56, %s4149_s21  ;;  %v2558_v46 = vsel %vm221_vm0, %v2556_v36, %v2557_v33  ;;  %v2582_v56 = vmul.f32 %v5950_v51, %v2580_v60 }
 0x270   :  { %v5983_v44 = vpop.permute.xlu1 %1837  ;;  %v5985_v35 = vpop.permute.xlu0 %1835 }
 0x272   :  { %2408 = vrot.lane.b32.xlu1 %v2397_v0, %s4149_s21  ;;  %2406 = vrot.lane.b32.xlu0 %v2396_v4, %s4149_s21  ;;  %v2583_v0 = vmul.f32 %v5973_v42, %v2580_v60  ;;  %v2581_v4 = vmul.f32 %v5955_v48, %v2580_v60 }
 0x274   :  { %v5991_v29 = vpop.permute.xlu1 %1841  ;;  %v5993_v34 = vpop.permute.xlu0 %1839  ;;  %v2592_v28 = vrot.slane %v2583_v0, 1 }
 0x276   :  { %2430 = vrot.lane.b32.xlu1 %v2421_v39, %s4149_s21  ;;  %2428 = vrot.lane.b32.xlu0 %v2420_v21, %s4149_s21  ;;  %v2562_v21 = vsel %vm221_vm0, %v2559_v11, %v2561_v58 }
 0x278   :  { %v5999_v3 = vpop.permute.xlu1 %1870  ;;  %v6001_v63 = vpop.permute.xlu0 %1868 }
 0x279   :  { %7844 = vst [vmem:[#allocation22_spill] sm:$0xff] %v5999_v3  ;;  %7845 = vst [vmem:[#allocation25_spill] sm:$0xff] %v6001_v63 }
 0x27a   :  { %2434 = vrot.lane.b32.xlu1 %v2423_v30, %s4149_s21  ;;  %2432 = vrot.lane.b32.xlu0 %v2422_v50, %s4149_s21  ;;  %v2584_v30 = vmul.f32 %v5968_v37, %v2580_v60  ;;  %v2590_v50 = vrot.slane %v2582_v56, 1 }
 0x27c   :  { %v6007_v19 = vpop.permute.xlu1 %1874  ;;  %v6009_v49 = vpop.permute.xlu0 %1872  ;;  %v2594_v26 = vrot.slane %v2584_v30, 1 }
 0x27d   :  { %7846 = vst [vmem:[#allocation30_spill] sm:$0xff] %v6007_v19  ;;  %7847 = vst [vmem:[#allocation29_spill] sm:$0xff] %v6009_v49 }
 0x27e   :  { %2456 = vrot.lane.b32.xlu1 %v2447_v20, %s4150_s3  ;;  %2454 = vrot.lane.b32.xlu0 %v2446_v57, %s4150_s3  ;;  %v2589_v20 = vrot.slane %v2581_v4, 1  ;;  %v2613_v57 = vstv %s3977_s16  ;;  %v2595_v18 = vsel %vm221_vm0, %v2592_v28, %v2594_v26  ;;  %s6582_s16 = sld [smem:[#allocation11 + $0x4]] }
 0x27f   :  { %v2615_v8 = vmul.f32 %v5950_v51, %v2613_v57  ;;  %v2616_v55 = vmul.f32 %v5973_v42, %v2613_v57  ;;  %v2614_v40 = vmul.f32 %v5955_v48, %v2613_v57  ;;  %v2617_v11 = vmul.f32 %v5968_v37, %v2613_v57 }
 0x280   :  { %v6015_v52 = vpop.permute.xlu1 %1916  ;;  %v6017_v10 = vpop.permute.xlu0 %1914 }
 0x281   :  { %v2625_v33 = vrot.slane %v2616_v55, 1  ;;  %v2622_v36 = vrot.slane %v2614_v40, 1  ;;  %v2627_v56 = vrot.slane %v2617_v11, 1 }
 0x282   :  { %2460 = vrot.lane.b32.xlu1 %v2449_v47, %s4150_s3  ;;  %2458 = vrot.lane.b32.xlu0 %v2448_v12, %s4150_s3 }
 0x284   :  { %v6026_v43 = vpop.permute.xlu1 %1920  ;;  %v6028_v54 = vpop.permute.xlu0 %1918 }
 0x286   :  { %2482 = vrot.lane.b32.xlu1 %v2473_v38, %s4150_s3  ;;  %2480 = vrot.lane.b32.xlu0 %v2472_v25, %s4150_s3  ;;  %v2593_v38 = vsel %vm221_vm0, %v2590_v50, %v2592_v28  ;;  %v2591_v25 = vsel %vm221_vm0, %v2589_v20, %v2590_v50  ;;  %v2628_v20 = vsel %vm221_vm0, %v2625_v33, %v2627_v56 }
 0x288   :  { %v6035_v62 = vpop.permute.xlu1 %1942  ;;  %v6037_v59 = vpop.permute.xlu0 %1940 }
 0x289   :  { %7848 = vst [vmem:[#allocation31_spill] sm:$0xff] %v6035_v62  ;;  %7849 = vst [vmem:[#allocation32_spill] sm:$0xff] %v6037_v59 }
 0x28a   :  { %2486 = vrot.lane.b32.xlu1 %v2475_v2, %s4150_s3  ;;  %2484 = vrot.lane.b32.xlu0 %v2474_v53, %s4150_s3  ;;  %v2623_v53 = vrot.slane %v2615_v8, 1 }
 0x28c   :  { %v6046_v16 = vpop.permute.xlu1 %1946  ;;  %v6048_v39 = vpop.permute.xlu0 %1944  ;;  %v2624_v0 = vsel %vm221_vm0, %v2622_v36, %v2623_v53 }
 0x28d   :  { %7850 = vst [vmem:[#allocation37_spill] sm:$0xff] %v6046_v16  ;;  %7851 = vst [vmem:[#allocation39_spill] sm:$0xff] %v6048_v39 }
 0x28e   :  { %2565 = vrot.lane.b32.xlu1 %v2560_v22, %s4149_s21  ;;  %2563 = vrot.lane.b32.xlu0 %v2558_v46, %s4149_s21  ;;  %v2626_v46 = vsel %vm221_vm0, %v2623_v53, %v2625_v33 }
 0x290   :  { %v6054_v47 = vpop.permute.xlu1 %1968  ;;  %v6056_v12 = vpop.permute.xlu0 %1966 }
 0x292   :  { %2569 = vrot.lane.b32.xlu1 %v2561_v58, %s4149_s21  ;;  %2567 = vrot.lane.b32.xlu0 %v2562_v21, %s4149_s21  ;;  %v2646_v58 = vstv %s3978_s17  ;;  %s6584_s17 = sld [smem:[#allocation11 + $0x16]] }
 0x293   :  { %v2648_v4 = vmul.f32 %v5950_v51, %v2646_v58  ;;  %v2649_v21 = vmul.f32 %v5973_v42, %v2646_v58  ;;  %v2647_v30 = vmul.f32 %v5955_v48, %v2646_v58  ;;  %v2650_v57 = vmul.f32 %v5968_v37, %v2646_v58 }
 0x294   :  { %v6065_v41 = vpop.permute.xlu1 %1972  ;;  %v6067_v2 = vpop.permute.xlu0 %1970 }
 0x295   :  { %v2656_v8 = vrot.slane %v2648_v4, 1  ;;  %v2658_v55 = vrot.slane %v2649_v21, 1  ;;  %v2660_v36 = vrot.slane %v2650_v57, 1 }
 0x296   :  { %2598 = vrot.lane.b32.xlu1 %v2593_v38, %s4149_s21  ;;  %2596 = vrot.lane.b32.xlu0 %v2591_v25, %s4149_s21  ;;  %v2655_v38 = vrot.slane %v2647_v30, 1  ;;  %v2729_v25 = vstv %s3981_s18  ;;  %s6591_s18 = sld [smem:[#allocation11 + $0x2]] }
 0x297   :  { %v2731_v53 = vmul.f32 %v5950_v51, %v2729_v25  ;;  %v2732_v11 = vmul.f32 %v5973_v42, %v2729_v25  ;;  %v2659_v33 = vsel %vm221_vm0, %v2656_v8, %v2658_v55  ;;  %v2730_v58 = vmul.f32 %v5955_v48, %v2729_v25 }
 0x298   :  { %v6073_v60 = vpop.permute.xlu1 %1994  ;;  %v6075_v22 = vpop.permute.xlu0 %1992  ;;  %v2733_v21 = vmul.f32 %v5968_v37, %v2729_v25  ;;  %v2661_v30 = vsel %vm221_vm0, %v2658_v55, %v2660_v36 }
 0x299   :  { %7852 = vst [vmem:[#allocation26_spill] sm:$0xff] %v6073_v60  ;;  %7853 = vst [vmem:[#allocation33_spill] sm:$0xff] %v6075_v22  ;;  %v2741_v4 = vrot.slane %v2732_v11, 2 }
 0x29a   :  { %2602 = vrot.lane.b32.xlu1 %v2594_v26, %s4149_s21  ;;  %2600 = vrot.lane.b32.xlu0 %v2595_v18, %s4149_s21  ;;  %v2657_v18 = vsel %vm221_vm0, %v2655_v38, %v2656_v8  ;;  %v2762_v38 = vstv %s3982_s7  ;;  %s6604_s7 = sld [smem:[#allocation11 + $0x5]] }
 0x29b   :  { %v2764_v25 = vmul.f32 %v5950_v51, %v2762_v38  ;;  %v2765_v55 = vmul.f32 %v5973_v42, %v2762_v38  ;;  %v2763_v11 = vmul.f32 %v5955_v48, %v2762_v38 }
 0x29c   :  { %v6084_v50 = vpop.permute.xlu1 %1998  ;;  %v6086_v28 = vpop.permute.xlu0 %1996 }
 0x29d   :  { %7854 = vst [vmem:[#allocation27_spill] sm:$0xff] %v6084_v50  ;;  %7855 = vst [vmem:[#allocation44_spill] sm:$0xff] %v6086_v28 }
 0x29e   :  { %2631 = vrot.lane.b32.xlu1 %v2626_v46, %s4150_s3  ;;  %2629 = vrot.lane.b32.xlu0 %v2624_v0, %s4150_s3 }
 0x2a0   :  { %v6092_v26 = vpop.permute.xlu1 %2077  ;;  %v6094_v40 = vpop.permute.xlu0 %2075 }
 0x2a2   :  { %2635 = vrot.lane.b32.xlu1 %v2627_v56, %s4150_s3  ;;  %2633 = vrot.lane.b32.xlu0 %v2628_v20, %s4150_s3  ;;  %v2739_v56 = vrot.slane %v2731_v53, 2  ;;  %v2738_v20 = vrot.slane %v2730_v58, 2 }
 0x2a4   :  { %v6103_v46 = vpop.permute.xlu1 %2081  ;;  %v6105_v0 = vpop.permute.xlu0 %2079  ;;  %v2740_v53 = vsel %vm1223_vm1, %v2738_v20, %v2739_v56  ;;  %v2771_v20 = vrot.slane %v2763_v11, 2 }
 0x2a6   :  { %2664 = vrot.lane.b32.xlu1 %v2659_v33, %s4150_s3  ;;  %2662 = vrot.lane.b32.xlu0 %v2657_v18, %s4150_s3  ;;  %v2742_v33 = vsel %vm1223_vm1, %v2739_v56, %v2741_v4  ;;  %v2743_v18 = vrot.slane %v2733_v21, 2  ;;  %v2766_v21 = vmul.f32 %v5968_v37, %v2762_v38  ;;  %v2774_v56 = vrot.slane %v2765_v55, 2 }
 0x2a8   :  { %v6111_v8 = vpop.permute.xlu1 %2110  ;;  %v6113_v57 = vpop.permute.xlu0 %2108 }
 0x2a9   :  { %7856 = vst [vmem:[#allocation34_spill] sm:$0xff] %v6111_v8  ;;  %7857 = vst [vmem:[#allocation42_spill] sm:$0xff] %v6113_v57  ;;  %v2795_v57 = vstv %s3983_s19  ;;  %s6618_s19 = sld [smem:[#allocation11 + $0x17]] }
 0x2aa   :  { %2668 = vrot.lane.b32.xlu1 %v2660_v36, %s4150_s3  ;;  %2666 = vrot.lane.b32.xlu0 %v2661_v30, %s4150_s3  ;;  %v2744_v36 = vsel %vm1223_vm1, %v2741_v4, %v2743_v18  ;;  %v2772_v30 = vrot.slane %v2764_v25, 2  ;;  %v2776_v25 = vrot.slane %v2766_v21, 2  ;;  %v2796_v55 = vmul.f32 %v5955_v48, %v2795_v57 }
 0x2ac   :  { %v6122_v58 = vpop.permute.xlu1 %2114  ;;  %v6124_v8 = vpop.permute.xlu0 %2112  ;;  %v2775_v4 = vsel %vm1223_vm1, %v2772_v30, %v2774_v56  ;;  %v2773_v38 = vsel %vm1223_vm1, %v2771_v20, %v2772_v30  ;;  %v2777_v22 = vsel %vm1223_vm1, %v2774_v56, %v2776_v25  ;;  %v2804_v60 = vrot.slane %v2796_v55, 2 }
 0x2ad   :  { %7858 = vst [vmem:[#allocation45_spill] sm:$0xff] %v6122_v58  ;;  %7859 = vst [vmem:[#allocation35_spill] sm:$0xff] %v6124_v8  ;;  %v2799_v58 = vmul.f32 %v5968_v37, %v2795_v57  ;;  %v2828_v30 = vstv %s3984_s20  ;;  %s6620_s20 = sld [smem:[#allocation11 + $0x7]] }
 0x2ae   :  { %2747 = vrot.lane.b32.xlu1 %v2742_v33, %s4149_s21  ;;  %2745 = vrot.lane.b32.xlu0 %v2740_v53, %s4149_s21  ;;  %v2797_v33 = vmul.f32 %v5950_v51, %v2795_v57  ;;  %v2798_v53 = vmul.f32 %v5973_v42, %v2795_v57  ;;  %v2831_v57 = vmul.f32 %v5973_v42, %v2828_v30 }
 0x2af   :  { %v2829_v56 = vmul.f32 %v5955_v48, %v2828_v30 }
 0x2b0   :  { %v6130_v28 = vpop.permute.xlu1 %2143  ;;  %v6132_v50 = vpop.permute.xlu0 %2141 }
 0x2b2   :  { %2751 = vrot.lane.b32.xlu1 %v2743_v18, %s4149_s21  ;;  %2749 = vrot.lane.b32.xlu0 %v2744_v36, %s4149_s21  ;;  %v2805_v18 = vrot.slane %v2797_v33, 2  ;;  %v2807_v36 = vrot.slane %v2798_v53, 2  ;;  %v2830_v53 = vmul.f32 %v5950_v51, %v2828_v30 }
 0x2b4   :  { %v6141_v11 = vpop.permute.xlu1 %2147  ;;  %v6143_v8 = vpop.permute.xlu0 %2145  ;;  %v2808_v20 = vsel %vm1223_vm1, %v2805_v18, %v2807_v36  ;;  %v2806_v33 = vsel %vm1223_vm1, %v2804_v60, %v2805_v18  ;;  %v2832_v60 = vmul.f32 %v5968_v37, %v2828_v30 }
 0x2b5   :  { %7860 = vst [vmem:[#allocation38_spill] sm:$0xff] %v6141_v11  ;;  %7861 = vst [vmem:[#allocation28_spill] sm:$0xff] %v6143_v8 }
 0x2b6   :  { %2780 = vrot.lane.b32.xlu1 %v2775_v4, %s4149_s21  ;;  %2778 = vrot.lane.b32.xlu0 %v2773_v38, %s4149_s21  ;;  %v2809_v4 = vrot.slane %v2799_v58, 2  ;;  %v2840_v58 = vrot.slane %v2831_v57, 2 }
 0x2b8   :  { %v6149_v39 = vpop.permute.xlu1 %2176  ;;  %v6151_v21 = vpop.permute.xlu0 %2174 }
 0x2b9   :  { %7862 = vst [vmem:[#allocation36_spill] sm:$0xff] %v6149_v39  ;;  %7863 = vst [vmem:[#allocation40_spill] sm:$0xff] %v6151_v21  ;;  %v2837_v21 = vrot.slane %v2829_v56, 2 }
 0x2ba   :  { %2784 = vrot.lane.b32.xlu1 %v2776_v25, %s4149_s21  ;;  %2782 = vrot.lane.b32.xlu0 %v2777_v22, %s4149_s21  ;;  %v2810_v22 = vsel %vm1223_vm1, %v2807_v36, %v2809_v4  ;;  %v2838_v25 = vrot.slane %v2830_v53, 2 }
 0x2bc   :  { %v6160_v38 = vpop.permute.xlu1 %2180  ;;  %v6162_v55 = vpop.permute.xlu0 %2178 }
 0x2bd   :  { %7864 = vst [vmem:[#allocation41_spill] sm:$0xff] %v6160_v38  ;;  %7865 = vst [vmem:[#allocation43_spill] sm:$0xff] %v6162_v55  ;;  %v2841_v55 = vsel %vm1223_vm1, %v2838_v25, %v2840_v58 }
 0x2be   :  { %2813 = vrot.lane.b32.xlu1 %v2808_v20, %s4150_s3  ;;  %2811 = vrot.lane.b32.xlu0 %v2806_v33, %s4150_s3  ;;  %v2839_v20 = vsel %vm1223_vm1, %v2837_v21, %v2838_v25  ;;  %v2842_v33 = vrot.slane %v2832_v60, 2 }
 0x2c0   :  { %v6168_v18 = vpop.permute.xlu1 %2259  ;;  %v6170_v39 = vpop.permute.xlu0 %2257  ;;  %v2843_v30 = vsel %vm1223_vm1, %v2840_v58, %v2842_v33 }
 0x2c1   :  { %7866 = vst [vmem:[#allocation48_spill] sm:$0xff] %v6168_v18  ;;  %7867 = vst [vmem:[#allocation49_spill] sm:$0xff] %v6170_v39 }
 0x2c2   :  { %2817 = vrot.lane.b32.xlu1 %v2809_v4, %s4150_s3  ;;  %2815 = vrot.lane.b32.xlu0 %v2810_v22, %s4150_s3 }
 0x2c4   :  { %v6176_v38 = vpop.permute.xlu1 %2263  ;;  %v6178_v36 = vpop.permute.xlu0 %2261 }
 0x2c5   :  { %7868 = vst [vmem:[#allocation46_spill] sm:$0xff] %v6176_v38  ;;  %7869 = vst [vmem:[#allocation50_spill] sm:$0xff] %v6178_v36 }
 0x2c6   :  { %2846 = vrot.lane.b32.xlu1 %v2841_v55, %s4150_s3  ;;  %2844 = vrot.lane.b32.xlu0 %v2839_v20, %s4150_s3 }
 0x2c8   :  { %v6183_v53 = vpop.permute.xlu1 %2292  ;;  %v6185_v4 = vpop.permute.xlu0 %2290 }
 0x2c9   :  { %7870 = vst [vmem:[#allocation51_spill] sm:$0xff] %v6183_v53  ;;  %7871 = vst [vmem:[#allocation52_spill] sm:$0xff] %v6185_v4 }
 0x2ca   :  { %2850 = vrot.lane.b32.xlu1 %v2842_v33, %s4150_s3  ;;  %2848 = vrot.lane.b32.xlu0 %v2843_v30, %s4150_s3 }
 0x2cc   :  { %v6189_v21 = vpop.permute.xlu1 %2296  ;;  %v6191_v57 = vpop.permute.xlu0 %2294 }
 0x2cd   :  { %7872 = vst [vmem:[#allocation47_spill] sm:$0xff] %v6189_v21  ;;  %7873 = vst [vmem:[#allocation54_spill] sm:$0xff] %v6191_v57 }
 0x2d0   :  { %v6193_v56 = vpop.permute.xlu1 %2325  ;;  %v6195_v22 = vpop.permute.xlu0 %2323 }
 0x2d1   :  { %7874 = vst [vmem:[#allocation21_spill] sm:$0xff] %v6193_v56  ;;  %7875 = vst [vmem:[#allocation55_spill] sm:$0xff] %v6195_v22 }
 0x2d4   :  { %v6197_v55 = vpop.permute.xlu1 %2329  ;;  %v6199_v25 = vpop.permute.xlu0 %2327 }
 0x2d5   :  { %7876 = vst [vmem:[#allocation53_spill] sm:$0xff] %v6197_v55  ;;  %7877 = vst [vmem:[#allocation56_spill] sm:$0xff] %v6199_v25  ;;  %v2034_v55 = vstv %s3956_s24  ;;  %s6701_s24 = sld [smem:[#allocation11 + $0x8]] }
 0x2d8   :  { %v6201_v58 = vpop.permute.xlu1 %2358  ;;  %v6203_v60 = vpop.permute.xlu0 %2356 }
 0x2d9   :  { %7878 = vst [vmem:[#allocation19_spill] sm:$0xff] %v6201_v58  ;;  %7879 = vst [vmem:[#allocation23_spill] sm:$0xff] %v6203_v60 }
 0x2dc   :  { %v6205_v20 = vpop.permute.xlu1 %2362  ;;  %v6207_v33 = vpop.permute.xlu0 %2360 }
 0x2dd   :  { %7880 = vst [vmem:[#allocation57_spill] sm:$0xff] %v6205_v20  ;;  %7881 = vst [vmem:[#allocation58_spill] sm:$0xff] %v6207_v33 }
 0x2e0   :  { %v6209_v30 = vpop.permute.xlu1 %2404  ;;  %v6211_v21 = vpop.permute.xlu0 %2402 }
 0x2e1   :  { %7882 = vst [vmem:[#allocation59_spill] sm:$0xff] %v6209_v30  ;;  %7883 = vst [vmem:[#allocation60_spill] sm:$0xff] %v6211_v21  ;;  %v1885_v21 = vstv %s3949_s23  ;;  %v4035_v30 = vld [vmem:[%s7592_s1 + $0x18] sm:$0x7f]  ;;  %s6690_s23 = sld [smem:[#allocation11 + $0x19]] }
 0x2e2   :  { %v1889_v39 = vmul.f32 %v4035_v30, %v1885_v21 }
 0x2e4   :  { %v6213_v57 = vpop.permute.xlu1 %2408  ;;  %v6215_v4 = vpop.permute.xlu0 %2406 }
 0x2e5   :  { %7884 = vst [vmem:[#allocation61_spill] sm:$0xff] %v6213_v57  ;;  %7885 = vst [vmem:[#allocation62_spill] sm:$0xff] %v6215_v4  ;;  %v2009_v4 = vstv %s3955_s22  ;;  %s6677_s22 = sld [smem:[#allocation11 + $0x14]] }
 0x2e6   :  { %v6251_v25 = vmul.f32 %v4035_v30, %v2009_v4 }
 0x2e8   :  { %v6217_v53 = vpop.permute.xlu1 %2430  ;;  %v6219_v16 = vpop.permute.xlu0 %2428 }
 0x2e9   :  { %7886 = vst [vmem:[#allocation63_spill] sm:$0xff] %v6217_v53  ;;  %7887 = vst [vmem:[#allocation64_spill] sm:$0xff] %v6219_v16  ;;  %v4032_v16 = vld [vmem:[%s7592_s1 + $0x8] sm:$0xff] }
 0x2ea   :  { %v1887_v22 = vmul.f32 %v4032_v16, %v1885_v21 }
 0x2ec   :  { %v6221_v59 = vpop.permute.xlu1 %2434  ;;  %v6223_v58 = vpop.permute.xlu0 %2432 }
 0x2ed   :  { %7888 = vst [vmem:[#allocation65_spill] sm:$0xff] %v6221_v59  ;;  %7889 = vst [vmem:[#allocation66_spill] sm:$0xff] %v6223_v58  ;;  %v2011_v59 = vmul.f32 %v4032_v16, %v2009_v4  ;;  %v4033_v58 = vld [vmem:[%s7592_s1 + $0x10] sm:$0xff] }
 0x2ee   :  { %v2012_v53 = vmul.f32 %v4033_v58, %v2009_v4  ;;  %v1888_v49 = vmul.f32 %v4033_v58, %v1885_v21  ;;  %v6262_v63 = vmul.f32 %v4033_v58, %v2034_v55 }
 0x2ef   :  { %v2019_v62 = vrot.slane %v2011_v59, 1  ;;  %v1782_v59 = vadd.f32 %v5932_v6, %v5887_v15 }
 0x2f0   :  { %v6225_v20 = vpop.permute.xlu1 %2456  ;;  %v6227_v33 = vpop.permute.xlu0 %2454 }
 0x2f1   :  { %7890 = vst [vmem:[#allocation67_spill] sm:$0xff] %v6225_v20  ;;  %7891 = vst [vmem:[#allocation68_spill] sm:$0xff] %v6227_v33  ;;  %v1848_v15 = vadd.f32 %v5983_v44, %v1782_v59  ;;  %v1783_v44 = vadd.f32 %v5942_v5, %v5904_v24 }
 0x2f4   :  { %v6229_v60 = vpop.permute.xlu1 %2460  ;;  %v6231_v57 = vpop.permute.xlu0 %2458 }
 0x2f5   :  { %7892 = vst [vmem:[#allocation69_spill] sm:$0xff] %v6229_v60  ;;  %7893 = vst [vmem:[#allocation70_spill] sm:$0xff] %v6231_v57  ;;  %v4034_v60 = vld [vmem:[%s7592_s1] sm:$0xff]  ;;  %s6299_s1 = sld [smem:[#allocation8 + $0x1b]] }
 0x2f6   :  { %v2010_v57 = vmul.f32 %v4034_v60, %v2009_v4  ;;  %v1886_v56 = vmul.f32 %v4034_v60, %v1885_v21  ;;  %v6260_v4 = vmul.f32 %v4032_v16, %v2034_v55 }
 0x2f8   :  { %v6239_v20 = vpop.permute.xlu1 %2482  ;;  %v6241_v33 = vpop.permute.xlu0 %2480  ;;  %v2018_v18 = vrot.slane %v2010_v57, 1 }
 0x2f9   :  { %7894 = vst [vmem:[#allocation71_spill] sm:$0xff] %v6239_v20  ;;  %7895 = vst [vmem:[#allocation72_spill] sm:$0xff] %v6241_v33  ;;  %v1895_v20 = vstv %s3950_s25  ;;  %v2021_v33 = vrot.slane %v2012_v53, 1  ;;  %v1781_v53 = vadd.f32 %v5934_v32, %v5890_v14  ;;  %v2191_v32 = vstv %s6246_s9  ;;  %s6731_s25 = sld [smem:[#allocation11 + $0x1a]]  ;;  %s6860_s9 = sld [smem:[#allocation11 + $0xe]] }
 0x2fa   :  { %v6270_v8 = vmul.f32 %v4034_v60, %v1895_v20  ;;  %v6272_v57 = vmul.f32 %v4035_v30, %v1895_v20  ;;  %v6274_v21 = vmul.f32 %v4033_v58, %v1895_v20  ;;  %v2020_v6 = vsel %vm221_vm0, %v2018_v18, %v2019_v62 }
 0x2fb   :  { %v2022_v19 = vsel %vm221_vm0, %v2019_v62, %v2021_v33  ;;  %v1847_v14 = vadd.f32 %v5985_v35, %v1781_v53  ;;  %v2216_v62 = vstv %s6253_s12  ;;  %v2193_v18 = vmul.f32 %v4032_v16, %v2191_v32  ;;  %s6869_s12 = sld [smem:[#allocation11 + $0x22]] }
 0x2fc   :  { %v6255_v36 = vpop.permute.xlu1 %2486  ;;  %v6257_v38 = vpop.permute.xlu0 %2484  ;;  %7899 = vst [vmem:[#allocation76_spill] sm:$0xff] %v6270_v8  ;;  %7900 = vst [vmem:[#allocation77_spill] sm:$0xff] %v6272_v57  ;;  %v7904_v8 = vrot.slane %v6251_v25, 1  ;;  %v2194_v59 = vmul.f32 %v4033_v58, %v2191_v32  ;;  %v2218_v24 = vmul.f32 %v4032_v16, %v2216_v62  ;;  %v2219_v5 = vmul.f32 %v4033_v58, %v2216_v62 }
 0x2fd   :  { %7896 = vst [vmem:[#allocation73_spill] sm:$0xff] %v6255_v36  ;;  %7897 = vst [vmem:[#allocation74_spill] sm:$0xff] %v6257_v38  ;;  %v6268_v36 = vmul.f32 %v4032_v16, %v1895_v20  ;;  %v2035_v38 = vmul.f32 %v4034_v60, %v2034_v55  ;;  %v2044_v20 = vrot.slane %v6260_v4, 1  ;;  %v1890_v53 = vadd.f32 %v1886_v56, %v1847_v14 }
 0x2fe   :  { %7901 = vst [vmem:[#allocation78_spill] sm:$0xff] %v6274_v21  ;;  %v6288_v57 = vsel %vm221_vm0, %v2021_v33, %v7904_v8  ;;  %v2046_v21 = vrot.slane %v6262_v63, 1  ;;  %v2192_v8 = vmul.f32 %v4034_v60, %v2191_v32  ;;  %v6301_v33 = vmul.f32 %v4035_v30, %v2191_v32 }
 0x2ff   :  { %7898 = vst [vmem:[#allocation75_spill] sm:$0xff] %v6268_v36  ;;  %v6292_v36 = vmul.f32 %v4035_v30, %v2034_v55  ;;  %v2043_v35 = vrot.slane %v2035_v38, 1  ;;  %v2217_v38 = vmul.f32 %v4034_v60, %v2216_v62  ;;  %v1926_v32 = vadd.f32 %v6017_v10, %v1890_v53 }
 0x300   :  { %v6277_v11 = vpop.permute.xlu1 %2565  ;;  %v6279_v3 = vpop.permute.xlu0 %2563  ;;  %v6314_v61 = vsel %vm221_vm0, %v2044_v20, %v2046_v21  ;;  %v7668_v16 = vrot.slane %v6301_v33, 2 }
 0x301   :  { %7902 = vst [vmem:[#allocation79_spill] sm:$0xff] %v6277_v11  ;;  %7903 = vst [vmem:[#allocation80_spill] sm:$0xff] %v6279_v3  ;;  %v1784_v3 = vadd.f32 %v5940_v31, %v5901_v45  ;;  %v1849_v45 = vadd.f32 %v5993_v34, %v1783_v44  ;;  %v1891_v31 = vadd.f32 %v1887_v22, %v1848_v15  ;;  %v2203_v34 = vrot.slane %v2194_v59, 2 }
 0x302   :  { %v6309_v11 = vmul.f32 %v4035_v30, %v2216_v62  ;;  %v1978_v60 = vadd.f32 %v6056_v12, %v1926_v32  ;;  %v2226_v30 = vrot.slane %v2218_v24, 2  ;;  %v2228_v15 = vrot.slane %v2219_v5, 2 }
 0x303   :  { %v1850_v55 = vadd.f32 %v5991_v29, %v1784_v3  ;;  %v1927_v1 = vadd.f32 %v6015_v52, %v1891_v31  ;;  %v2201_v29 = vrot.slane %v2193_v18, 2  ;;  %v2200_v3 = vrot.slane %v2192_v8, 2 }
 0x304   :  { %v6303_v4 = vpop.permute.xlu1 %2569  ;;  %v6305_v63 = vpop.permute.xlu0 %2567  ;;  %v1892_v22 = vadd.f32 %v1888_v49, %v1849_v45  ;;  %v2225_v14 = vrot.slane %v2217_v38, 2  ;;  %v7666_v44 = vrot.slane %v6309_v11, 2  ;;  %v6332_v59 = vsel %vm221_vm0, %v2043_v35, %v2044_v20 }
 0x305   :  { %7905 = vst [vmem:[#allocation81_spill] sm:$0xff] %v6305_v63  ;;  %v7667_v63 = vrot.slane %v6292_v36, 1  ;;  %v1893_v10 = vadd.f32 %v1889_v39, %v1850_v55  ;;  %v1979_v58 = vadd.f32 %v6054_v47, %v1927_v1  ;;  %v2373_v8 = vstv %s6299_s1  ;;  %s6881_s1 = sld [smem:[#allocation11 + $0x11]] }
 0x306   :  { %v1928_v18 = vadd.f32 %v6028_v54, %v1892_v22  ;;  %v2204_v1 = vsel %vm1223_vm1, %v2201_v29, %v2203_v34  ;;  %v2202_v39 = vsel %vm1223_vm1, %v2200_v3, %v2201_v29  ;;  %v2029_v35 = vadd.f32 %v2020_v6, %v1978_v60 }
 0x307   :  { %v1929_v62 = vadd.f32 %v6026_v43, %v1893_v10  ;;  %v6338_v49 = vsel %vm221_vm0, %v2046_v21, %v7667_v63  ;;  %v2206_v43 = vsel %vm1223_vm1, %v2203_v34, %v7668_v16  ;;  %v2030_v21 = vadd.f32 %v2022_v19, %v1979_v58 }
 0x308   :  { %v6322_v56 = vpop.permute.xlu1 %2598  ;;  %v6324_v52 = vpop.permute.xlu0 %2596  ;;  %v1980_v20 = vadd.f32 %v6067_v2, %v1928_v18  ;;  %v6352_v55 = vsel %vm1223_vm1, %v2226_v30, %v2228_v15  ;;  %v6355_v45 = vsel %vm1223_vm1, %v2225_v14, %v2226_v30  ;;  %v6360_v31 = vsel %vm1223_vm1, %v2228_v15, %v7666_v44  ;;  %v7912_v14 = vld [vmem:[#allocation22_spill] sm:$0xff] }
 0x309   :  { %7906 = vst [vmem:[#allocation82_spill] sm:$0xff] %v6324_v52  ;;  %v1981_v12 = vadd.f32 %v6065_v41, %v1929_v62  ;;  %v6363_v53 = vmul.f32 %v5950_v51, %v2373_v8  ;;  %v2088_v41 = vadd.f32 %v6092_v26, %v2030_v21  ;;  %v2087_v2 = vadd.f32 %v6094_v40, %v2029_v35  ;;  %v7915_v35 = vld [vmem:[#allocation25_spill] sm:$0xff] }
 0x30a   :  { %v2383_v19 = vstv %s6317_s13  ;;  %v2497_v6 = vstv %s6319_s0  ;;  %v1815_v24 = vadd.f32 %v5957_v13, %v5916_v17  ;;  %v6372_v5 = vmul.f32 %v5955_v48, %v2373_v8  ;;  %s6979_s13 = sld [smem:[#allocation11 + $0x23]]  ;;  %s7138_s0 = sld [smem:[#allocation11 + $0xc]] }
 0x30b   :  { %v6375_v38 = vmul.f32 %v5968_v37, %v2373_v8  ;;  %v6378_v32 = vmul.f32 %v5973_v42, %v2373_v8  ;;  %v7909_v40 = vrot.slane %v6251_v25, 1  ;;  %v2031_v17 = vadd.f32 %v6288_v57, %v1980_v20  ;;  %v7914_v20 = vld [vmem:[#allocation28_spill] sm:$0xff] }
 0x30c   :  { %v6345_v54 = vpop.permute.xlu1 %2602  ;;  %v6347_v47 = vpop.permute.xlu0 %2600  ;;  %v2154_v13 = vadd.f32 %v6130_v28, %v2088_v41  ;;  %v2153_v3 = vadd.f32 %v6132_v50, %v2087_v2  ;;  %v1814_v10 = vadd.f32 %v5959_v23, %v5919_v9  ;;  %v6394_v22 = vmul.f32 %v5950_v51, %v2383_v19  ;;  %v7910_v9 = vld [vmem:[#allocation20_spill] sm:$0xff]  ;;  %v7916_v2 = vld [vmem:[#allocation30_spill] sm:$0xff] }
 0x30d   :  { %7907 = vst [vmem:[#allocation83_spill] sm:$0xff] %v6345_v54  ;;  %7908 = vst [vmem:[#allocation84_spill] sm:$0xff] %v6347_v47  ;;  %v2032_v34 = vadd.f32 %v7909_v40, %v1981_v12  ;;  %v6397_v58 = vmul.f32 %v5955_v48, %v2383_v19  ;;  %v2499_v60 = vmul.f32 %v5950_v51, %v2497_v6  ;;  %v7911_v23 = vld [vmem:[#allocation24_spill] sm:$0xff]  ;;  %v7917_v40 = vld [vmem:[#allocation29_spill] sm:$0xff] }
 0x30e   :  { %v2089_v30 = vadd.f32 %v6105_v0, %v2031_v17  ;;  %v2500_v57 = vmul.f32 %v5973_v42, %v2497_v6  ;;  %v2498_v28 = vmul.f32 %v5955_v48, %v2497_v6  ;;  %v1817_v50 = vadd.f32 %v5975_v27, %v5927_v7  ;;  %v7913_v0 = vld [vmem:[#allocation38_spill] sm:$0xff]  ;;  %v7918_v17 = vld [vmem:[#allocation48_spill] sm:$0xff] }
 0x30f   :  { %v2090_v25 = vadd.f32 %v6103_v46, %v2032_v34  ;;  %v1816_v15 = vadd.f32 %v7911_v23, %v7910_v9  ;;  %v1881_v62 = vadd.f32 %v7912_v14, %v1815_v24  ;;  %v6410_v18 = vmul.f32 %v5968_v37, %v2497_v6  ;;  %v7919_v23 = vld [vmem:[#allocation49_spill] sm:$0xff]  ;;  %v7949_v54 = vld [vmem:[#allocation62_spill] sm:$0xff] }
 0x310   :  { %v6382_v29 = vpop.permute.xlu1 %2631  ;;  %v6384_v26 = vpop.permute.xlu0 %2629  ;;  %v2155_v21 = vadd.f32 %v7914_v20, %v2089_v30  ;;  %v2212_v7 = vadd.f32 %v2204_v1, %v2154_v13  ;;  %v2211_v27 = vadd.f32 %v2202_v39, %v2153_v3  ;;  %v1880_v41 = vadd.f32 %v7915_v35, %v1814_v10  ;;  %v7930_v1 = vld [vmem:[#allocation50_spill] sm:$0xff] }
 0x311   :  { %v2156_v12 = vadd.f32 %v7913_v0, %v2090_v25  ;;  %v1883_v24 = vadd.f32 %v7916_v2, %v1817_v50  ;;  %v1882_v6 = vadd.f32 %v7917_v40, %v1816_v15  ;;  %v2507_v34 = vrot.slane %v2499_v60, 1  ;;  %v7923_v50 = vld [vmem:[#allocation21_spill] sm:$0xff]  ;;  %v7925_v0 = vld [vmem:[#allocation75_spill] sm:$0xff]  ;;  %v7928_v2 = vld [vmem:[#allocation78_spill] sm:$0xff] }
 0x312   :  { %v2270_v9 = vadd.f32 %v7918_v17, %v2212_v7  ;;  %v2269_v14 = vadd.f32 %v7919_v23, %v2211_v27  ;;  %v2509_v44 = vrot.slane %v2500_v57, 1  ;;  %v2506_v63 = vrot.slane %v2498_v28, 1  ;;  %v7924_v28 = vld [vmem:[#allocation55_spill] sm:$0xff]  ;;  %v7927_v27 = vld [vmem:[#allocation77_spill] sm:$0xff]  ;;  %v7929_v17 = vld [vmem:[#allocation46_spill] sm:$0xff] }
 0x313   :  { %v6426_v16 = vmul.f32 %v5968_v37, %v2383_v19  ;;  %v6429_v25 = vmul.f32 %v5973_v42, %v2383_v19  ;;  %v2522_v39 = vstv %s6380_s5  ;;  %v7922_v10 = vrot.slane %v6301_v33, 2  ;;  %v7926_v19 = vld [vmem:[#allocation76_spill] sm:$0xff]  ;;  %s7155_s5 = sld [smem:[#allocation11 + $0x1e]] }
 0x314   :  { %v6412_v8 = vpop.permute.xlu1 %2635  ;;  %v6414_v46 = vpop.permute.xlu0 %2633  ;;  %v2213_v30 = vadd.f32 %v2206_v43, %v2155_v21  ;;  %v2336_v57 = vadd.f32 %v7923_v50, %v2270_v9  ;;  %v2335_v15 = vadd.f32 %v7924_v28, %v2269_v14  ;;  %v1901_v20 = vadd.f32 %v7925_v0, %v1881_v62  ;;  %v7937_v50 = vld [vmem:[#allocation32_spill] sm:$0xff] }
 0x315   :  { %v2214_v60 = vadd.f32 %v7922_v10, %v2156_v12  ;;  %v1900_v7 = vadd.f32 %v7926_v19, %v1880_v41  ;;  %v1903_v35 = vadd.f32 %v7927_v27, %v1883_v24  ;;  %v1902_v40 = vadd.f32 %v7928_v2, %v1882_v6  ;;  %v7931_v12 = vld [vmem:[#allocation31_spill] sm:$0xff]  ;;  %v7935_v10 = vld [vmem:[#allocation53_spill] sm:$0xff] }
 0x316   :  { %v2510_v33 = vsel %vm221_vm0, %v2507_v34, %v2509_v44  ;;  %v2508_v43 = vsel %vm221_vm0, %v2506_v63, %v2507_v34  ;;  %v1953_v21 = vadd.f32 %v7931_v12, %v1901_v20  ;;  %v7932_v9 = vrot.slane %v6410_v18, 1  ;;  %v7938_v19 = vld [vmem:[#allocation37_spill] sm:$0xff]  ;;  %v7939_v2 = vld [vmem:[#allocation39_spill] sm:$0xff] }
 0x317   :  { %v2272_v23 = vadd.f32 %v7929_v17, %v2214_v60  ;;  %v6454_v41 = vmul.f32 %v5950_v51, %v2522_v39  ;;  %v2679_v14 = vstv %s6416_s14  ;;  %v7936_v60 = vld [vmem:[#allocation56_spill] sm:$0xff]  ;;  %v2379_v63 = vadd.f32 %v6363_v53, %v2336_v57  ;;  %s7157_s14 = sld [smem:[#allocation11 + $0xf]] }
 0x318   :  { %v6433_v13 = vpop.permute.xlu1 %2664  ;;  %v6435_v3 = vpop.permute.xlu0 %2662  ;;  %v2512_v62 = vsel %vm221_vm0, %v2509_v44, %v7932_v9  ;;  %v2378_v34 = vadd.f32 %v6372_v5, %v2335_v15  ;;  %v1952_v28 = vadd.f32 %v7937_v50, %v1900_v7  ;;  %v6467_v44 = vmul.f32 %v5973_v42, %v2522_v39  ;;  %v7941_v53 = vld [vmem:[#allocation60_spill] sm:$0xff]  ;;  %v7944_v50 = vld [vmem:[#allocation26_spill] sm:$0xff] }
 0x319   :  { %7920 = vst [vmem:[#allocation20_spill] sm:$0xff] %v6433_v13  ;;  %7921 = vst [vmem:[#allocation24_spill] sm:$0xff] %v6435_v3  ;;  %v2271_v3 = vadd.f32 %v7930_v1, %v2213_v30  ;;  %v2338_v1 = vadd.f32 %v7935_v10, %v2272_v23  ;;  %v6470_v0 = vmul.f32 %v5955_v48, %v2522_v39  ;;  %v7942_v10 = vld [vmem:[#allocation67_spill] sm:$0xff]  ;;  %v7948_v13 = vld [vmem:[#allocation61_spill] sm:$0xff] }
 0x31a   :  { %v6473_v20 = vmul.f32 %v5968_v37, %v2522_v39  ;;  %v1955_v27 = vadd.f32 %v7938_v19, %v1903_v35  ;;  %v1954_v17 = vadd.f32 %v7939_v2, %v1902_v40  ;;  %v2414_v57 = vadd.f32 %v7941_v53, %v2378_v34  ;;  %v7945_v2 = vld [vmem:[#allocation33_spill] sm:$0xff]  ;;  %v7946_v53 = vld [vmem:[#allocation27_spill] sm:$0xff] }
 0x31b   :  { %v2337_v30 = vadd.f32 %v7936_v60, %v2271_v3  ;;  %v7940_v3 = vld [vmem:[#allocation59_spill] sm:$0xff]  ;;  %v2681_v15 = vmul.f32 %v5950_v51, %v2679_v14  ;;  %v2682_v7 = vmul.f32 %v5973_v42, %v2679_v14  ;;  %v2680_v39 = vmul.f32 %v5955_v48, %v2679_v14 }
 0x31c   :  { %v6456_v24 = vpop.permute.xlu1 %2668  ;;  %v6458_v6 = vpop.permute.xlu0 %2666  ;;  %v2415_v23 = vadd.f32 %v7940_v3, %v2379_v63  ;;  %v2381_v35 = vadd.f32 %v6375_v38, %v2338_v1  ;;  %v7943_v63 = vld [vmem:[#allocation68_spill] sm:$0xff]  ;;  %v2005_v19 = vadd.f32 %v7944_v50, %v1953_v21  ;;  %v2004_v3 = vadd.f32 %v7945_v2, %v1952_v28 }
 0x31d   :  { %7933 = vst [vmem:[#allocation22_spill] sm:$0xff] %v6456_v24  ;;  %7934 = vst [vmem:[#allocation38_spill] sm:$0xff] %v6458_v6  ;;  %v2380_v40 = vadd.f32 %v6378_v32, %v2337_v30  ;;  %v2466_v34 = vadd.f32 %v7943_v63, %v2414_v57  ;;  %v2007_v5 = vadd.f32 %v7946_v53, %v1955_v27  ;;  %v7947_v6 = vld [vmem:[#allocation44_spill] sm:$0xff]  ;;  %v2534_v38 = vrot.slane %v6467_v44, 1 }
 0x31e   :  { %v2467_v60 = vadd.f32 %v7942_v10, %v2415_v23  ;;  %v2006_v24 = vadd.f32 %v7947_v6, %v1954_v17  ;;  %v2417_v47 = vadd.f32 %v7948_v13, %v2381_v35  ;;  %v6501_v32 = vmul.f32 %v5968_v37, %v2679_v14  ;;  %v7950_v6 = vld [vmem:[#allocation69_spill] sm:$0xff]  ;;  %v7951_v13 = vld [vmem:[#allocation70_spill] sm:$0xff]  ;;  %v7954_v50 = vld [vmem:[#allocation80_spill] sm:$0xff] }
 0x31f   :  { %v2416_v52 = vadd.f32 %v7949_v54, %v2380_v40  ;;  %v2531_v1 = vrot.slane %v6470_v0, 1  ;;  %v2689_v30 = vrot.slane %v2681_v15, 2  ;;  %v2691_v21 = vrot.slane %v2682_v7, 2 }
 0x320   :  { %v6484_v12 = vpop.permute.xlu1 %2747  ;;  %v6487_v9 = vpop.permute.xlu0 %2745  ;;  %v2688_v23 = vrot.slane %v2680_v39, 2  ;;  %v2469_v17 = vadd.f32 %v7950_v6, %v2417_v47  ;;  %v2518_v54 = vadd.f32 %v2510_v33, %v2467_v60  ;;  %v2517_v35 = vadd.f32 %v2508_v43, %v2466_v34  ;;  %v7953_v39 = vld [vmem:[#allocation79_spill] sm:$0xff]  ;;  %v7955_v6 = vld [vmem:[#allocation34_spill] sm:$0xff] }
 0x321   :  { %v2468_v57 = vadd.f32 %v7951_v13, %v2416_v52  ;;  %v2055_v40 = vadd.f32 %v6314_v61, %v2005_v19  ;;  %v2054_v14 = vadd.f32 %v6332_v59, %v2004_v3  ;;  %v7952_v10 = vrot.slane %v6292_v36, 1  ;;  %v7956_v33 = vld [vmem:[#allocation42_spill] sm:$0xff]  ;;  %v7958_v3 = vld [vmem:[#allocation45_spill] sm:$0xff]  ;;  %v7959_v13 = vld [vmem:[#allocation35_spill] sm:$0xff] }
 0x322   :  { %v2056_v7 = vadd.f32 %v6338_v49, %v2006_v24  ;;  %v2576_v63 = vadd.f32 %v7953_v39, %v2518_v54  ;;  %v2575_v2 = vadd.f32 %v7954_v50, %v2517_v35  ;;  %v2693_v53 = vrot.slane %v6501_v32, 2  ;;  %v7960_v35 = vld [vmem:[#allocation36_spill] sm:$0xff] }
 0x323   :  { %v2057_v15 = vadd.f32 %v7952_v10, %v2007_v5  ;;  %v2704_v47 = vstv %s6479_s4  ;;  %v2121_v52 = vadd.f32 %v7955_v6, %v2055_v40  ;;  %v2120_v43 = vadd.f32 %v7956_v33, %v2054_v14  ;;  %v7961_v40 = vld [vmem:[#allocation40_spill] sm:$0xff]  ;;  %s7161_s4 = sld [smem:[#allocation11 + $0x21]] }
 0x324   :  { %v6504_v28 = vpop.permute.xlu1 %2751  ;;  %v6506_v27 = vpop.permute.xlu0 %2749  ;;  %v2692_v61 = vsel %vm1223_vm1, %v2689_v30, %v2691_v21  ;;  %v2690_v59 = vsel %vm1223_vm1, %v2688_v23, %v2689_v30  ;;  %v7957_v49 = vrot.slane %v6410_v18, 1  ;;  %v2519_v5 = vadd.f32 %v2512_v62, %v2468_v57  ;;  %v7962_v18 = vld [vmem:[#allocation81_spill] sm:$0xff]  ;;  %v7964_v57 = vld [vmem:[#allocation43_spill] sm:$0xff] }
 0x325   :  { %v2642_v34 = vadd.f32 %v6382_v29, %v2576_v63  ;;  %v2641_v19 = vadd.f32 %v6384_v26, %v2575_v2  ;;  %v2123_v32 = vadd.f32 %v7958_v3, %v2057_v15  ;;  %v2122_v54 = vadd.f32 %v7959_v13, %v2056_v7  ;;  %v7963_v29 = vld [vmem:[#allocation41_spill] sm:$0xff]  ;;  %v7968_v13 = vld [vmem:[#allocation47_spill] sm:$0xff] }
 0x326   :  { %v2520_v24 = vadd.f32 %v7957_v49, %v2469_v17  ;;  %v2187_v30 = vadd.f32 %v7960_v35, %v2121_v52  ;;  %v6537_v23 = vmul.f32 %v5950_v51, %v2704_v47  ;;  %v2186_v14 = vadd.f32 %v7961_v40, %v2120_v43 }
 0x327   :  { %v2577_v17 = vadd.f32 %v7962_v18, %v2519_v5  ;;  %v6543_v62 = vmul.f32 %v5973_v42, %v2704_v47  ;;  %v2189_v26 = vadd.f32 %v7963_v29, %v2123_v32  ;;  %v2188_v15 = vadd.f32 %v7964_v57, %v2122_v54  ;;  %v7967_v32 = vld [vmem:[#allocation52_spill] sm:$0xff]  ;;  %v7969_v54 = vld [vmem:[#allocation54_spill] sm:$0xff]  ;;  %v7972_v18 = vld [vmem:[#allocation57_spill] sm:$0xff] }
 0x328   :  { %v6523_v60 = vpop.permute.xlu1 %2780  ;;  %v6525_v36 = vpop.permute.xlu0 %2778  ;;  %v2578_v10 = vadd.f32 %v6303_v4, %v2520_v24  ;;  %v2536_v7 = vrot.slane %v6473_v20, 1  ;;  %v2694_v39 = vsel %vm1223_vm1, %v2691_v21, %v2693_v53  ;;  %v2700_v2 = vadd.f32 %v2692_v61, %v2642_v34  ;;  %v7965_v24 = vld [vmem:[#allocation51_spill] sm:$0xff] }
 0x329   :  { %v2643_v4 = vadd.f32 %v6414_v46, %v2577_v17  ;;  %v2699_v42 = vadd.f32 %v2690_v59, %v2641_v19  ;;  %v2237_v6 = vadd.f32 %v6352_v55, %v2187_v30  ;;  %v2714_v52 = vrot.slane %v6537_v23, 2  ;;  %v7970_v30 = vld [vmem:[#allocation19_spill] sm:$0xff] }
 0x32a   :  { %v2644_v50 = vadd.f32 %v6412_v8, %v2578_v10  ;;  %v2705_v33 = vmul.f32 %v5955_v48, %v2704_v47  ;;  %v6559_v43 = vmul.f32 %v5968_v37, %v2704_v47  ;;  %v2236_v21 = vadd.f32 %v6355_v45, %v2186_v14  ;;  %v7971_v14 = vld [vmem:[#allocation23_spill] sm:$0xff] }
 0x32b   :  { %v2758_v49 = vadd.f32 %v6484_v12, %v2700_v2  ;;  %v2757_v8 = vadd.f32 %v6487_v9, %v2699_v42  ;;  %v2716_v46 = vrot.slane %v6543_v62, 2  ;;  %v2303_v61 = vadd.f32 %v7965_v24, %v2237_v6  ;;  %v7973_v62 = vld [vmem:[#allocation58_spill] sm:$0xff] }
 0x32c   :  { %v6549_v63 = vpop.permute.xlu1 %2784  ;;  %v6551_v51 = vpop.permute.xlu0 %2782  ;;  %v7966_v59 = vrot.slane %v6309_v11, 2  ;;  %v2238_v5 = vadd.f32 %v6360_v31, %v2188_v15  ;;  %v2895_v19 = vstv %s6527_s6  ;;  %v2702_v37 = vadd.f32 %v2693_v53, %v2644_v50  ;;  %s4005_s6 = sld [smem:[#allocation11 + $0xa]] }
 0x32d   :  { %v2701_v47 = vadd.f32 %v2694_v39, %v2643_v4  ;;  %v2302_v12 = vadd.f32 %v7967_v32, %v2236_v21  ;;  %v2369_v23 = vadd.f32 %v7970_v30, %v2303_v61  ;;  %v7974_v4 = vrot.slane %v6454_v41, 1  ;;  %v7981_v32 = vld [vmem:[#allocation72_spill] sm:$0xff] }
 0x32e   :  { %v2239_v55 = vadd.f32 %v7966_v59, %v2189_v26  ;;  %v2304_v35 = vadd.f32 %v7969_v54, %v2238_v5  ;;  %v2760_v11 = vadd.f32 %v6504_v28, %v2702_v37  ;;  %v2713_v26 = vrot.slane %v2705_v33, 2  ;;  %v7977_v5 = vld [vmem:[#allocation64_spill] sm:$0xff]  ;;  %v7979_v37 = vld [vmem:[#allocation66_spill] sm:$0xff] }
 0x32f   :  { %v2759_v31 = vadd.f32 %v6506_v27, %v2701_v47  ;;  %v2368_v10 = vadd.f32 %v7971_v14, %v2302_v12  ;;  %v2535_v2 = vsel %vm221_vm0, %v7974_v4, %v2534_v38  ;;  %v7975_v42 = vmov %v7974_v4 }
 0x330   :  { %v2814_v34 = vpop.permute.xlu1 %2813  ;;  %v2812_v48 = vpop.permute.xlu0 %2811  ;;  %v2305_v9 = vadd.f32 %v7968_v13, %v2239_v55  ;;  %v2370_v29 = vadd.f32 %v7973_v62, %v2304_v35  ;;  %v2533_v6 = vsel %vm221_vm0, %v2531_v1, %v7975_v42  ;;  %v2718_v33 = vrot.slane %v6559_v43, 2  ;;  %v7982_v13 = vld [vmem:[#allocation73_spill] sm:$0xff] }
 0x331   :  { %v2824_v3 = vadd.f32 %v2814_v34, %v2758_v49  ;;  %v2823_v45 = vadd.f32 %v2812_v48, %v2757_v8  ;;  %v2389_v21 = vadd.f32 %v6394_v22, %v2369_v23  ;;  %v2537_v49 = vsel %vm221_vm0, %v2534_v38, %v2536_v7  ;;  %v7976_v38 = vld [vmem:[#allocation63_spill] sm:$0xff]  ;;  %v7978_v34 = vld [vmem:[#allocation65_spill] sm:$0xff] }
 0x332   :  { %v2371_v17 = vadd.f32 %v7972_v18, %v2305_v9  ;;  %v2388_v22 = vadd.f32 %v6397_v58, %v2368_v10  ;;  %v6625_v44 = vsel %vm1223_vm1, %v2714_v52, %v2716_v46  ;;  %v6628_v0 = vsel %vm1223_vm1, %v2713_v26, %v2714_v52 }
 0x333   :  { %v6578_v40 = vmax.f32 %v2824_v3, 0.0  ;;  %v6580_v53 = vmax.f32 %v2823_v45, 0.0  ;;  %v2441_v1 = vadd.f32 %v7976_v38, %v2389_v21  ;;  %v2390_v61 = vadd.f32 %v6429_v25, %v2370_v29  ;;  %v7980_v3 = vld [vmem:[#allocation71_spill] sm:$0xff] }
 0x334   :  { %v2818_v57 = vpop.permute.xlu1 %2817  ;;  %v2816_v15 = vpop.permute.xlu0 %2815  ;;  %v2391_v41 = vadd.f32 %v6426_v16, %v2371_v17  ;;  %v2440_v58 = vadd.f32 %v7977_v5, %v2388_v22  ;;  %v6639_v48 = vsel %vm1223_vm1, %v2716_v46, %v2718_v33  ;;  %v2921_v52 = vstv %s6574_s15  ;;  %v7984_v22 = vld [vmem:[#allocation82_spill] sm:$0xff]  ;;  %v7985_v38 = vld [vmem:[#allocation83_spill] sm:$0xff]  ;;  %s4006_s15 = sld [smem:[#allocation11 + $0x1c]] }
 0x335   :  { %v2826_v28 = vadd.f32 %v2818_v57, %v2760_v11  ;;  %v2825_v39 = vadd.f32 %v2816_v15, %v2759_v31  ;;  %v2897_v27 = vmul.f32 %v2895_v19, %v6578_v40  ;;  %v2896_v50 = vmul.f32 %v2895_v19, %v6580_v53  ;;  %v7983_v31 = vld [vmem:[#allocation74_spill] sm:$0xff] }
 0x336   :  { %v2443_v16 = vadd.f32 %v7978_v34, %v2391_v41  ;;  %v2442_v47 = vadd.f32 %v7979_v37, %v2390_v61  ;;  %v2493_v45 = vadd.f32 %v7980_v3, %v2441_v1  ;;  %v6647_v25 = vstv %s6582_s16  ;;  %v7986_v61 = vld [vmem:[#allocation84_spill] sm:$0xff]  ;;  %s4007_s16 = sld [smem:[#allocation11 + $0xb]] }
 0x337   :  { %v6612_v8 = vmax.f32 %v2826_v28, 0.0  ;;  %v6614_v24 = vmax.f32 %v2825_v39, 0.0  ;;  %2906 = vrot.lane.b32.xlu1 %v2897_v27, %s4149_s21  ;;  %2904 = vrot.lane.b32.xlu0 %v2896_v50, %s4149_s21  ;;  %v2492_v12 = vadd.f32 %v7981_v32, %v2440_v58  ;;  %v2923_v35 = vmul.f32 %v2921_v52, %v6578_v40  ;;  %v7987_v34 = vld [vmem:[#allocation20_spill] sm:$0xff] }
 0x338   :  { %v2495_v9 = vadd.f32 %v7982_v13, %v2443_v16  ;;  %v2922_v30 = vmul.f32 %v2921_v52, %v6580_v53  ;;  %v2947_v23 = vstv %s6591_s18  ;;  %v2494_v14 = vadd.f32 %v7983_v31, %v2442_v47  ;;  %s4008_s18 = sld [smem:[#allocation11 + $0x1d]] }
 0x339   :  { %v2899_v59 = vmul.f32 %v2895_v19, %v6612_v8  ;;  %v2898_v55 = vmul.f32 %v2895_v19, %v6614_v24  ;;  %v6650_v19 = vstv %s6584_s17  ;;  %v6656_v46 = vmul.f32 %v6647_v25, %v6614_v24  ;;  %s2874_s17 = sld [smem:[#allocation11]] }
 0x33a   :  { %v6660_v54 = vmul.f32 %v6647_v25, %v6612_v8  ;;  %v6667_v11 = vmul.f32 %v6650_v19, %v6614_v24  ;;  %v6673_v17 = vstv %s6604_s7  ;;  %v6682_v29 = vmul.f32 %v6650_v19, %v6612_v8  ;;  %s2868_s7 = sld [smem:[#allocation12]] }
 0x33b   :  { %2910 = vrot.lane.b32.xlu1 %v2899_v59, %s4149_s21  ;;  %2908 = vrot.lane.b32.xlu0 %v2898_v55, %s4149_s21  ;;  %v3061_v10 = vrot.slane %v6656_v46, 1  ;;  %v6685_v26 = vstv %s6618_s19  ;;  %v6688_v57 = vstv %s6620_s20  ;;  %v2543_v15 = vadd.f32 %v2535_v2, %v2493_v45  ;;  %v7989_v45 = vld [vmem:[#allocation22_spill] sm:$0xff]  ;;  %s3986_s19 = sld [smem:[#allocation11 + $0x12]]  ;;  %s3985_s20 = sld [smem:[#allocation12 + $0x1]] }
 0x33c   :  { %v3063_v18 = vrot.slane %v6660_v54, 1  ;;  %v3094_v62 = vrot.slane %v6667_v11, 1  ;;  %v2542_v28 = vadd.f32 %v2533_v6, %v2492_v12  ;;  %v2545_v39 = vadd.f32 %v2536_v7, %v2495_v9 }
 0x33d   :  { %v2925_v50 = vmul.f32 %v2921_v52, %v6612_v8  ;;  %v2924_v4 = vmul.f32 %v2921_v52, %v6614_v24  ;;  %v7681_v42 = vrot.slane %v6682_v29, 1  ;;  %v6708_v2 = vmul.f32 %v6673_v17, %v6614_v24  ;;  %v7988_v52 = vld [vmem:[#allocation24_spill] sm:$0xff] }
 0x33e   :  { %v6699_v27 = vsel %vm221_vm0, %v3061_v10, %v3063_v18  ;;  %v2609_v20 = vadd.f32 %v6322_v56, %v2543_v15  ;;  %v2544_v7 = vadd.f32 %v2537_v49, %v2494_v14  ;;  %v6713_v6 = vmul.f32 %v6673_v17, %v6612_v8 }
 0x33f   :  { %2932 = vrot.lane.b32.xlu1 %v2923_v35, %s4149_s21  ;;  %2930 = vrot.lane.b32.xlu0 %v2922_v30, %s4149_s21  ;;  %v6717_v21 = vmul.f32 %v6685_v26, %v6614_v24  ;;  %v2608_v41 = vadd.f32 %v7984_v22, %v2542_v28  ;;  %v2611_v1 = vadd.f32 %v7985_v38, %v2545_v39  ;;  %v7680_v49 = vrot.slane %v6708_v2, 1  ;;  %v7990_v35 = vld [vmem:[#allocation38_spill] sm:$0xff] }
 0x340   :  { %v6728_v56 = vsel %vm221_vm0, %v3094_v62, %v7681_v42  ;;  %v2610_v59 = vadd.f32 %v7986_v61, %v2544_v7  ;;  %v7678_v55 = vrot.slane %v6713_v6, 1  ;;  %v6738_v58 = vmul.f32 %v6685_v26, %v6612_v8  ;;  %v2845_v7 = vpop.permute.xlu0 %2844 }
 0x341   :  { %v7679_v5 = vrot.slane %v6717_v21, 1  ;;  %v2675_v16 = vadd.f32 %v7987_v34, %v2609_v20  ;;  %v2674_v37 = vadd.f32 %v7988_v52, %v2608_v41  ;;  %v2949_v47 = vmul.f32 %v2947_v23, %v6578_v40  ;;  %v2847_v20 = vpop.permute.xlu1 %2846 }
 0x342   :  { %v2948_v3 = vmul.f32 %v2947_v23, %v6580_v53  ;;  %v2677_v32 = vadd.f32 %v7989_v45, %v2611_v1  ;;  %v6750_v12 = vsel %vm221_vm0, %v7680_v49, %v7678_v55  ;;  %v7677_v13 = vrot.slane %v6738_v58, 1 }
 0x343   :  { %2936 = vrot.lane.b32.xlu1 %v2925_v50, %s4149_s21  ;;  %2934 = vrot.lane.b32.xlu0 %v2924_v4, %s4149_s21  ;;  %v6755_v9 = vmul.f32 %v6688_v57, %v6614_v24  ;;  %v2676_v30 = vadd.f32 %v7990_v35, %v2610_v59  ;;  %v2973_v31 = vstv %s6677_s22  ;;  %v6763_v14 = vmul.f32 %v6688_v57, %v6612_v8  ;;  %s4004_s22 = sld [smem:[#allocation11 + $0x1b]] }
 0x344   :  { %v6766_v15 = vstv %s6690_s23  ;;  %v6773_v28 = vsel %vm221_vm0, %v7679_v5, %v7677_v13  ;;  %v6781_v4 = vstv %s6701_s24  ;;  %v2951_v22 = vmul.f32 %v2947_v23, %v6612_v8 }
 0x345   :  { %v7676_v39 = vrot.slane %v6755_v9, 2  ;;  %v6778_v50 = vmul.f32 %v6766_v15, %v6614_v24  ;;  %v2950_v41 = vmul.f32 %v2947_v23, %v6614_v24  ;;  %v7675_v38 = vrot.slane %v6763_v14, 2 }
 0x346   :  { %v6788_v1 = vmul.f32 %v6766_v15, %v6612_v8  ;;  %v2725_v61 = vadd.f32 %v6625_v44, %v2675_v16  ;;  %v2724_v59 = vadd.f32 %v6628_v0, %v2674_v37  ;;  %v2727_v34 = vadd.f32 %v2718_v33, %v2677_v32 }
 0x347   :  { %2958 = vrot.lane.b32.xlu1 %v2949_v47, %s4150_s3  ;;  %2956 = vrot.lane.b32.xlu0 %v2948_v3, %s4150_s3  ;;  %v7670_v52 = vrot.slane %v6778_v50, 2  ;;  %v2726_v47 = vadd.f32 %v6639_v48, %v2676_v30  ;;  %v6803_v23 = vsel %vm1223_vm1, %v7676_v39, %v7675_v38  ;;  %v6807_v0 = vstv %s6731_s25 }
 0x348   :  { %v7669_v44 = vrot.slane %v6788_v1, 2  ;;  %v2791_v43 = vadd.f32 %v6523_v60, %v2725_v61  ;;  %v2790_v33 = vadd.f32 %v6525_v36, %v2724_v59  ;;  %v2793_v48 = vadd.f32 %v6549_v63, %v2727_v34 }
 0x349   :  { %v6818_v16 = vmul.f32 %v6781_v4, %v6614_v24  ;;  %v2975_v37 = vmul.f32 %v2973_v31, %v6578_v40  ;;  %v2974_v3 = vmul.f32 %v2973_v31, %v6580_v53  ;;  %v6835_v36 = vmul.f32 %v6781_v4, %v6612_v8 }
 0x34a   :  { %v6831_v60 = vsel %vm1223_vm1, %v7670_v52, %v7669_v44  ;;  %v3051_v63 = vmul.f32 %v6647_v25, %v6578_v40  ;;  %v3050_v45 = vmul.f32 %v6647_v25, %v6580_v53  ;;  %v6844_v35 = vmul.f32 %v6807_v0, %v6614_v24 }
 0x34b   :  { %2962 = vrot.lane.b32.xlu1 %v2951_v22, %s4150_s3  ;;  %2960 = vrot.lane.b32.xlu0 %v2950_v41, %s4150_s3  ;;  %v7672_v32 = vrot.slane %v6818_v16, 2  ;;  %v2792_v30 = vadd.f32 %v6551_v51, %v2726_v47  ;;  %v2851_v22 = vpop.permute.xlu1 %2850  ;;  %v2849_v41 = vpop.permute.xlu0 %2848  ;;  %v3084_v25 = vmul.f32 %v6650_v19, %v6578_v40  ;;  %v7671_v61 = vrot.slane %v6835_v36, 2 }
 0x34c   :  { %v6858_v59 = vmul.f32 %v6807_v0, %v6612_v8  ;;  %v2857_v51 = vadd.f32 %v2847_v20, %v2791_v43  ;;  %v2856_v34 = vadd.f32 %v2845_v7, %v2790_v33  ;;  %v3083_v47 = vmul.f32 %v6650_v19, %v6580_v53 }
 0x34d   :  { %v2976_v44 = vmul.f32 %v2973_v31, %v6614_v24  ;;  %v6878_v19 = vsel %vm1223_vm1, %v7672_v32, %v7671_v61  ;;  %v2859_v7 = vadd.f32 %v2851_v22, %v2793_v48  ;;  %v2858_v43 = vadd.f32 %v2849_v41, %v2792_v30 }
 0x34e   :  { %v7673_v20 = vrot.slane %v6858_v59, 2  ;;  %v3059_v33 = vrot.slane %v3051_v63, 1  ;;  %v3058_v52 = vrot.slane %v3050_v45, 1  ;;  %v3537_v61 = vstv %s6820_s27 }
 0x34f   :  { %2984 = vrot.lane.b32.xlu1 %v2975_v37, %s4150_s3  ;;  %2982 = vrot.lane.b32.xlu0 %v2974_v3, %s4150_s3  ;;  %v7674_v37 = vrot.slane %v6844_v35, 2  ;;  %v2977_v3 = vmul.f32 %v2973_v31, %v6612_v8  ;;  %v6894_v32 = vstv %s6809_s2  ;;  %v6897_v48 = vstv %s6811_s26 }
 0x350   :  { %v6900_v63 = vstv %s6822_s28  ;;  %v6904_v45 = vmax.f32 %v2856_v34, 0.0  ;;  %v3092_v30 = vrot.slane %v3084_v25, 1  ;;  %v3091_v22 = vrot.slane %v3083_v47, 1 }
 0x351   :  { %v6890_v31 = vsel %vm1223_vm1, %v7674_v37, %v7673_v20  ;;  %v6906_v41 = vmax.f32 %v2859_v7, 0.0  ;;  %v3062_v20 = vsel %vm221_vm0, %v3059_v33, %v3061_v10  ;;  %v3060_v37 = vsel %vm221_vm0, %v3058_v52, %v3059_v33 }
 0x352   :  { %7991 = vst [vmem:[#allocation28_spill] sm:$0xff] %v6890_v31  ;;  %v6918_v34 = vstv %s6848_s30  ;;  %v3603_v25 = vstv %s6860_s9  ;;  %v6922_v47 = vstv %s6862_s10  ;;  %v6925_v7 = vstv %s6867_s11 }
 0x353   :  { %2988 = vrot.lane.b32.xlu1 %v2977_v3, %s4150_s3  ;;  %2986 = vrot.lane.b32.xlu0 %v2976_v44, %s4150_s3  ;;  %v6902_v44 = vmax.f32 %v2857_v51, 0.0  ;;  %v6908_v3 = vmax.f32 %v2858_v43, 0.0  ;;  %v3570_v51 = vstv %s6846_s29  ;;  %v6928_v43 = vstv %s6869_s12 }
 0x354   :  { %v3093_v46 = vsel %vm221_vm0, %v3091_v22, %v3092_v30  ;;  %v3117_v10 = vmul.f32 %v6673_v17, %v6578_v40  ;;  %v3538_v38 = vmul.f32 %v3537_v61, %v6904_v45  ;;  %v6943_v39 = vmul.f32 %v3537_v61, %v6906_v41 }
 0x355   :  { %v3539_v52 = vmul.f32 %v3537_v61, %v6902_v44  ;;  %v3540_v33 = vmul.f32 %v3537_v61, %v6908_v3  ;;  %v3116_v22 = vmul.f32 %v6673_v17, %v6580_v53  ;;  %v6954_v11 = vmul.f32 %v6685_v26, %v6578_v40 }
 0x356   :  { %v3546_v61 = vrot.slane %v3538_v38, 1  ;;  %v7682_v55 = vrot.slane %v6943_v39, 1  ;;  %v3573_v54 = vmul.f32 %v3570_v51, %v6908_v3  ;;  %v3571_v5 = vmul.f32 %v3570_v51, %v6904_v45 }
 0x357   :  { %3067 = vrot.lane.b32.xlu1 %v3062_v20, %s4149_s21  ;;  %3065 = vrot.lane.b32.xlu0 %v3060_v37, %s4149_s21  ;;  %v6935_v20 = vstv %s6881_s1  ;;  %v3095_v37 = vsel %vm221_vm0, %v3092_v30, %v3094_v62  ;;  %v3547_v62 = vrot.slane %v3539_v52, 1  ;;  %v3572_v30 = vmul.f32 %v3570_v51, %v6902_v44 }
 0x358   :  { %v3549_v13 = vrot.slane %v3540_v33, 1  ;;  %v3605_v17 = vmul.f32 %v3603_v25, %v6902_v44  ;;  %v3582_v33 = vrot.slane %v3573_v54, 1  ;;  %v3606_v31 = vmul.f32 %v3603_v25, %v6908_v3 }
 0x359   :  { %v6968_v52 = vsel %vm221_vm0, %v3546_v61, %v3547_v62  ;;  %v6987_v54 = vmul.f32 %v6894_v32, %v6614_v24 }
 0x35a   :  { %v6965_v49 = vsel %vm221_vm0, %v3547_v62, %v3549_v13  ;;  %v6973_v38 = vsel %vm221_vm0, %v3549_v13, %v7682_v55  ;;  %v3613_v61 = vrot.slane %v3605_v17, 1  ;;  %v3604_v13 = vmul.f32 %v3603_v25, %v6904_v45 }
 0x35b   :  { %3071 = vrot.lane.b32.xlu1 %v3063_v18, %s4149_s21  ;;  %3069 = vrot.lane.b32.xlu0 %v6699_v27, %s4149_s21  ;;  %v3580_v18 = vrot.slane %v3572_v30, 1  ;;  %v6961_v27 = vmul.f32 %v3570_v51, %v6906_v41  ;;  %7992 = vst [vmem:[#allocation25_spill] sm:$0xff] %v6973_v38  ;;  %v3125_v51 = vrot.slane %v3117_v10, 1  ;;  %v3579_v30 = vrot.slane %v3571_v5, 1 }
 0x35c   :  { %v3615_v10 = vrot.slane %v3606_v31, 1  ;;  %v3158_v55 = vrot.slane %v6954_v11, 1  ;;  %v3149_v17 = vmul.f32 %v6685_v26, %v6580_v53  ;;  %v7001_v38 = vmul.f32 %v3603_v25, %v6906_v41 }
 0x35d   :  { %v7683_v42 = vrot.slane %v6961_v27, 1  ;;  %v6982_v62 = vsel %vm221_vm0, %v3580_v18, %v3582_v33  ;;  %v7014_v11 = vmul.f32 %v6894_v32, %v6612_v8  ;;  %v3638_v26 = vmul.f32 %v6922_v47, %v6902_v44 }
 0x35e   :  { %7993 = vst [vmem:[#allocation30_spill] sm:$0xff] %v6982_v62  ;;  %v3612_v62 = vrot.slane %v3604_v13, 1  ;;  %7994 = vst [vmem:[#allocation29_spill] sm:$0xff] %v7001_v38  ;;  %v7996_v25 = vrot.slane %v6708_v2, 1  ;;  %v3637_v31 = vmul.f32 %v6922_v47, %v6904_v45  ;;  %v3157_v2 = vrot.slane %v3149_v17, 1 }
 0x35f   :  { %3100 = vrot.lane.b32.xlu1 %v3095_v37, %s4149_s21  ;;  %3098 = vrot.lane.b32.xlu0 %v3093_v46, %s4149_s21  ;;  %v3124_v37 = vrot.slane %v3116_v22, 1  ;;  %v6990_v46 = vsel %vm221_vm0, %v3579_v30, %v3580_v18  ;;  %v6995_v5 = vsel %vm221_vm0, %v3582_v33, %v7683_v42  ;;  %v7995_v22 = vrot.slane %v6682_v29, 1 }
 0x360   :  { %v7009_v18 = vsel %vm221_vm0, %v3613_v61, %v3615_v10  ;;  %v3128_v29 = vsel %vm221_vm0, %v3125_v51, %v7996_v25  ;;  %v7022_v33 = vsel %vm221_vm0, %v3612_v62, %v3613_v61  ;;  %v3639_v30 = vmul.f32 %v6922_v47, %v6908_v3 }
 0x361   :  { %v3126_v13 = vsel %vm221_vm0, %v3124_v37, %v3125_v51  ;;  %v3646_v42 = vrot.slane %v3638_v26, 1  ;;  %v7038_v25 = vmul.f32 %v6897_v48, %v6614_v24  ;;  %v7998_v51 = vrot.slane %v6987_v54, 1 }
 0x362   :  { %v3648_v61 = vrot.slane %v3639_v30, 1  ;;  %v3645_v17 = vrot.slane %v3637_v31, 1  ;;  %v7054_v26 = vstv %s6979_s13  ;;  %v7058_v30 = vmul.f32 %v6688_v57, %v6578_v40 }
 0x363   :  { %3104 = vrot.lane.b32.xlu1 %v7995_v22, %s4149_s21  ;;  %3102 = vrot.lane.b32.xlu0 %v6728_v56, %s4149_s21  ;;  %v7684_v56 = vrot.slane %v7001_v38, 1  ;;  %v7685_v22 = vrot.slane %v7014_v11, 1  ;;  %v8001_v31 = vrot.slane %v6717_v21, 1  ;;  %v3722_v38 = vmul.f32 %v6925_v7, %v6908_v3 }
 0x364   :  { %v3720_v21 = vmul.f32 %v6925_v7, %v6904_v45 }
 0x365   :  { %v7034_v62 = vsel %vm221_vm0, %v3615_v10, %v7684_v56  ;;  %v7047_v37 = vsel %vm221_vm0, %v7998_v51, %v7685_v22  ;;  %v7051_v10 = vmul.f32 %v6922_v47, %v6906_v41  ;;  %v7066_v51 = vmul.f32 %v6897_v48, %v6612_v8 }
 0x366   :  { %7997 = vst [vmem:[#allocation48_spill] sm:$0xff] %v7034_v62  ;;  %v3161_v47 = vsel %vm221_vm0, %v3158_v55, %v8001_v31  ;;  %v7072_v56 = vsel %vm221_vm0, %v3645_v17, %v3646_v42  ;;  %v3721_v62 = vmul.f32 %v6925_v7, %v6902_v44  ;;  %v8003_v31 = vrot.slane %v6713_v6, 1 }
 0x367   :  { %3133 = vrot.lane.b32.xlu1 %v3128_v29, %s4150_s3  ;;  %3131 = vrot.lane.b32.xlu0 %v3126_v13, %s4150_s3  ;;  %7999 = vst [vmem:[#allocation49_spill] sm:$0xff] %v7051_v10  ;;  %v7061_v29 = vsel %vm221_vm0, %v3646_v42, %v3648_v61  ;;  %8002 = vst [vmem:[#allocation55_spill] sm:$0xff] %v7072_v56  ;;  %v7687_v22 = vrot.slane %v7051_v10, 1  ;;  %v7688_v13 = vrot.slane %v7066_v51, 1  ;;  %v8005_v6 = vrot.slane %v7038_v25, 1 }
 0x368   :  { %8000 = vst [vmem:[#allocation21_spill] sm:$0xff] %v7061_v29  ;;  %v3159_v29 = vsel %vm221_vm0, %v3157_v2, %v3158_v55  ;;  %v3232_v42 = vmul.f32 %v6688_v57, %v6580_v53  ;;  %v3729_v2 = vrot.slane %v3721_v62, 2  ;;  %v7097_v17 = vmul.f32 %v6925_v7, %v6906_v41 }
 0x369   :  { %v7093_v55 = vsel %vm221_vm0, %v3648_v61, %v7687_v22  ;;  %v3728_v56 = vrot.slane %v3720_v21, 2  ;;  %v3754_v57 = vmul.f32 %v6928_v43, %v6902_v44  ;;  %v3755_v62 = vmul.f32 %v6928_v43, %v6908_v3 }
 0x36a   :  { %8004 = vst [vmem:[#allocation75_spill] sm:$0xff] %v7093_v55  ;;  %v7690_v61 = vrot.slane %v7097_v17, 2  ;;  %v3753_v7 = vmul.f32 %v6928_v43, %v6904_v45  ;;  %v7115_v22 = vmul.f32 %v6928_v43, %v6906_v41 }
 0x36b   :  { %3137 = vrot.lane.b32.xlu1 %v8003_v31, %s4150_s3  ;;  %3135 = vrot.lane.b32.xlu0 %v6750_v12, %s4150_s3  ;;  %v7104_v31 = vsel %vm221_vm0, %v8005_v6, %v7688_v13  ;;  %v3731_v12 = vrot.slane %v3722_v38, 2  ;;  %v7121_v38 = vsel %vm1223_vm1, %v3728_v56, %v3729_v2  ;;  %v3762_v21 = vrot.slane %v3754_v57, 2 }
 0x36c   :  { %8006 = vst [vmem:[#allocation76_spill] sm:$0xff] %v7115_v22  ;;  %v3787_v13 = vmul.f32 %v6935_v20, %v6902_v44  ;;  %v3764_v43 = vrot.slane %v3755_v62, 2  ;;  %v3761_v10 = vrot.slane %v3753_v7, 2  ;;  %v3241_v56 = vrot.slane %v7058_v30, 2 }
 0x36d   :  { %v7118_v6 = vsel %vm1223_vm1, %v3729_v2, %v3731_v12  ;;  %v7130_v55 = vsel %vm1223_vm1, %v3731_v12, %v7690_v61  ;;  %v3788_v2 = vmul.f32 %v6935_v20, %v6908_v3  ;;  %v7153_v30 = vmul.f32 %v6900_v63, %v6614_v24 }
 0x36e   :  { %8007 = vst [vmem:[#allocation77_spill] sm:$0xff] %v7118_v6  ;;  %v7691_v6 = vrot.slane %v7115_v22, 2  ;;  %v3795_v57 = vrot.slane %v3787_v13, 2  ;;  %v7144_v12 = vsel %vm1223_vm1, %v3761_v10, %v3762_v21  ;;  %v3240_v13 = vrot.slane %v3232_v42, 2 }
 0x36f   :  { %3166 = vrot.lane.b32.xlu1 %v3161_v47, %s4150_s3  ;;  %3164 = vrot.lane.b32.xlu0 %v3159_v29, %s4150_s3  ;;  %v3786_v47 = vmul.f32 %v6935_v20, %v6904_v45  ;;  %v7141_v29 = vsel %vm1223_vm1, %v3762_v21, %v3764_v43  ;;  %8008 = vst [vmem:[#allocation78_spill] sm:$0xff] %v7144_v12  ;;  %v3797_v61 = vrot.slane %v3788_v2, 2  ;;  %v8010_v21 = vrot.slane %v6738_v58, 1 }
 0x370   :  { %v7149_v62 = vsel %vm1223_vm1, %v3764_v43, %v7691_v6  ;;  %v3266_v7 = vmul.f32 %v6766_v15, %v6578_v40  ;;  %v7171_v6 = vmul.f32 %v6935_v20, %v6906_v41  ;;  %v7175_v42 = vmul.f32 %v6900_v63, %v6612_v8 }
 0x371   :  { %8009 = vst [vmem:[#allocation46_spill] sm:$0xff] %v7149_v62  ;;  %v3794_v10 = vrot.slane %v3786_v47, 2  ;;  %v3820_v2 = vmul.f32 %v7054_v26, %v6902_v44  ;;  %v3265_v58 = vmul.f32 %v6766_v15, %v6580_v53  ;;  %v7182_v47 = vsel %vm1223_vm1, %v3795_v57, %v3797_v61 }
 0x372   :  { %8011 = vst [vmem:[#allocation50_spill] sm:$0xff] %v7171_v6  ;;  %8012 = vst [vmem:[#allocation31_spill] sm:$0xff] %v7182_v47  ;;  %v3821_v20 = vmul.f32 %v7054_v26, %v6908_v3  ;;  %v7194_v62 = vmul.f32 %v6781_v4, %v6578_v40  ;;  %v7693_v22 = vrot.slane %v7171_v6, 2  ;;  %v7694_v15 = vrot.slane %v7175_v42, 2 }
 0x373   :  { %3170 = vrot.lane.b32.xlu1 %v8010_v21, %s4150_s3  ;;  %3168 = vrot.lane.b32.xlu0 %v6773_v28, %s4150_s3  ;;  %v7185_v28 = vsel %vm1223_vm1, %v3794_v10, %v3795_v57  ;;  %v8014_v21 = vrot.slane %v6755_v9, 2  ;;  %v3242_v47 = vsel %vm1223_vm1, %v3240_v13, %v3241_v56  ;;  %v3828_v12 = vrot.slane %v3820_v2, 2 }
 0x374   :  { %8013 = vst [vmem:[#allocation53_spill] sm:$0xff] %v7185_v28  ;;  %v3830_v57 = vrot.slane %v3821_v20, 2  ;;  %v3819_v10 = vmul.f32 %v7054_v26, %v6904_v45  ;;  %v3274_v9 = vrot.slane %v3266_v7, 2  ;;  %v3273_v2 = vrot.slane %v3265_v58, 2 }
 0x375   :  { %v3244_v43 = vsel %vm1223_vm1, %v3241_v56, %v8014_v21  ;;  %v7206_v21 = vsel %vm1223_vm1, %v3797_v61, %v7693_v22  ;;  %v8016_v56 = vrot.slane %v7153_v30, 2  ;;  %v3298_v7 = vmul.f32 %v6781_v4, %v6580_v53 }
 0x376   :  { %8015 = vst [vmem:[#allocation56_spill] sm:$0xff] %v7206_v21  ;;  %v3827_v61 = vrot.slane %v3819_v10, 2  ;;  %v7227_v22 = vmul.f32 %v7054_v26, %v6906_v41  ;;  %v3512_v21 = vstv %s7155_s5  ;;  %v3669_v4 = vstv %s7157_s14 }
 0x377   :  { %3249 = vrot.lane.b32.xlu1 %v3244_v43, %s4149_s21  ;;  %3247 = vrot.lane.b32.xlu0 %v3242_v47, %s4149_s21  ;;  %v7213_v13 = vsel %vm1223_vm1, %v8016_v56, %v7694_v15  ;;  %v7217_v43 = vmul.f32 %v6918_v34, %v6614_v24  ;;  %v7222_v47 = vsel %vm1223_vm1, %v3828_v12, %v3830_v57  ;;  %v3487_v15 = vstv %s7138_s0 }
 0x378   :  { %8017 = vst [vmem:[#allocation32_spill] sm:$0xff] %v7213_v13  ;;  %8019 = vst [vmem:[#allocation39_spill] sm:$0xff] %v7222_v47  ;;  %v7231_v56 = vmul.f32 %v6918_v34, %v6612_v8  ;;  %v7235_v58 = vsel %vm1223_vm1, %v3827_v61, %v3828_v12  ;;  %v3694_v6 = vstv %s7161_s4  ;;  %v8023_v10 = vrot.slane %v6763_v14, 2 }
 0x379   :  { %8018 = vst [vmem:[#allocation37_spill] sm:$0xff] %v7217_v43  ;;  %8020 = vst [vmem:[#allocation59_spill] sm:$0xff] %v7227_v22  ;;  %v8024_v26 = vrot.slane %v6778_v50, 2  ;;  %v3307_v47 = vrot.slane %v7194_v62, 2  ;;  %v7696_v28 = vrot.slane %v7227_v22, 2  ;;  %v3275_v61 = vsel %vm1223_vm1, %v3273_v2, %v3274_v9 }
 0x37a   :  { %8021 = vst [vmem:[#allocation60_spill] sm:$0xff] %v7231_v56  ;;  %8022 = vst [vmem:[#allocation67_spill] sm:$0xff] %v7235_v58  ;;  %v7697_v12 = vrot.slane %v7231_v56, 2  ;;  %v3306_v58 = vrot.slane %v3298_v7, 2  ;;  %v7254_v14 = vmul.f32 %v6807_v0, %v6578_v40  ;;  %v8025_v50 = vrot.slane %v6818_v16, 2 }
 0x37b   :  { %3253 = vrot.lane.b32.xlu1 %v8023_v10, %s4149_s21  ;;  %3251 = vrot.lane.b32.xlu0 %v6803_v23, %s4149_s21  ;;  %v3277_v20 = vsel %vm1223_vm1, %v3274_v9, %v8024_v26  ;;  %v7258_v23 = vmul.f32 %v6807_v0, %v6580_v53  ;;  %v7266_v62 = vsel %vm1223_vm1, %v3830_v57, %v7696_v28  ;;  %v8027_v9 = vrot.slane %v7217_v43, 2 }
 0x37c   :  { %v3310_v10 = vsel %vm1223_vm1, %v3307_v47, %v8025_v50  ;;  %8026 = vst [vmem:[#allocation68_spill] sm:$0xff] %v7266_v62  ;;  %v3489_v7 = vmul.f32 %v3487_v15, %v6902_v44  ;;  %v3490_v0 = vmul.f32 %v3487_v15, %v6908_v3  ;;  %v3488_v16 = vmul.f32 %v3487_v15, %v6904_v45 }
 0x37d   :  { %v7273_v2 = vsel %vm1223_vm1, %v8027_v9, %v7697_v12  ;;  %v7279_v26 = vmul.f32 %v3487_v15, %v6906_v41  ;;  %v3514_v50 = vmul.f32 %v3512_v21, %v6902_v44  ;;  %v3515_v28 = vmul.f32 %v3512_v21, %v6908_v3 }
 0x37e   :  { %8028 = vst [vmem:[#allocation26_spill] sm:$0xff] %v7273_v2  ;;  %v3497_v57 = vrot.slane %v3489_v7, 1  ;;  %v3513_v9 = vmul.f32 %v3512_v21, %v6904_v45  ;;  %v7287_v12 = vmul.f32 %v3512_v21, %v6906_v41  ;;  %v3499_v62 = vrot.slane %v3490_v0, 1 }
 0x37f   :  { %3282 = vrot.lane.b32.xlu1 %v3277_v20, %s4149_s21  ;;  %3280 = vrot.lane.b32.xlu0 %v3275_v61, %s4149_s21  ;;  %v3496_v22 = vrot.slane %v3488_v16, 1  ;;  %v7701_v2 = vrot.slane %v7279_v26, 1  ;;  %v3522_v15 = vrot.slane %v3514_v50, 1  ;;  %v3524_v56 = vrot.slane %v3515_v28, 1 }
 0x380   :  { %8029 = vst [vmem:[#allocation33_spill] sm:$0xff] %v7287_v12  ;;  %v3521_v43 = vrot.slane %v3513_v9, 1  ;;  %v7702_v13 = vrot.slane %v7287_v12, 1  ;;  %v3671_v20 = vmul.f32 %v3669_v4, %v6902_v44  ;;  %v7293_v61 = vsel %vm221_vm0, %v3497_v57, %v3499_v62 }
 0x381   :  { %v7296_v7 = vsel %vm221_vm0, %v3496_v22, %v3497_v57  ;;  %v7301_v21 = vsel %vm221_vm0, %v3499_v62, %v7701_v2  ;;  %v3672_v0 = vmul.f32 %v3669_v4, %v6908_v3  ;;  %v8030_v28 = vrot.slane %v6788_v1, 2 }
 0x382   :  { %v7310_v16 = vsel %vm221_vm0, %v3522_v15, %v3524_v56  ;;  %v7313_v22 = vsel %vm221_vm0, %v3521_v43, %v3522_v15  ;;  %v7318_v62 = vsel %vm221_vm0, %v3524_v56, %v7702_v13  ;;  %v3679_v50 = vrot.slane %v3671_v20, 2 }
 0x383   :  { %3286 = vrot.lane.b32.xlu1 %v8030_v28, %s4149_s21  ;;  %3284 = vrot.lane.b32.xlu0 %v6831_v60, %s4149_s21  ;;  %8031 = vst [vmem:[#allocation27_spill] sm:$0xff] %v7318_v62  ;;  %v3681_v57 = vrot.slane %v3672_v0, 2  ;;  %v3670_v9 = vmul.f32 %v3669_v4, %v6904_v45  ;;  %v7322_v1 = vmul.f32 %v3669_v4, %v6906_v41 }
 0x384   :  { %v3696_v60 = vmul.f32 %v3694_v6, %v6902_v44  ;;  %v3308_v28 = vsel %vm1223_vm1, %v3306_v58, %v3307_v47  ;;  %v3697_v2 = vmul.f32 %v3694_v6, %v6908_v3  ;;  %v3695_v43 = vmul.f32 %v3694_v6, %v6904_v45 }
 0x385   :  { %8032 = vst [vmem:[#allocation44_spill] sm:$0xff] %v7322_v1  ;;  %v7329_v15 = vmul.f32 %v3694_v6, %v6906_v41  ;;  %v7332_v56 = vsel %vm1223_vm1, %v3679_v50, %v3681_v57  ;;  %v3678_v20 = vrot.slane %v3670_v9, 2  ;;  %v7704_v0 = vrot.slane %v7322_v1, 2 }
 0x386   :  { %8034 = vst [vmem:[#allocation62_spill] sm:$0xff] %v7332_v56  ;;  %v3704_v13 = vrot.slane %v3696_v60, 2  ;;  %v3706_v4 = vrot.slane %v3697_v2, 2  ;;  %v3703_v47 = vrot.slane %v3695_v43, 2  ;;  %v3340_v2 = vrot.slane %v7254_v14, 2 }
 0x387   :  { %8033 = vst [vmem:[#allocation61_spill] sm:$0xff] %v7329_v15  ;;  %3315 = vrot.lane.b32.xlu1 %v3310_v10, %s4150_s3  ;;  %3313 = vrot.lane.b32.xlu0 %v3308_v28, %s4150_s3  ;;  %v7703_v58 = vrot.slane %v7329_v15, 2  ;;  %v7339_v62 = vsel %vm1223_vm1, %v3678_v20, %v3679_v50  ;;  %v7344_v6 = vsel %vm1223_vm1, %v3681_v57, %v7704_v0  ;;  %v3339_v50 = vrot.slane %v7258_v23, 2 }
 0x388   :  { %8035 = vst [vmem:[#allocation69_spill] sm:$0xff] %v7339_v62  ;;  %8036 = vst [vmem:[#allocation70_spill] sm:$0xff] %v7344_v6  ;;  %v7347_v9 = vsel %vm1223_vm1, %v3704_v13, %v3706_v4  ;;  %v7350_v60 = vsel %vm1223_vm1, %v3703_v47, %v3704_v13  ;;  %v8040_v57 = vrot.slane %v6835_v36, 2  ;;  %v8041_v13 = vrot.slane %v6844_v35, 2  ;;  %v8043_v36 = vld [vmem:[#allocation28_spill] sm:$0xff] }
 0x389   :  { %8037 = vst [vmem:[#allocation79_spill] sm:$0xff] %v7347_v9  ;;  %8038 = vst [vmem:[#allocation80_spill] sm:$0xff] %v7350_v60  ;;  %v7355_v10 = vsel %vm1223_vm1, %v3706_v4, %v7703_v58  ;;  %v3341_v43 = vsel %vm1223_vm1, %v3339_v50, %v3340_v2  ;;  %v3383_v14 = vstv %s4005_s6  ;;  %v8042_v23 = vrot.slane %v6858_v59, 2 }
 0x38a   :  { %8039 = vst [vmem:[#allocation34_spill] sm:$0xff] %v7355_v10  ;;  %v3343_v28 = vsel %vm1223_vm1, %v3340_v2, %v8041_v13  ;;  %v3384_v35 = vmul.f32 %v3383_v14, %v6904_v45  ;;  %v3387_v20 = vmul.f32 %v3383_v14, %v6906_v41  ;;  %v3386_v4 = vmul.f32 %v3383_v14, %v6908_v3 }
 0x38b   :  { %3319 = vrot.lane.b32.xlu1 %v8040_v57, %s4150_s3  ;;  %3317 = vrot.lane.b32.xlu0 %v6878_v19, %s4150_s3  ;;  %v3385_v19 = vmul.f32 %v3383_v14, %v6902_v44  ;;  %v3409_v47 = vstv %s4006_s15  ;;  %v3435_v13 = vstv %s4007_s16 }
 0x38c   :  { %v3411_v59 = vmul.f32 %v3409_v47, %v6902_v44  ;;  %v3410_v2 = vmul.f32 %v3409_v47, %v6904_v45  ;;  %v3413_v50 = vmul.f32 %v3409_v47, %v6906_v41  ;;  %v3412_v57 = vmul.f32 %v3409_v47, %v6908_v3 }
 0x38d   :  { %v2875_v14 = vstv %s2874_s17  ;;  %v3461_v47 = vstv %s4008_s18 }
 0x38e   :  { %v3462_v58 = vmul.f32 %v3461_v47, %v6904_v45  ;;  %v3464_v60 = vmul.f32 %v3461_v47, %v6908_v3  ;;  %v2877_v9 = vmul.f32 %v2875_v14, %v6578_v40 }
 0x38f   :  { %3348 = vrot.lane.b32.xlu1 %v3343_v28, %s4150_s3  ;;  %3346 = vrot.lane.b32.xlu0 %v3341_v43, %s4150_s3  ;;  %v3437_v28 = vmul.f32 %v3435_v13, %v6902_v44  ;;  %v3436_v43 = vmul.f32 %v3435_v13, %v6904_v45 }
 0x393   :  { %3352 = vrot.lane.b32.xlu1 %v8042_v23, %s4150_s3  ;;  %3350 = vrot.lane.b32.xlu0 %v8043_v36, %s4150_s3  ;;  %v2879_v23 = vmul.f32 %v2875_v14, %v6612_v8  ;;  %v2878_v36 = vmul.f32 %v2875_v14, %v6614_v24 }
 0x397   :  { %3394 = vrot.lane.b32.xlu1 %v3385_v19, %s4149_s21  ;;  %3392 = vrot.lane.b32.xlu0 %v3384_v35, %s4149_s21 }
 0x39b   :  { %3398 = vrot.lane.b32.xlu1 %v3387_v20, %s4149_s21  ;;  %3396 = vrot.lane.b32.xlu0 %v3386_v4, %s4149_s21  ;;  %v3439_v20 = vmul.f32 %v3435_v13, %v6906_v41  ;;  %v3438_v4 = vmul.f32 %v3435_v13, %v6908_v3  ;;  %v2885_v13 = vstv %s3986_s19 }
 0x39c   :  { %v2887_v62 = vmul.f32 %v2885_v13, %v6578_v40  ;;  %v2886_v56 = vmul.f32 %v2885_v13, %v6580_v53 }
 0x39f   :  { %3420 = vrot.lane.b32.xlu1 %v3411_v59, %s4149_s21  ;;  %3418 = vrot.lane.b32.xlu0 %v3410_v2, %s4149_s21  ;;  %v2869_v59 = vstv %s2868_s7 }
 0x3a0   :  { %v2883_v2 = vadd.f32 %v2879_v23, %v2869_v59 }
 0x3a3   :  { %3424 = vrot.lane.b32.xlu1 %v3413_v50, %s4149_s21  ;;  %3422 = vrot.lane.b32.xlu0 %v3412_v57, %s4149_s21  ;;  %v2882_v50 = vadd.f32 %v2878_v36, %v2869_v59  ;;  %v3465_v36 = vmul.f32 %v3461_v47, %v6906_v41 }
 0x3a7   :  { %3446 = vrot.lane.b32.xlu1 %v3437_v28, %s4150_s3  ;;  %3444 = vrot.lane.b32.xlu0 %v3436_v43, %s4150_s3  ;;  %v3463_v43 = vmul.f32 %v3461_v47, %v6902_v44 }
 0x3a9   :  { %v2907_v19 = vpop.permute.xlu1 %2906  ;;  %v2905_v35 = vpop.permute.xlu0 %2904 }
 0x3ab   :  { %3450 = vrot.lane.b32.xlu1 %v3439_v20, %s4150_s3  ;;  %3448 = vrot.lane.b32.xlu0 %v3438_v4, %s4150_s3  ;;  %v2889_v20 = vmul.f32 %v2885_v13, %v6612_v8  ;;  %v2888_v4 = vmul.f32 %v2885_v13, %v6614_v24  ;;  %v3001_v24 = vmul.f32 %v6894_v32, %v6578_v40 }
 0x3ad   :  { %v2911_v57 = vpop.permute.xlu1 %2910  ;;  %v2909_v28 = vpop.permute.xlu0 %2908 }
 0x3ae   :  { %v2919_v0 = vadd.f32 %v2911_v57, %v2883_v2  ;;  %v2918_v10 = vadd.f32 %v2909_v28, %v2882_v50  ;;  %v2876_v2 = vmul.f32 %v2875_v14, %v6580_v53  ;;  %v2872_v50 = vstv %s3985_s20 }
 0x3af   :  { %3472 = vrot.lane.b32.xlu1 %v3463_v43, %s4150_s3  ;;  %3470 = vrot.lane.b32.xlu0 %v3462_v58, %s4150_s3  ;;  %v2893_v58 = vadd.f32 %v2889_v20, %v2872_v50  ;;  %v2892_v57 = vadd.f32 %v2888_v4, %v2872_v50  ;;  %v2881_v43 = vadd.f32 %v2877_v9, %v2869_v59  ;;  %v3009_v4 = vrot.slane %v3001_v24, 1 }
 0x3b0   :  { %v2880_v6 = vadd.f32 %v2876_v2, %v2869_v59  ;;  %v8044_v59 = vrot.slane %v6943_v39, 1  ;;  %v2891_v13 = vadd.f32 %v2887_v62, %v2872_v50  ;;  %v8047_v39 = vld [vmem:[#allocation30_spill] sm:$0xff] }
 0x3b1   :  { %v2933_v15 = vpop.permute.xlu1 %2932  ;;  %v2931_v23 = vpop.permute.xlu0 %2930  ;;  %v2917_v14 = vadd.f32 %v2907_v19, %v2881_v43  ;;  %v8048_v43 = vrot.slane %v7014_v11, 1 }
 0x3b2   :  { %v2943_v24 = vadd.f32 %v2933_v15, %v2891_v13 }
 0x3b3   :  { %3476 = vrot.lane.b32.xlu1 %v3465_v36, %s4150_s3  ;;  %3474 = vrot.lane.b32.xlu0 %v3464_v60, %s4150_s3  ;;  %v2916_v36 = vadd.f32 %v2905_v35, %v2880_v6 }
 0x3b5   :  { %v2937_v8 = vpop.permute.xlu1 %2936  ;;  %v2935_v28 = vpop.permute.xlu0 %2934 }
 0x3b6   :  { %v2945_v1 = vadd.f32 %v2937_v8, %v2893_v58  ;;  %v2944_v47 = vadd.f32 %v2935_v28, %v2892_v57  ;;  %v3026_v58 = vmul.f32 %v6897_v48, %v6578_v40  ;;  %v2890_v57 = vadd.f32 %v2886_v56, %v2872_v50 }
 0x3b7   :  { %3555 = vrot.lane.b32.xlu1 %v6965_v49, %s4149_s21  ;;  %3553 = vrot.lane.b32.xlu0 %v6968_v52, %s4149_s21  ;;  %v8045_v49 = vld [vmem:[#allocation25_spill] sm:$0xff]  ;;  %v8046_v52 = vrot.slane %v6987_v54, 1  ;;  %v3000_v54 = vmul.f32 %v6894_v32, %v6580_v53 }
 0x3b9   :  { %v2959_v60 = vpop.permute.xlu1 %2958  ;;  %v2957_v20 = vpop.permute.xlu0 %2956  ;;  %v3012_v6 = vsel %vm221_vm0, %v3009_v4, %v8046_v52  ;;  %v3008_v32 = vrot.slane %v3000_v54, 1 }
 0x3ba   :  { %v2969_v12 = vadd.f32 %v2959_v60, %v2917_v14  ;;  %v2968_v9 = vadd.f32 %v2957_v20, %v2916_v36  ;;  %v8049_v60 = vrot.slane %v6961_v27, 1 }
 0x3bb   :  { %3559 = vrot.lane.b32.xlu1 %v8044_v59, %s4149_s21  ;;  %3557 = vrot.lane.b32.xlu0 %v8045_v49, %s4149_s21  ;;  %v3010_v27 = vsel %vm221_vm0, %v3008_v32, %v3009_v4 }
 0x3bc   :  { %v3020_v19 = vadd.f32 %v3012_v6, %v2969_v12  ;;  %v2942_v12 = vadd.f32 %v2931_v23, %v2890_v57  ;;  %v3019_v49 = vadd.f32 %v3010_v27, %v2968_v9 }
 0x3bd   :  { %v2963_v35 = vpop.permute.xlu1 %2962  ;;  %v2961_v2 = vpop.permute.xlu0 %2960 }
 0x3be   :  { %v2971_v8 = vadd.f32 %v2963_v35, %v2919_v0  ;;  %v2970_v28 = vadd.f32 %v2961_v2, %v2918_v10  ;;  %v3034_v0 = vrot.slane %v3026_v58, 1 }
 0x3bf   :  { %3588 = vrot.lane.b32.xlu1 %v8047_v39, %s4149_s21  ;;  %3586 = vrot.lane.b32.xlu0 %v6990_v46, %s4149_s21  ;;  %v8050_v46 = vrot.slane %v7038_v25, 1  ;;  %v8051_v25 = vrot.slane %v7066_v51, 1  ;;  %v8055_v51 = vld [vmem:[#allocation21_spill] sm:$0xff] }
 0x3c0   :  { %v3022_v14 = vadd.f32 %v8048_v43, %v2971_v8  ;;  %v3021_v36 = vadd.f32 %v7047_v37, %v2970_v28 }
 0x3c1   :  { %v2985_v62 = vpop.permute.xlu1 %2984  ;;  %v2983_v56 = vpop.permute.xlu0 %2982  ;;  %v3037_v11 = vsel %vm221_vm0, %v3034_v0, %v8050_v46 }
 0x3c2   :  { %v2995_v10 = vadd.f32 %v2985_v62, %v2943_v24  ;;  %v2994_v50 = vadd.f32 %v2983_v56, %v2942_v12  ;;  %v8057_v12 = vld [vmem:[#allocation49_spill] sm:$0xff]  ;;  %v3183_v56 = vmul.f32 %v6900_v63, %v6578_v40 }
 0x3c3   :  { %3592 = vrot.lane.b32.xlu1 %v8049_v60, %s4149_s21  ;;  %3590 = vrot.lane.b32.xlu0 %v6995_v5, %s4149_s21  ;;  %v3025_v5 = vmul.f32 %v6897_v48, %v6580_v53  ;;  %v8058_v43 = vrot.slane %v8057_v12, 1 }
 0x3c4   :  { %v3045_v15 = vadd.f32 %v3037_v11, %v2995_v10  ;;  %v3191_v46 = vrot.slane %v3183_v56, 2 }
 0x3c5   :  { %v2989_v23 = vpop.permute.xlu1 %2988  ;;  %v2987_v37 = vpop.permute.xlu0 %2986  ;;  %v3033_v4 = vrot.slane %v3025_v5, 1 }
 0x3c6   :  { %v2997_v20 = vadd.f32 %v2989_v23, %v2945_v1  ;;  %v2996_v59 = vadd.f32 %v2987_v37, %v2944_v47  ;;  %v8061_v23 = vrot.slane %v7097_v17, 2  ;;  %v8062_v37 = vrot.slane %v7153_v30, 2  ;;  %v8063_v17 = vld [vmem:[#allocation78_spill] sm:$0xff] }
 0x3c7   :  { %3621 = vrot.lane.b32.xlu1 %v7009_v18, %s4150_s3  ;;  %3619 = vrot.lane.b32.xlu0 %v7022_v33, %s4150_s3  ;;  %v8052_v18 = vld [vmem:[#allocation29_spill] sm:$0xff]  ;;  %v8054_v33 = vld [vmem:[#allocation48_spill] sm:$0xff]  ;;  %v8064_v30 = vrot.slane %v7175_v42, 2 }
 0x3c8   :  { %v3047_v52 = vadd.f32 %v8051_v25, %v2997_v20  ;;  %v3046_v6 = vadd.f32 %v7104_v31, %v2996_v59  ;;  %v8053_v58 = vrot.slane %v8052_v18, 1  ;;  %v8056_v31 = vld [vmem:[#allocation55_spill] sm:$0xff]  ;;  %v3194_v20 = vsel %vm1223_vm1, %v3191_v46, %v8062_v37 }
 0x3c9   :  { %v3068_v35 = vpop.permute.xlu1 %3067  ;;  %v3066_v1 = vpop.permute.xlu0 %3065  ;;  %v8080_v37 = vld [vmem:[#allocation67_spill] sm:$0xff] }
 0x3ca   :  { %v3078_v47 = vadd.f32 %v3068_v35, %v3020_v19  ;;  %v3077_v2 = vadd.f32 %v3066_v1, %v3019_v49  ;;  %v3035_v19 = vsel %vm221_vm0, %v3033_v4, %v3034_v0  ;;  %v8060_v0 = vld [vmem:[#allocation77_spill] sm:$0xff] }
 0x3cb   :  { %3625 = vrot.lane.b32.xlu1 %v8053_v58, %s4150_s3  ;;  %3623 = vrot.lane.b32.xlu0 %v8054_v33, %s4150_s3  ;;  %v3044_v8 = vadd.f32 %v3035_v19, %v2994_v50  ;;  %v8066_v58 = vld [vmem:[#allocation76_spill] sm:$0xff]  ;;  %v8071_v19 = vld [vmem:[#allocation31_spill] sm:$0xff] }
 0x3cc   :  { %v8067_v33 = vrot.slane %v8066_v58, 2 }
 0x3cd   :  { %v3072_v13 = vpop.permute.xlu1 %3071  ;;  %v3070_v48 = vpop.permute.xlu0 %3069 }
 0x3ce   :  { %v3080_v9 = vadd.f32 %v3072_v13, %v3022_v14  ;;  %v3079_v57 = vadd.f32 %v3070_v48, %v3021_v36  ;;  %v8059_v14 = vld [vmem:[#allocation75_spill] sm:$0xff]  ;;  %v8069_v13 = vld [vmem:[#allocation37_spill] sm:$0xff] }
 0x3cf   :  { %3654 = vrot.lane.b32.xlu1 %v8055_v51, %s4150_s3  ;;  %3652 = vrot.lane.b32.xlu0 %v8056_v31, %s4150_s3 }
 0x3d1   :  { %v3101_v28 = vpop.permute.xlu1 %3100  ;;  %v3099_v39 = vpop.permute.xlu0 %3098 }
 0x3d2   :  { %v3111_v54 = vadd.f32 %v3101_v28, %v3045_v15  ;;  %v3110_v24 = vadd.f32 %v3099_v39, %v3044_v8  ;;  %v8072_v8 = vld [vmem:[#allocation53_spill] sm:$0xff]  ;;  %v3207_v39 = vmul.f32 %v6918_v34, %v6580_v53 }
 0x3d3   :  { %3658 = vrot.lane.b32.xlu1 %v8058_v43, %s4150_s3  ;;  %3656 = vrot.lane.b32.xlu0 %v8059_v14, %s4150_s3  ;;  %v8075_v14 = vld [vmem:[#allocation26_spill] sm:$0xff] }
 0x3d5   :  { %v3105_v36 = vpop.permute.xlu1 %3104  ;;  %v3103_v62 = vpop.permute.xlu0 %3102 }
 0x3d6   :  { %v3113_v10 = vadd.f32 %v3105_v36, %v3047_v52  ;;  %v3112_v60 = vadd.f32 %v3103_v62, %v3046_v6  ;;  %v8065_v6 = vld [vmem:[#allocation32_spill] sm:$0xff] }
 0x3d7   :  { %3737 = vrot.lane.b32.xlu1 %v8060_v0, %s4149_s21  ;;  %3735 = vrot.lane.b32.xlu0 %v7121_v38, %s4149_s21  ;;  %v3208_v38 = vmul.f32 %v6918_v34, %v6578_v40  ;;  %v8076_v0 = vld [vmem:[#allocation50_spill] sm:$0xff] }
 0x3d9   :  { %v3134_v50 = vpop.permute.xlu1 %3133  ;;  %v3132_v32 = vpop.permute.xlu0 %3131 }
 0x3da   :  { %v3144_v11 = vadd.f32 %v3134_v50, %v3078_v47  ;;  %v3143_v15 = vadd.f32 %v3132_v32, %v3077_v2  ;;  %v3216_v2 = vrot.slane %v3208_v38, 2  ;;  %v8077_v50 = vrot.slane %v8076_v0, 2  ;;  %v8078_v32 = vld [vmem:[#allocation56_spill] sm:$0xff] }
 0x3db   :  { %3741 = vrot.lane.b32.xlu1 %v8061_v23, %s4149_s21  ;;  %3739 = vrot.lane.b32.xlu0 %v7130_v55, %s4149_s21  ;;  %v3182_v55 = vmul.f32 %v6900_v63, %v6580_v53  ;;  %v8070_v63 = vrot.slane %v8069_v13, 2  ;;  %v8079_v23 = vld [vmem:[#allocation39_spill] sm:$0xff] }
 0x3dc   :  { %v3202_v59 = vadd.f32 %v3194_v20, %v3144_v11 }
 0x3dd   :  { %v3138_v27 = vpop.permute.xlu1 %3137  ;;  %v3136_v5 = vpop.permute.xlu0 %3135  ;;  %v3190_v4 = vrot.slane %v3182_v55, 2  ;;  %v3219_v42 = vsel %vm1223_vm1, %v3216_v2, %v8070_v63  ;;  %v8083_v55 = vld [vmem:[#allocation68_spill] sm:$0xff] }
 0x3de   :  { %v3146_v49 = vadd.f32 %v3138_v27, %v3080_v9  ;;  %v3145_v25 = vadd.f32 %v3136_v5, %v3079_v57 }
 0x3df   :  { %3770 = vrot.lane.b32.xlu1 %v7141_v29, %s4149_s21  ;;  %3768 = vrot.lane.b32.xlu0 %v8063_v17, %s4149_s21  ;;  %v8068_v29 = vld [vmem:[#allocation46_spill] sm:$0xff]  ;;  %v3192_v28 = vsel %vm1223_vm1, %v3190_v4, %v3191_v46  ;;  %v3215_v46 = vrot.slane %v3207_v39, 2 }
 0x3e0   :  { %v3204_v52 = vadd.f32 %v8064_v30, %v3146_v49  ;;  %v3203_v35 = vadd.f32 %v8065_v6, %v3145_v25  ;;  %v8081_v25 = vld [vmem:[#allocation59_spill] sm:$0xff] }
 0x3e1   :  { %v3167_v1 = vpop.permute.xlu1 %3166  ;;  %v3165_v47 = vpop.permute.xlu0 %3164  ;;  %v3217_v20 = vsel %vm1223_vm1, %v3215_v46, %v3216_v2  ;;  %v8082_v17 = vrot.slane %v8081_v25, 2 }
 0x3e2   :  { %v3177_v40 = vadd.f32 %v3167_v1, %v3111_v54  ;;  %v3176_v18 = vadd.f32 %v3165_v47, %v3110_v24  ;;  %v3201_v54 = vadd.f32 %v3192_v28, %v3143_v15  ;;  %v8073_v24 = vld [vmem:[#allocation60_spill] sm:$0xff] }
 0x3e3   :  { %3774 = vrot.lane.b32.xlu1 %v8067_v33, %s4149_s21  ;;  %3772 = vrot.lane.b32.xlu0 %v8068_v29, %s4149_s21  ;;  %v8074_v12 = vrot.slane %v8073_v24, 2  ;;  %s4003_s21 = sld [smem:[#allocation11 + $0x9]] }
 0x3e4   :  { %v3227_v48 = vadd.f32 %v3219_v42, %v3177_v40 }
 0x3e5   :  { %v3171_v9 = vpop.permute.xlu1 %3170  ;;  %v3169_v57 = vpop.permute.xlu0 %3168 }
 0x3e6   :  { %v3179_v51 = vadd.f32 %v3171_v9, %v3113_v10  ;;  %v3178_v31 = vadd.f32 %v3169_v57, %v3112_v60 }
 0x3e7   :  { %3803 = vrot.lane.b32.xlu1 %v8071_v19, %s4150_s3  ;;  %3801 = vrot.lane.b32.xlu0 %v8072_v8, %s4150_s3 }
 0x3e8   :  { %v3229_v43 = vadd.f32 %v8074_v12, %v3179_v51  ;;  %v3228_v36 = vadd.f32 %v8075_v14, %v3178_v31  ;;  %v3373_v51 = vstv %s4004_s22 }
 0x3e9   :  { %v3250_v62 = vpop.permute.xlu1 %3249  ;;  %v3248_v56 = vpop.permute.xlu0 %3247  ;;  %v3363_v1 = vstv %s4003_s21  ;;  %v3375_v24 = vmul.f32 %v3373_v51, %v6902_v44  ;;  %v3374_v12 = vmul.f32 %v3373_v51, %v6904_v45  ;;  %v3376_v0 = vmul.f32 %v3373_v51, %v6908_v3 }
 0x3ea   :  { %v3260_v10 = vadd.f32 %v3250_v62, %v3202_v59  ;;  %v3259_v60 = vadd.f32 %v3248_v56, %v3201_v54  ;;  %v3226_v59 = vadd.f32 %v3217_v20, %v3176_v18  ;;  %v3365_v58 = vmul.f32 %v3363_v1, %v6902_v44 }
 0x3eb   :  { %3807 = vrot.lane.b32.xlu1 %v8077_v50, %s4150_s3  ;;  %3805 = vrot.lane.b32.xlu0 %v8078_v32, %s4150_s3  ;;  %v3364_v33 = vmul.f32 %v3363_v1, %v6904_v45  ;;  %v3367_v9 = vmul.f32 %v3363_v1, %v6906_v41  ;;  %v3366_v57 = vmul.f32 %v3363_v1, %v6908_v3 }
 0x3ed   :  { %v3254_v11 = vpop.permute.xlu1 %3253  ;;  %v3252_v53 = vpop.permute.xlu0 %3251 }
 0x3ee   :  { %v3262_v34 = vadd.f32 %v3254_v11, %v3204_v52  ;;  %v3261_v15 = vadd.f32 %v3252_v53, %v3203_v35 }
 0x3ef   :  { %3836 = vrot.lane.b32.xlu1 %v8079_v23, %s4150_s3  ;;  %3834 = vrot.lane.b32.xlu0 %v8080_v37, %s4150_s3 }
 0x3f1   :  { %v3283_v27 = vpop.permute.xlu1 %3282  ;;  %v3281_v5 = vpop.permute.xlu0 %3280 }
 0x3f2   :  { %v3293_v38 = vadd.f32 %v3283_v27, %v3227_v48  ;;  %v3292_v49 = vadd.f32 %v3281_v5, %v3226_v59 }
 0x3f3   :  { %3840 = vrot.lane.b32.xlu1 %v8082_v17, %s4150_s3  ;;  %3838 = vrot.lane.b32.xlu0 %v8083_v55, %s4150_s3 }
 0x3f5   :  { %v3287_v30 = vpop.permute.xlu1 %3286  ;;  %v3285_v52 = vpop.permute.xlu0 %3284 }
 0x3f6   :  { %v3295_v6 = vadd.f32 %v3287_v30, %v3229_v43  ;;  %v3294_v35 = vadd.f32 %v3285_v52, %v3228_v36 }
 0x3f9   :  { %v3316_v47 = vpop.permute.xlu1 %3315  ;;  %v3314_v2 = vpop.permute.xlu0 %3313 }
 0x3fa   :  { %v3326_v40 = vadd.f32 %v3316_v47, %v3260_v10  ;;  %v3325_v18 = vadd.f32 %v3314_v2, %v3259_v60  ;;  %v3377_v60 = vmul.f32 %v3373_v51, %v6906_v41  ;;  %v8084_v2 = vrot.slane %v7279_v26, 1 }
 0x3fc   :  { %v3369_v29 = vadd.f32 %v3365_v58, %v3326_v40  ;;  %v3368_v4 = vadd.f32 %v3364_v33, %v3325_v18 }
 0x3fd   :  { %v3320_v13 = vpop.permute.xlu1 %3319  ;;  %v3318_v63 = vpop.permute.xlu0 %3317 }
 0x3fe   :  { %v3328_v42 = vadd.f32 %v3320_v13, %v3262_v34  ;;  %v3327_v48 = vadd.f32 %v3318_v63, %v3261_v15 }
 0x400   :  { %v3371_v31 = vadd.f32 %v3367_v9, %v3328_v42  ;;  %v3370_v19 = vadd.f32 %v3366_v57, %v3327_v48  ;;  %v8085_v9 = vld [vmem:[#allocation33_spill] sm:$0xff] }
 0x401   :  { %v3349_v8 = vpop.permute.xlu1 %3348  ;;  %v3347_v28 = vpop.permute.xlu0 %3346  ;;  %v8086_v57 = vrot.slane %v8085_v9, 1 }
 0x402   :  { %v3359_v39 = vadd.f32 %v3349_v8, %v3293_v38  ;;  %v3358_v54 = vadd.f32 %v3347_v28, %v3292_v49 }
 0x404   :  { %v3379_v43 = vadd.f32 %v3375_v24, %v3359_v39  ;;  %v3378_v14 = vadd.f32 %v3374_v12, %v3358_v54 }
 0x405   :  { %v3353_v36 = vpop.permute.xlu1 %3352  ;;  %v3351_v62 = vpop.permute.xlu0 %3350 }
 0x406   :  { %v3361_v56 = vadd.f32 %v3353_v36, %v3295_v6  ;;  %v3360_v10 = vadd.f32 %v3351_v62, %v3294_v35 }
 0x408   :  { %v3381_v50 = vadd.f32 %v3377_v60, %v3361_v56  ;;  %v3380_v32 = vadd.f32 %v3376_v0, %v3360_v10  ;;  %v8088_v60 = vld [vmem:[#allocation62_spill] sm:$0xff] }
 0x409   :  { %v3395_v46 = vpop.permute.xlu1 %3394  ;;  %v3393_v11 = vpop.permute.xlu0 %3392 }
 0x40a   :  { %v3405_v53 = vadd.f32 %v3395_v46, %v3369_v29  ;;  %v3404_v34 = vadd.f32 %v3393_v11, %v3368_v4 }
 0x40d   :  { %v3399_v15 = vpop.permute.xlu1 %3398  ;;  %v3397_v44 = vpop.permute.xlu0 %3396 }
 0x40e   :  { %v3407_v23 = vadd.f32 %v3399_v15, %v3371_v31  ;;  %v3406_v45 = vadd.f32 %v3397_v44, %v3370_v19  ;;  %v8087_v31 = vld [vmem:[#allocation27_spill] sm:$0xff] }
 0x411   :  { %v3421_v37 = vpop.permute.xlu1 %3420  ;;  %v3419_v20 = vpop.permute.xlu0 %3418 }
 0x412   :  { %v3431_v59 = vadd.f32 %v3421_v37, %v3379_v43  ;;  %v3430_v27 = vadd.f32 %v3419_v20, %v3378_v14  ;;  %v8092_v20 = vld [vmem:[#allocation70_spill] sm:$0xff] }
 0x415   :  { %v3425_v5 = vpop.permute.xlu1 %3424  ;;  %v3423_v38 = vpop.permute.xlu0 %3422 }
 0x416   :  { %v3433_v49 = vadd.f32 %v3425_v5, %v3381_v50  ;;  %v3432_v41 = vadd.f32 %v3423_v38, %v3380_v32  ;;  %v8089_v50 = vld [vmem:[#allocation69_spill] sm:$0xff] }
 0x419   :  { %v3447_v25 = vpop.permute.xlu1 %3446  ;;  %v3445_v3 = vpop.permute.xlu0 %3444 }
 0x41a   :  { %v3457_v17 = vadd.f32 %v3447_v25, %v3405_v53  ;;  %v3456_v55 = vadd.f32 %v3445_v3, %v3404_v34  ;;  %v8093_v3 = vld [vmem:[#allocation79_spill] sm:$0xff] }
 0x41c   :  { %v3508_v30 = vadd.f32 %v7293_v61, %v3457_v17  ;;  %v3507_v52 = vadd.f32 %v7296_v7, %v3456_v55  ;;  %v8094_v55 = vld [vmem:[#allocation80_spill] sm:$0xff] }
 0x41d   :  { %v3451_v6 = vpop.permute.xlu1 %3450  ;;  %v3449_v35 = vpop.permute.xlu0 %3448 }
 0x41e   :  { %v3459_v1 = vadd.f32 %v3451_v6, %v3407_v23  ;;  %v3458_v47 = vadd.f32 %v3449_v35, %v3406_v45  ;;  %v8090_v23 = vld [vmem:[#allocation44_spill] sm:$0xff] }
 0x41f   :  { %v8091_v45 = vrot.slane %v8090_v23, 2 }
 0x420   :  { %v3510_v40 = vadd.f32 %v8084_v2, %v3459_v1  ;;  %v3509_v18 = vadd.f32 %v7301_v21, %v3458_v47  ;;  %v8095_v47 = vld [vmem:[#allocation61_spill] sm:$0xff] }
 0x421   :  { %v3473_v58 = vpop.permute.xlu1 %3472  ;;  %v3471_v33 = vpop.permute.xlu0 %3470  ;;  %v8096_v2 = vrot.slane %v8095_v47, 2 }
 0x422   :  { %v3483_v29 = vadd.f32 %v3473_v58, %v3431_v59  ;;  %v3482_v4 = vadd.f32 %v3471_v33, %v3430_v27 }
 0x424   :  { %v3533_v13 = vadd.f32 %v7310_v16, %v3483_v29  ;;  %v3532_v63 = vadd.f32 %v7313_v22, %v3482_v4 }
 0x425   :  { %v3477_v61 = vpop.permute.xlu1 %3476  ;;  %v3475_v42 = vpop.permute.xlu0 %3474 }
 0x426   :  { %v3485_v7 = vadd.f32 %v3477_v61, %v3433_v49  ;;  %v3484_v48 = vadd.f32 %v3475_v42, %v3432_v41 }
 0x428   :  { %v3535_v51 = vadd.f32 %v8086_v57, %v3485_v7  ;;  %v3534_v26 = vadd.f32 %v8087_v31, %v3484_v48 }
 0x429   :  { %v3556_v19 = vpop.permute.xlu1 %3555  ;;  %v3554_v8 = vpop.permute.xlu0 %3553 }
 0x42a   :  { %v3566_v16 = vadd.f32 %v3556_v19, %v3508_v30  ;;  %v3565_v43 = vadd.f32 %v3554_v8, %v3507_v52 }
 0x42d   :  { %v3560_v21 = vpop.permute.xlu1 %3559  ;;  %v3558_v28 = vpop.permute.xlu0 %3557 }
 0x42e   :  { %v3568_v56 = vadd.f32 %v3560_v21, %v3510_v40  ;;  %v3567_v10 = vadd.f32 %v3558_v28, %v3509_v18  ;;  %v8097_v18 = vld [vmem:[#allocation34_spill] sm:$0xff] }
 0x431   :  { %v3589_v39 = vpop.permute.xlu1 %3588  ;;  %v3587_v54 = vpop.permute.xlu0 %3586 }
 0x432   :  { %v3599_v15 = vadd.f32 %v3589_v39, %v3533_v13  ;;  %v3598_v44 = vadd.f32 %v3587_v54, %v3532_v63 }
 0x435   :  { %v3593_v24 = vpop.permute.xlu1 %3592  ;;  %v3591_v12 = vpop.permute.xlu0 %3590 }
 0x436   :  { %v3601_v41 = vadd.f32 %v3593_v24, %v3535_v51  ;;  %v3600_v25 = vadd.f32 %v3591_v12, %v3534_v26 }
 0x439   :  { %v3622_v22 = vpop.permute.xlu1 %3621  ;;  %v3620_v14 = vpop.permute.xlu0 %3619 }
 0x43a   :  { %v3632_v36 = vadd.f32 %v3622_v22, %v3566_v16  ;;  %v3631_v62 = vadd.f32 %v3620_v14, %v3565_v43 }
 0x43c   :  { %v3690_v0 = vadd.f32 %v8088_v60, %v3632_v36  ;;  %v3689_v32 = vadd.f32 %v8089_v50, %v3631_v62 }
 0x43d   :  { %v3626_v46 = vpop.permute.xlu1 %3625  ;;  %v3624_v11 = vpop.permute.xlu0 %3623 }
 0x43e   :  { %v3634_v53 = vadd.f32 %v3626_v46, %v3568_v56  ;;  %v3633_v34 = vadd.f32 %v3624_v11, %v3567_v10 }
 0x440   :  { %v3692_v37 = vadd.f32 %v8091_v45, %v3634_v53  ;;  %v3691_v59 = vadd.f32 %v8092_v20, %v3633_v34 }
 0x441   :  { %v3655_v27 = vpop.permute.xlu1 %3654  ;;  %v3653_v5 = vpop.permute.xlu0 %3652 }
 0x442   :  { %v3665_v38 = vadd.f32 %v3655_v27, %v3599_v15  ;;  %v3664_v49 = vadd.f32 %v3653_v5, %v3598_v44 }
 0x444   :  { %v3715_v17 = vadd.f32 %v8093_v3, %v3665_v38  ;;  %v3714_v30 = vadd.f32 %v8094_v55, %v3664_v49 }
 0x445   :  { %v3659_v52 = vpop.permute.xlu1 %3658  ;;  %v3657_v6 = vpop.permute.xlu0 %3656 }
 0x446   :  { %v3667_v35 = vadd.f32 %v3659_v52, %v3601_v41  ;;  %v3666_v1 = vadd.f32 %v3657_v6, %v3600_v25 }
 0x448   :  { %v3717_v40 = vadd.f32 %v8096_v2, %v3667_v35  ;;  %v3716_v58 = vadd.f32 %v8097_v18, %v3666_v1 }
 0x449   :  { %v3738_v33 = vpop.permute.xlu1 %3737  ;;  %v3736_v29 = vpop.permute.xlu0 %3735 }
 0x44a   :  { %v3748_v48 = vadd.f32 %v3738_v33, %v3690_v0  ;;  %v3747_v9 = vadd.f32 %v3736_v29, %v3689_v32 }
 0x44d   :  { %v3742_v4 = vpop.permute.xlu1 %3741  ;;  %v3740_v13 = vpop.permute.xlu0 %3739 }
 0x44e   :  { %v3750_v19 = vadd.f32 %v3742_v4, %v3692_v37  ;;  %v3749_v8 = vadd.f32 %v3740_v13, %v3691_v59 }
 0x451   :  { %v3771_v63 = vpop.permute.xlu1 %3770  ;;  %v3769_v61 = vpop.permute.xlu0 %3768 }
 0x452   :  { %v3781_v16 = vadd.f32 %v3771_v63, %v3715_v17  ;;  %v3780_v43 = vadd.f32 %v3769_v61, %v3714_v30 }
 0x455   :  { %v3775_v42 = vpop.permute.xlu1 %3774  ;;  %v3773_v7 = vpop.permute.xlu0 %3772 }
 0x456   :  { %v3783_v60 = vadd.f32 %v3775_v42, %v3717_v40  ;;  %v3782_v0 = vadd.f32 %v3773_v7, %v3716_v58 }
 0x459   :  { %v3804_v57 = vpop.permute.xlu1 %3803  ;;  %v3802_v51 = vpop.permute.xlu0 %3801 }
 0x45a   :  { %v3814_v31 = vadd.f32 %v3804_v57, %v3748_v48  ;;  %v3813_v26 = vadd.f32 %v3802_v51, %v3747_v9 }
 0x45c   :  { %v3851_v21 = vmax.f32 %v3814_v31, 0.0  ;;  %v3850_v28 = vmax.f32 %v3813_v26, 0.0 }
 0x45d   :  { %v3808_v39 = vpop.permute.xlu1 %3807  ;;  %v3806_v54 = vpop.permute.xlu0 %3805 }
 0x45e   :  { %3860 = vst.msk [vmem:[%s7599_s8 + $0x8] sm:$0xff] %vm3858_vm2, %v3851_v21  ;;  %3859 = vst.msk [vmem:[%s7599_s8] sm:$0xff] %vm3858_vm2, %v3850_v28  ;;  %v3816_v24 = vadd.f32 %v3808_v39, %v3750_v19  ;;  %v3815_v12 = vadd.f32 %v3806_v54, %v3749_v8 }
 0x460   :  { %v3853_v22 = vmax.f32 %v3816_v24, 0.0  ;;  %v3852_v14 = vmax.f32 %v3815_v12, 0.0 }
 0x461   :  { %v3837_v36 = vpop.permute.xlu1 %3836  ;;  %v3835_v62 = vpop.permute.xlu0 %3834 }
 0x462   :  { %3863 = vst.msk [vmem:[%s7599_s8 + $0x18] sm:$0x7] %vm3862_vm3, %v3853_v22  ;;  %v3847_v56 = vadd.f32 %v3837_v36, %v3781_v16  ;;  %v3846_v10 = vadd.f32 %v3835_v62, %v3780_v43 }
 0x463   :  { %3861 = vst.msk [vmem:[%s7599_s8 + $0x10] sm:$0xff] %vm3858_vm2, %v3852_v14 }
 0x464   :  { %v3855_v50 = vmax.f32 %v3847_v56, 0.0  ;;  %v3854_v32 = vmax.f32 %v3846_v10, 0.0 }
 0x465   :  { %v3841_v46 = vpop.permute.xlu1 %3840  ;;  %v3839_v11 = vpop.permute.xlu0 %3838 }
 0x466   :  { %3865 = vst.msk [vmem:[%s7599_s8 + $0x28] sm:$0xff] %vm3858_vm2, %v3855_v50  ;;  %3864 = vst.msk [vmem:[%s7599_s8 + $0x20] sm:$0xff] %vm3858_vm2, %v3854_v32  ;;  %v3849_v53 = vadd.f32 %v3841_v46, %v3783_v60  ;;  %v3848_v34 = vadd.f32 %v3839_v11, %v3782_v0 }
 0x468   :  { %v3857_v15 = vmax.f32 %v3849_v53, 0.0  ;;  %v3856_v44 = vmax.f32 %v3848_v34, 0.0 }
 0x46a   :  { %3867 = vst.msk [vmem:[%s7599_s8 + $0x38] sm:$0x7] %vm3862_vm3, %v3857_v15 }
 0x46b   :  { %3866 = vst.msk [vmem:[%s7599_s8 + $0x30] sm:$0xff] %vm3858_vm2, %v3856_v44 }
 0x46c   :  { %3872 = vsyncpa [#allocation3], 1 }
 0x46d   :  { %3873 = vsyncpa [#allocation4], 1 }
 0x46e   :  { %3874 = vsyncpa [#allocation7], 1 }
 0x46f   :  { %3875 = vsyncpa [#allocation10], 1 }
 0x470   :  { %3876 = vsyncpa [#allocation13], 1 }

</bundles_post_ra>
